<compile_context>
chip_gen: v6e
topology: v6e:2x2x1
jax: 0.10.0
libtpu: 0.0.40
codegen_flags: <defaults>
</compile_context>

<pallas_src>
import functools

import jax
import jax.numpy as jnp
from jax.experimental import pallas as pl
from jax.experimental.pallas import tpu as pltpu

LANE = 128             # TPU lane width (fast axis)
SUB = 8                # TPU sublane granularity
OUT_PAD = 128          # lane-dense padded width of the final (10-wide) output
REAL_OUT = 10          # real output width of final_linear


def _round_up(x, m):
    return (x + m - 1) // m * m


# --------------------------------------------------------------------------- #
# Kernel
# --------------------------------------------------------------------------- #
def make_widedeep_kernel(cfg, *, precision=None):
    num_sparse = cfg["num_sparse"]
    E = cfg["E"]
    V_pad = cfg["V_pad"]
    dense_w = cfg["dense_w"]
    num_feat = cfg["num_feat"]
    dense_row_off = cfg["dense_row_off"]
    layers = cfg["layers"]          # tuple of (in_dim, out_cols, col_off, relu)
    ww_off = cfg["ww_off"]
    bw_off = cfg["bw_off"]

    def dot(a, b):
        return jnp.dot(a, b, preferred_element_type=jnp.float32,
                       precision=precision)

    def kernel(x_ref, emb_ref, w_ref, misc_ref, out_ref):
        x = x_ref[...]                                    # (Bt, num_feat) f32
        dense = x[:, :dense_w]                            # (Bt, dense_w)
        idx = x[:, dense_w:num_feat].astype(jnp.int32)    # torch .long() (trunc)

        # ----- DNN layer 0: fused one-hot embedding gather + split-K matmul ---
        # dense columns of the concat map to rows [dense_row_off, +dense_w) of W0
        _, out0, col0, relu0 = layers[0]
        acc = dot(dense,
                  w_ref[dense_row_off:dense_row_off + dense_w, col0:col0 + out0])
        # (1, V_pad) iota = one sublane group; broadcast happens in the compare,
        # so no (Bt, V_pad) int32 constant stays live across the feature loop.
        iota = jax.lax.broadcasted_iota(jnp.int32, (1, V_pad), 1)
        for i in range(num_sparse):
            oh = (idx[:, i:i + 1] == iota).astype(jnp.float32)    # (Bt, V_pad)
            emb_i = dot(oh, emb_ref[:, i * E:(i + 1) * E])        # (Bt, E)
            acc = acc + dot(emb_i, w_ref[i * E:(i + 1) * E, col0:col0 + out0])
        acc = acc + misc_ref[0:1, col0:col0 + out0]
        h = jnp.maximum(acc, 0.0) if relu0 else acc

        # ----- remaining DNN layers + final linear (OUT_PAD lane-dense) -------
        # All column offsets are 128-aligned -> aligned slices of the slabs.
        for (in_d, out_d, coff, relu) in layers[1:]:
            z = dot(h, w_ref[0:in_d, coff:coff + out_d]) \
                + misc_ref[0:1, coff:coff + out_d]
            h = jnp.maximum(z, 0.0) if relu else z
        deep = h                                           # (Bt, OUT_PAD)

        # ----- wide path on the VPU/XLU (no tiny N=1 MXU matmul) --------------
        ww = misc_ref[0:1, ww_off:ww_off + dense_w]        # (1, dense_w)
        bw = misc_ref[0:1, bw_off:bw_off + 1]              # (1, 1)
        wide = jnp.sum(dense * ww, axis=-1, keepdims=True) + bw   # (Bt, 1)

        # (Bt,1) + (Bt,OUT_PAD) broadcast, exactly like PyTorch; columns >= 10
        # hold 0.5*wide junk and are sliced off outside the kernel.
        out_ref[...] = 0.5 * (wide + deep)

    return kernel


# --------------------------------------------------------------------------- #
# Parameter packing (done once, outside the per-call forward)
# --------------------------------------------------------------------------- #
def pack_params(params, *, num_embeddings, embedding_dim, hidden_units,
                num_dense, num_sparse):
    E = embedding_dim
    dense_w = num_dense + 1
    emb_total = num_sparse * E
    V_pad = _round_up(max(num_embeddings), SUB)
    dense_row_off = _round_up(emb_total, SUB)     # 8-aligned dense-weight rows

    # Layer stack: DNN layers (relu) then final linear (no relu, OUT_PAD lanes).
    # Every layer's column block starts on a 128-lane boundary.
    layer_specs = []
    col = 0
    for fi, fo in zip(hidden_units[:-1], hidden_units[1:]):
        layer_specs.append((fi, fo, col, True))
        col += _round_up(fo, LANE)
    layer_specs.append((hidden_units[-1], OUT_PAD, col, False))
    col += OUT_PAD
    n_total = col                                  # multiple of 128

    K_max = dense_row_off + dense_w
    for (fi, _, _, _) in layer_specs[1:]:
        K_max = max(K_max, fi)
    K_max = _round_up(K_max, SUB)

    ww_off = n_total                               # 128-aligned wide-weight block
    bw_off = n_total + LANE                        # 128-aligned wide-bias block
    misc_w = n_total + 2 * LANE

    w_slab = jnp.zeros((K_max, n_total), jnp.float32)
    misc = jnp.zeros((1, misc_w), jnp.float32)

    # Layer 0: dnn_input = cat([sparse_embeds, dense]) -> embedding rows [0, emb_total),
    # dense rows re-homed at the 8-aligned offset dense_row_off.
    _, fo0, c0, _ = layer_specs[0]
    w0 = params["dnn_w"][0]
    w_slab = w_slab.at[0:emb_total, c0:c0 + fo0].set(w0[:emb_total])
    w_slab = w_slab.at[dense_row_off:dense_row_off + dense_w, c0:c0 + fo0].set(
        w0[emb_total:])
    misc = misc.at[:, c0:c0 + fo0].set(params["dnn_b"][0])

    for li, (fi, fo, coff, _) in enumerate(layer_specs[1:-1], start=1):
        w_slab = w_slab.at[:fi, coff:coff + fo].set(params["dnn_w"][li])
        misc = misc.at[:, coff:coff + fo].set(params["dnn_b"][li])

    fi, _, coff, _ = layer_specs[-1]
    w_slab = w_slab.at[:fi, coff:coff + REAL_OUT].set(params["final_w"])
    misc = misc.at[:, coff:coff + REAL_OUT].set(params["final_b"])
    misc = misc.at[:, ww_off:ww_off + dense_w].set(
        params["wide_w"].reshape(1, dense_w))
    misc = misc.at[:, bw_off:bw_off + 1].set(params["wide_b"])

    emb_slab = jnp.zeros((V_pad, emb_total), jnp.float32)
    for i in range(num_sparse):
        emb_slab = emb_slab.at[:num_embeddings[i], i * E:(i + 1) * E].set(
            params["embed"][i])

    cfg = dict(num_sparse=num_sparse, E=E, V_pad=V_pad, dense_w=dense_w,
               num_feat=dense_w + num_sparse, emb_total=emb_total,
               dense_row_off=dense_row_off, layers=tuple(layer_specs),
               n_total=n_total, K_max=K_max, misc_w=misc_w,
               ww_off=ww_off, bw_off=bw_off)
    return dict(cfg=cfg, w_slab=w_slab, misc_slab=misc, emb_slab=emb_slab)


# --------------------------------------------------------------------------- #
# Forward
# --------------------------------------------------------------------------- #
def _resident_in_specs(cfg, single_buffer):
    # Constant index_map -> weights stay resident across all grid steps.
    kwargs = {"pipeline_mode": pl.Buffered(1)} if single_buffer else {}
    return [
        pl.BlockSpec((cfg["V_pad"], cfg["emb_total"]), lambda i: (0, 0), **kwargs),
        pl.BlockSpec((cfg["K_max"], cfg["n_total"]), lambda i: (0, 0), **kwargs),
        pl.BlockSpec((1, cfg["misc_w"]), lambda i: (0, 0), **kwargs),
    ]


def _vmem_limit_bytes(cfg, block_b):
    f32 = 4
    resident = (cfg["V_pad"] * max(cfg["emb_total"], LANE)
                + cfg["K_max"] * cfg["n_total"]
                + SUB * cfg["misc_w"]) * f32
    streamed = 2 * block_b * (LANE + OUT_PAD) * f32          # x + out, 2 buffers
    act = block_b * (cfg["V_pad"] + cfg["n_total"] + 3 * LANE) * f32
    # 2x on residents covers the non-single-buffered fallback; generous headroom.
    return min(2 * resident + streamed + act + (8 << 20), 64 << 20)


def _call_kernel(x_pad, packed, block_b, *, single_buffer, precision):
    cfg = packed["cfg"]
    B_pad = x_pad.shape[0]
    return pl.pallas_call(
        make_widedeep_kernel(cfg, precision=precision),
        out_shape=jax.ShapeDtypeStruct((B_pad, OUT_PAD), jnp.float32),
        grid=(B_pad // block_b,),
        in_specs=[pl.BlockSpec((block_b, cfg["num_feat"]), lambda i: (i, 0))]
                 + _resident_in_specs(cfg, single_buffer),
        out_specs=pl.BlockSpec((block_b, OUT_PAD), lambda i: (i, 0)),
        compiler_params=pltpu.CompilerParams(
            dimension_semantics=("parallel",),
            vmem_limit_bytes=_vmem_limit_bytes(cfg, block_b)),
    )(x_pad, packed["emb_slab"], packed["w_slab"], packed["misc_slab"])


def widedeep_forward(x, packed, *, num_dense, num_sparse, block_b=None):
    cfg = packed["cfg"]
    num_feat = cfg["num_feat"]
    B = x.shape[0]
    x = x[:, :num_feat].astype(jnp.float32)   # dense cols + float-encoded indices

    if block_b is None:
        # Prefer large batch tiles (per-step overhead ~0.35us, better MXU M-occupancy),
        # but keep >= 2 grid steps when the batch allows so the "parallel" axis can
        # shard across v7x's two TensorCores.
        block_b = min(512, _round_up(B, SUB))
        if B > 16 and pl.cdiv(B, block_b) < 2:
            block_b = _round_up(pl.cdiv(B, 2), SUB)
    B_pad = _round_up(B, block_b)
    if B_pad != B:
        x = jnp.pad(x, ((0, B_pad - B), (0, 0)))   # padded rows produce junk, sliced off

    # Feature-probe fallbacks: single-buffered resident slabs (pl.Buffered(1)) and an
    # explicit in-kernel MXU precision are newer APIs; fall back gracefully so the
    # kernel always compiles and runs.
    attempts = (
        dict(single_buffer=True, precision=jax.lax.Precision.HIGHEST),
        dict(single_buffer=True, precision=None),
        dict(single_buffer=False, precision=jax.lax.Precision.HIGHEST),
        dict(single_buffer=False, precision=None),
    )
    last_err = None
    for opts in attempts:
        try:
            out = _call_kernel(x, packed, block_b, **opts)
            jax.block_until_ready(out)
            return out[:B, :REAL_OUT]
        except Exception as err:  # noqa: BLE001 - retry with a more conservative variant
            last_err = err
    raise last_err


# --------------------------------------------------------------------------- #
# Init + pure-JAX reference
# --------------------------------------------------------------------------- #
def init_params(key, num_embeddings, embedding_dim, hidden_units, num_dense):
    """PyTorch-style init: U(+-1/sqrt(fan_in)) for linears, N(0,1) for embeddings."""
    params = {}
    keys = jax.random.split(key, 64)
    ki = 0

    params["embed"] = []
    for n in num_embeddings:
        params["embed"].append(
            jax.random.normal(keys[ki], (n, embedding_dim), dtype=jnp.float32))
        ki += 1

    def linear_init(k_w, k_b, fan_in, fan_out):
        bound = 1.0 / jnp.sqrt(jnp.float32(fan_in))
        w = jax.random.uniform(k_w, (fan_in, fan_out), minval=-bound,
                               maxval=bound, dtype=jnp.float32)
        b = jax.random.uniform(k_b, (1, fan_out), minval=-bound,
                               maxval=bound, dtype=jnp.float32)
        return w, b

    params["dnn_w"], params["dnn_b"] = [], []
    for fi, fo in zip(hidden_units[:-1], hidden_units[1:]):
        w, b = linear_init(keys[ki], keys[ki + 1], fi, fo)
        ki += 2
        params["dnn_w"].append(w)
        params["dnn_b"].append(b)

    params["final_w"], params["final_b"] = linear_init(
        keys[ki], keys[ki + 1], hidden_units[-1], REAL_OUT)
    ki += 2
    params["wide_w"], params["wide_b"] = linear_init(
        keys[ki], keys[ki + 1], num_dense + 1, 1)
    ki += 2
    return params


def reference_forward(x, params, *, num_dense, num_sparse):
    dot = functools.partial(jnp.dot, precision=jax.lax.Precision.HIGHEST)
    dense = x[:, :num_dense + 1]
    sp = x[:, num_dense + 1:].astype(jnp.int32)
    embs = [jnp.take(params["embed"][i], sp[:, i], axis=0)
            for i in range(num_sparse)]
    h = jnp.concatenate(embs + [dense], axis=-1)
    for w, b in zip(params["dnn_w"], params["dnn_b"]):
        h = jnp.maximum(dot(h, w) + b, 0.0)
    deep = dot(h, params["final_w"]) + params["final_b"]
    wide = dot(dense, params["wide_w"]) + params["wide_b"]
    return 0.5 * (wide + deep)


# --------------------------------------------------------------------------- #
if __name__ == "__main__":
    B = 64
    dense_features = ["d0", "d1", "d2"]        # dense slice width = 4
    sparse_features = ["s0", "s1"]             # 2 sparse features
    num_embeddings = [20, 30]
    embedding_dim = 8
    hidden_units = [32, 16]                    # as passed to WideDeep.__init__

    num_dense = len(dense_features)
    num_sparse = len(sparse_features)
    dnn_input_dim = num_dense + 1 + num_sparse * embedding_dim   # 4 + 16 = 20
    hidden_units = [dnn_input_dim] + hidden_units                # insert(0, ...)

    key = jax.random.PRNGKey(0)
    k_params, k_dense, k_sparse = jax.random.split(key, 3)

    params = init_params(k_params, num_embeddings, embedding_dim,
                         hidden_units, num_dense)
    packed = pack_params(params, num_embeddings=num_embeddings,
                         embedding_dim=embedding_dim, hidden_units=hidden_units,
                         num_dense=num_dense, num_sparse=num_sparse)

    # Input x: [B, num_dense + 1 + num_sparse]; sparse cols hold float-encoded ints.
    dense_part = jax.random.normal(k_dense, (B, num_dense + 1), dtype=jnp.float32)
    sk = jax.random.split(k_sparse, num_sparse)
    sparse_cols = [
        jax.random.randint(sk[i], (B, 1), 0, num_embeddings[i]).astype(jnp.float32)
        for i in range(num_sparse)
    ]
    x = jnp.concatenate([dense_part] + sparse_cols, axis=-1)

    out = widedeep_forward(x, packed, num_dense=num_dense, num_sparse=num_sparse)
    jax.block_until_ready(out)

    ref = reference_forward(x, params, num_dense=num_dense, num_sparse=num_sparse)
    assert out.shape == (B, REAL_OUT) and out.dtype == jnp.float32
    assert jnp.allclose(out, ref, rtol=1e-3, atol=1e-3), \
        float(jnp.max(jnp.abs(out - ref)))
    print("KERNEL_OK")
</pallas_src>

<mosaic_0001>
module attributes {stable_mosaic.version = 11 : i64} {
  func.func @kernel(%arg0: i32, %arg1: memref<32x6xf32, #tpu.memory_space<vmem>>, %arg2: memref<32x16xf32, #tpu.memory_space<vmem>>, %arg3: memref<32x384xf32, #tpu.memory_space<vmem>>, %arg4: memref<1x640xf32, #tpu.memory_space<vmem>>, %arg5: memref<32x128xf32, #tpu.memory_space<vmem>>) attributes {dimension_semantics = [#tpu.dimension_semantics<parallel>], iteration_bounds = array<i64: 2>, scalar_prefetch = 0 : i64, scratch_operands = 0 : i64, tpu.core_type = #tpu.core_type<tc>, window_params = [{transform_indices = @transform_0, window_bounds = array<i64: 32, 6>}, {pipeline_mode = #tpu.pipeline_mode<synchronous>, transform_indices = @transform_1, window_bounds = array<i64: 32, 16>}, {pipeline_mode = #tpu.pipeline_mode<synchronous>, transform_indices = @transform_2, window_bounds = array<i64: 32, 384>}, {pipeline_mode = #tpu.pipeline_mode<synchronous>, transform_indices = @transform_3, window_bounds = array<i64: 1, 640>}, {transform_indices = @transform_4, window_bounds = array<i64: 32, 128>}]} {
    %c0 = arith.constant 0 : index
    %c0_0 = arith.constant 0 : index
    %0 = vector.load %arg1[%c0, %c0_0] : memref<32x6xf32, #tpu.memory_space<vmem>>, vector<32x6xf32>
    %1 = vector.extract_strided_slice %0 {offsets = [0, 0], sizes = [32, 4], strides = [1, 1]} : vector<32x6xf32> to vector<32x4xf32>
    %2 = vector.extract_strided_slice %0 {offsets = [0, 4], sizes = [32, 2], strides = [1, 1]} : vector<32x6xf32> to vector<32x2xf32>
    %3 = arith.fptosi %2 : vector<32x2xf32> to vector<32x2xi32>
    %c16 = arith.constant 16 : index
    %c0_1 = arith.constant 0 : index
    %4 = vector.load %arg3[%c16, %c0_1] : memref<32x384xf32, #tpu.memory_space<vmem>>, vector<4x32xf32>
    %cst = arith.constant dense<0.000000e+00> : vector<32x32xf32>
    %5 = tpu.matmul %1, %4, %cst {dimension_numbers = #tpu.dot_dimension_numbers<[1], [0], [0], [1], [0, 0, 1, 1], [], []>, precision = #tpu.contract_precision<fp32>} : vector<32x4xf32>, vector<4x32xf32>, vector<32x32xf32> -> vector<32x32xf32>
    %6 = tpu.iota {dimensions = array<i32: 1>} : vector<1x32xi32>
    %7 = vector.extract_strided_slice %3 {offsets = [0, 0], sizes = [32, 1], strides = [1, 1]} : vector<32x2xi32> to vector<32x1xi32>
    %8 = vector.broadcast %7 : vector<32x1xi32> to vector<32x32xi32>
    %9 = vector.broadcast %6 : vector<1x32xi32> to vector<32x32xi32>
    %10 = arith.cmpi eq, %8, %9 : vector<32x32xi32>
    %11 = arith.extui %10 : vector<32x32xi1> to vector<32x32xi32>
    %12 = arith.sitofp %11 : vector<32x32xi32> to vector<32x32xf32>
    %c0_2 = arith.constant 0 : index
    %c0_3 = arith.constant 0 : index
    %13 = vector.load %arg2[%c0_2, %c0_3] : memref<32x16xf32, #tpu.memory_space<vmem>>, vector<32x8xf32>
    %cst_4 = arith.constant dense<0.000000e+00> : vector<32x8xf32>
    %14 = tpu.matmul %12, %13, %cst_4 {dimension_numbers = #tpu.dot_dimension_numbers<[1], [0], [0], [1], [0, 0, 1, 1], [], []>, precision = #tpu.contract_precision<fp32>} : vector<32x32xf32>, vector<32x8xf32>, vector<32x8xf32> -> vector<32x8xf32>
    %c0_5 = arith.constant 0 : index
    %c0_6 = arith.constant 0 : index
    %15 = vector.load %arg3[%c0_5, %c0_6] : memref<32x384xf32, #tpu.memory_space<vmem>>, vector<8x32xf32>
    %cst_7 = arith.constant dense<0.000000e+00> : vector<32x32xf32>
    %16 = tpu.matmul %14, %15, %cst_7 {dimension_numbers = #tpu.dot_dimension_numbers<[1], [0], [0], [1], [0, 0, 1, 1], [], []>, precision = #tpu.contract_precision<fp32>} : vector<32x8xf32>, vector<8x32xf32>, vector<32x32xf32> -> vector<32x32xf32>
    %17 = arith.addf %5, %16 : vector<32x32xf32>
    %18 = vector.extract_strided_slice %3 {offsets = [0, 1], sizes = [32, 1], strides = [1, 1]} : vector<32x2xi32> to vector<32x1xi32>
    %19 = vector.broadcast %18 : vector<32x1xi32> to vector<32x32xi32>
    %20 = vector.broadcast %6 : vector<1x32xi32> to vector<32x32xi32>
    %21 = arith.cmpi eq, %19, %20 : vector<32x32xi32>
    %22 = arith.extui %21 : vector<32x32xi1> to vector<32x32xi32>
    %23 = arith.sitofp %22 : vector<32x32xi32> to vector<32x32xf32>
    %c0_8 = arith.constant 0 : index
    %c8 = arith.constant 8 : index
    %24 = vector.load %arg2[%c0_8, %c8] : memref<32x16xf32, #tpu.memory_space<vmem>>, vector<32x8xf32>
    %cst_9 = arith.constant dense<0.000000e+00> : vector<32x8xf32>
    %25 = tpu.matmul %23, %24, %cst_9 {dimension_numbers = #tpu.dot_dimension_numbers<[1], [0], [0], [1], [0, 0, 1, 1], [], []>, precision = #tpu.contract_precision<fp32>} : vector<32x32xf32>, vector<32x8xf32>, vector<32x8xf32> -> vector<32x8xf32>
    %c8_10 = arith.constant 8 : index
    %c0_11 = arith.constant 0 : index
    %26 = vector.load %arg3[%c8_10, %c0_11] : memref<32x384xf32, #tpu.memory_space<vmem>>, vector<8x32xf32>
    %cst_12 = arith.constant dense<0.000000e+00> : vector<32x32xf32>
    %27 = tpu.matmul %25, %26, %cst_12 {dimension_numbers = #tpu.dot_dimension_numbers<[1], [0], [0], [1], [0, 0, 1, 1], [], []>, precision = #tpu.contract_precision<fp32>} : vector<32x8xf32>, vector<8x32xf32>, vector<32x32xf32> -> vector<32x32xf32>
    %28 = arith.addf %17, %27 : vector<32x32xf32>
    %c0_13 = arith.constant 0 : index
    %c0_14 = arith.constant 0 : index
    %29 = vector.load %arg4[%c0_13, %c0_14] : memref<1x640xf32, #tpu.memory_space<vmem>>, vector<1x32xf32>
    %30 = vector.broadcast %29 : vector<1x32xf32> to vector<32x32xf32>
    %31 = arith.addf %28, %30 : vector<32x32xf32>
    %cst_15 = arith.constant 0.000000e+00 : f32
    %32 = vector.broadcast %cst_15 : f32 to vector<32x32xf32>
    %33 = arith.maximumf %31, %32 : vector<32x32xf32>
    %c0_16 = arith.constant 0 : index
    %c128 = arith.constant 128 : index
    %34 = vector.load %arg3[%c0_16, %c128] : memref<32x384xf32, #tpu.memory_space<vmem>>, vector<32x16xf32>
    %cst_17 = arith.constant dense<0.000000e+00> : vector<32x16xf32>
    %35 = tpu.matmul %33, %34, %cst_17 {dimension_numbers = #tpu.dot_dimension_numbers<[1], [0], [0], [1], [0, 0, 1, 1], [], []>, precision = #tpu.contract_precision<fp32>} : vector<32x32xf32>, vector<32x16xf32>, vector<32x16xf32> -> vector<32x16xf32>
    %c0_18 = arith.constant 0 : index
    %c128_19 = arith.constant 128 : index
    %36 = vector.load %arg4[%c0_18, %c128_19] : memref<1x640xf32, #tpu.memory_space<vmem>>, vector<1x16xf32>
    %37 = vector.broadcast %36 : vector<1x16xf32> to vector<32x16xf32>
    %38 = arith.addf %35, %37 : vector<32x16xf32>
    %cst_20 = arith.constant 0.000000e+00 : f32
    %39 = vector.broadcast %cst_20 : f32 to vector<32x16xf32>
    %40 = arith.maximumf %38, %39 : vector<32x16xf32>
    %c0_21 = arith.constant 0 : index
    %c256 = arith.constant 256 : index
    %41 = vector.load %arg3[%c0_21, %c256] : memref<32x384xf32, #tpu.memory_space<vmem>>, vector<16x128xf32>
    %cst_22 = arith.constant dense<0.000000e+00> : vector<32x128xf32>
    %42 = tpu.matmul %40, %41, %cst_22 {dimension_numbers = #tpu.dot_dimension_numbers<[1], [0], [0], [1], [0, 0, 1, 1], [], []>, precision = #tpu.contract_precision<fp32>} : vector<32x16xf32>, vector<16x128xf32>, vector<32x128xf32> -> vector<32x128xf32>
    %c0_23 = arith.constant 0 : index
    %c256_24 = arith.constant 256 : index
    %43 = vector.load %arg4[%c0_23, %c256_24] : memref<1x640xf32, #tpu.memory_space<vmem>>, vector<1x128xf32>
    %44 = vector.broadcast %43 : vector<1x128xf32> to vector<32x128xf32>
    %45 = arith.addf %42, %44 : vector<32x128xf32>
    %c0_25 = arith.constant 0 : index
    %c384 = arith.constant 384 : index
    %46 = vector.load %arg4[%c0_25, %c384] : memref<1x640xf32, #tpu.memory_space<vmem>>, vector<1x4xf32>
    %c0_26 = arith.constant 0 : index
    %c512 = arith.constant 512 : index
    %47 = vector.load %arg4[%c0_26, %c512] : memref<1x640xf32, #tpu.memory_space<vmem>>, vector<1x1xf32>
    %48 = vector.broadcast %46 : vector<1x4xf32> to vector<32x4xf32>
    %49 = arith.mulf %1, %48 : vector<32x4xf32>
    %cst_27 = arith.constant dense<0.000000e+00> : vector<32xf32>
    %50 = vector.multi_reduction <add>, %49, %cst_27 [1] : vector<32x4xf32> to vector<32xf32>
    %51 = vector.shape_cast %50 : vector<32xf32> to vector<32x1xf32>
    %52 = vector.broadcast %47 : vector<1x1xf32> to vector<32x1xf32>
    %53 = arith.addf %51, %52 : vector<32x1xf32>
    %54 = vector.broadcast %53 : vector<32x1xf32> to vector<32x128xf32>
    %55 = arith.addf %54, %45 : vector<32x128xf32>
    %cst_28 = arith.constant 5.000000e-01 : f32
    %56 = vector.broadcast %cst_28 : f32 to vector<32x128xf32>
    %57 = arith.mulf %56, %55 : vector<32x128xf32>
    %c0_29 = arith.constant 0 : index
    %c0_30 = arith.constant 0 : index
    %58 = vector.load %arg5[%c0_29, %c0_30] : memref<32x128xf32, #tpu.memory_space<vmem>>, vector<32x128xf32>
    tpu.vector_store %arg5[%c0_29, %c0_30], %57 {strides = array<i32>} : memref<32x128xf32, #tpu.memory_space<vmem>>, vector<32x128xf32>,
    return
  }
  func.func @transform_0(%arg0: i32) -> (i32, i32) {
    %c0_i32 = arith.constant 0 : i32
    %c0_i32_0 = arith.constant 0 : i32
    return %arg0, %c0_i32 : i32, i32
  }
  func.func @transform_1(%arg0: i32) -> (i32, i32) {
    %c0_i32 = arith.constant 0 : i32
    %c0_i32_0 = arith.constant 0 : i32
    %c0_i32_1 = arith.constant 0 : i32
    return %c0_i32, %c0_i32_0 : i32, i32
  }
  func.func @transform_2(%arg0: i32) -> (i32, i32) {
    %c0_i32 = arith.constant 0 : i32
    %c0_i32_0 = arith.constant 0 : i32
    %c0_i32_1 = arith.constant 0 : i32
    return %c0_i32, %c0_i32_0 : i32, i32
  }
  func.func @transform_3(%arg0: i32) -> (i32, i32) {
    %c0_i32 = arith.constant 0 : i32
    %c0_i32_0 = arith.constant 0 : i32
    %c0_i32_1 = arith.constant 0 : i32
    return %c0_i32, %c0_i32_0 : i32, i32
  }
  func.func @transform_4(%arg0: i32) -> (i32, i32) {
    %c0_i32 = arith.constant 0 : i32
    %c0_i32_0 = arith.constant 0 : i32
    return %arg0, %c0_i32 : i32, i32
  }
}

module attributes {stable_mosaic.version = 11 : i64} {
  func.func @kernel(%arg0: i32, %arg1: memref<32x6xf32, #tpu.memory_space<vmem>>, %arg2: memref<32x16xf32, #tpu.memory_space<vmem>>, %arg3: memref<32x384xf32, #tpu.memory_space<vmem>>, %arg4: memref<1x640xf32, #tpu.memory_space<vmem>>, %arg5: memref<32x128xf32, #tpu.memory_space<vmem>>) attributes {dimension_semantics = [#tpu.dimension_semantics<parallel>], iteration_bounds = array<i64: 2>, scalar_prefetch = 0 : i64, scratch_operands = 0 : i64, tpu.core_type = #tpu.core_type<tc>, window_params = [{transform_indices = @transform_0, window_bounds = array<i64: 32, 6>}, {pipeline_mode = #tpu.pipeline_mode<synchronous>, transform_indices = @transform_1, window_bounds = array<i64: 32, 16>}, {pipeline_mode = #tpu.pipeline_mode<synchronous>, transform_indices = @transform_2, window_bounds = array<i64: 32, 384>}, {pipeline_mode = #tpu.pipeline_mode<synchronous>, transform_indices = @transform_3, window_bounds = array<i64: 1, 640>}, {transform_indices = @transform_4, window_bounds = array<i64: 32, 128>}]} {
    %c0 = arith.constant 0 : index
    %c0_0 = arith.constant 0 : index
    %0 = vector.load %arg1[%c0, %c0_0] : memref<32x6xf32, #tpu.memory_space<vmem>>, vector<32x6xf32>
    %1 = vector.extract_strided_slice %0 {offsets = [0, 0], sizes = [32, 4], strides = [1, 1]} : vector<32x6xf32> to vector<32x4xf32>
    %2 = vector.extract_strided_slice %0 {offsets = [0, 4], sizes = [32, 2], strides = [1, 1]} : vector<32x6xf32> to vector<32x2xf32>
    %3 = arith.fptosi %2 : vector<32x2xf32> to vector<32x2xi32>
    %c16 = arith.constant 16 : index
    %c0_1 = arith.constant 0 : index
    %4 = vector.load %arg3[%c16, %c0_1] : memref<32x384xf32, #tpu.memory_space<vmem>>, vector<4x32xf32>
    %cst = arith.constant dense<0.000000e+00> : vector<32x32xf32>
    %5 = tpu.matmul %1, %4, %cst {dimension_numbers = #tpu.dot_dimension_numbers<[1], [0], [0], [1], [0, 0, 1, 1], [], []>} : vector<32x4xf32>, vector<4x32xf32>, vector<32x32xf32> -> vector<32x32xf32>
    %6 = tpu.iota {dimensions = array<i32: 1>} : vector<1x32xi32>
    %7 = vector.extract_strided_slice %3 {offsets = [0, 0], sizes = [32, 1], strides = [1, 1]} : vector<32x2xi32> to vector<32x1xi32>
    %8 = vector.broadcast %7 : vector<32x1xi32> to vector<32x32xi32>
    %9 = vector.broadcast %6 : vector<1x32xi32> to vector<32x32xi32>
    %10 = arith.cmpi eq, %8, %9 : vector<32x32xi32>
    %11 = arith.extui %10 : vector<32x32xi1> to vector<32x32xi32>
    %12 = arith.sitofp %11 : vector<32x32xi32> to vector<32x32xf32>
    %c0_2 = arith.constant 0 : index
    %c0_3 = arith.constant 0 : index
    %13 = vector.load %arg2[%c0_2, %c0_3] : memref<32x16xf32, #tpu.memory_space<vmem>>, vector<32x8xf32>
    %cst_4 = arith.constant dense<0.000000e+00> : vector<32x8xf32>
    %14 = tpu.matmul %12, %13, %cst_4 {dimension_numbers = #tpu.dot_dimension_numbers<[1], [0], [0], [1], [0, 0, 1, 1], [], []>} : vector<32x32xf32>, vector<32x8xf32>, vector<32x8xf32> -> vector<32x8xf32>
    %c0_5 = arith.constant 0 : index
    %c0_6 = arith.constant 0 : index
    %15 = vector.load %arg3[%c0_5, %c0_6] : memref<32x384xf32, #tpu.memory_space<vmem>>, vector<8x32xf32>
    %cst_7 = arith.constant dense<0.000000e+00> : vector<32x32xf32>
    %16 = tpu.matmul %14, %15, %cst_7 {dimension_numbers = #tpu.dot_dimension_numbers<[1], [0], [0], [1], [0, 0, 1, 1], [], []>} : vector<32x8xf32>, vector<8x32xf32>, vector<32x32xf32> -> vector<32x32xf32>
    %17 = arith.addf %5, %16 : vector<32x32xf32>
    %18 = vector.extract_strided_slice %3 {offsets = [0, 1], sizes = [32, 1], strides = [1, 1]} : vector<32x2xi32> to vector<32x1xi32>
    %19 = vector.broadcast %18 : vector<32x1xi32> to vector<32x32xi32>
    %20 = vector.broadcast %6 : vector<1x32xi32> to vector<32x32xi32>
    %21 = arith.cmpi eq, %19, %20 : vector<32x32xi32>
    %22 = arith.extui %21 : vector<32x32xi1> to vector<32x32xi32>
    %23 = arith.sitofp %22 : vector<32x32xi32> to vector<32x32xf32>
    %c0_8 = arith.constant 0 : index
    %c8 = arith.constant 8 : index
    %24 = vector.load %arg2[%c0_8, %c8] : memref<32x16xf32, #tpu.memory_space<vmem>>, vector<32x8xf32>
    %cst_9 = arith.constant dense<0.000000e+00> : vector<32x8xf32>
    %25 = tpu.matmul %23, %24, %cst_9 {dimension_numbers = #tpu.dot_dimension_numbers<[1], [0], [0], [1], [0, 0, 1, 1], [], []>} : vector<32x32xf32>, vector<32x8xf32>, vector<32x8xf32> -> vector<32x8xf32>
    %c8_10 = arith.constant 8 : index
    %c0_11 = arith.constant 0 : index
    %26 = vector.load %arg3[%c8_10, %c0_11] : memref<32x384xf32, #tpu.memory_space<vmem>>, vector<8x32xf32>
    %cst_12 = arith.constant dense<0.000000e+00> : vector<32x32xf32>
    %27 = tpu.matmul %25, %26, %cst_12 {dimension_numbers = #tpu.dot_dimension_numbers<[1], [0], [0], [1], [0, 0, 1, 1], [], []>} : vector<32x8xf32>, vector<8x32xf32>, vector<32x32xf32> -> vector<32x32xf32>
    %28 = arith.addf %17, %27 : vector<32x32xf32>
    %c0_13 = arith.constant 0 : index
    %c0_14 = arith.constant 0 : index
    %29 = vector.load %arg4[%c0_13, %c0_14] : memref<1x640xf32, #tpu.memory_space<vmem>>, vector<1x32xf32>
    %30 = vector.broadcast %29 : vector<1x32xf32> to vector<32x32xf32>
    %31 = arith.addf %28, %30 : vector<32x32xf32>
    %cst_15 = arith.constant 0.000000e+00 : f32
    %32 = vector.broadcast %cst_15 : f32 to vector<32x32xf32>
    %33 = arith.maximumf %31, %32 : vector<32x32xf32>
    %c0_16 = arith.constant 0 : index
    %c128 = arith.constant 128 : index
    %34 = vector.load %arg3[%c0_16, %c128] : memref<32x384xf32, #tpu.memory_space<vmem>>, vector<32x16xf32>
    %cst_17 = arith.constant dense<0.000000e+00> : vector<32x16xf32>
    %35 = tpu.matmul %33, %34, %cst_17 {dimension_numbers = #tpu.dot_dimension_numbers<[1], [0], [0], [1], [0, 0, 1, 1], [], []>} : vector<32x32xf32>, vector<32x16xf32>, vector<32x16xf32> -> vector<32x16xf32>
    %c0_18 = arith.constant 0 : index
    %c128_19 = arith.constant 128 : index
    %36 = vector.load %arg4[%c0_18, %c128_19] : memref<1x640xf32, #tpu.memory_space<vmem>>, vector<1x16xf32>
    %37 = vector.broadcast %36 : vector<1x16xf32> to vector<32x16xf32>
    %38 = arith.addf %35, %37 : vector<32x16xf32>
    %cst_20 = arith.constant 0.000000e+00 : f32
    %39 = vector.broadcast %cst_20 : f32 to vector<32x16xf32>
    %40 = arith.maximumf %38, %39 : vector<32x16xf32>
    %c0_21 = arith.constant 0 : index
    %c256 = arith.constant 256 : index
    %41 = vector.load %arg3[%c0_21, %c256] : memref<32x384xf32, #tpu.memory_space<vmem>>, vector<16x128xf32>
    %cst_22 = arith.constant dense<0.000000e+00> : vector<32x128xf32>
    %42 = tpu.matmul %40, %41, %cst_22 {dimension_numbers = #tpu.dot_dimension_numbers<[1], [0], [0], [1], [0, 0, 1, 1], [], []>} : vector<32x16xf32>, vector<16x128xf32>, vector<32x128xf32> -> vector<32x128xf32>
    %c0_23 = arith.constant 0 : index
    %c256_24 = arith.constant 256 : index
    %43 = vector.load %arg4[%c0_23, %c256_24] : memref<1x640xf32, #tpu.memory_space<vmem>>, vector<1x128xf32>
    %44 = vector.broadcast %43 : vector<1x128xf32> to vector<32x128xf32>
    %45 = arith.addf %42, %44 : vector<32x128xf32>
    %c0_25 = arith.constant 0 : index
    %c384 = arith.constant 384 : index
    %46 = vector.load %arg4[%c0_25, %c384] : memref<1x640xf32, #tpu.memory_space<vmem>>, vector<1x4xf32>
    %c0_26 = arith.constant 0 : index
    %c512 = arith.constant 512 : index
    %47 = vector.load %arg4[%c0_26, %c512] : memref<1x640xf32, #tpu.memory_space<vmem>>, vector<1x1xf32>
    %48 = vector.broadcast %46 : vector<1x4xf32> to vector<32x4xf32>
    %49 = arith.mulf %1, %48 : vector<32x4xf32>
    %cst_27 = arith.constant dense<0.000000e+00> : vector<32xf32>
    %50 = vector.multi_reduction <add>, %49, %cst_27 [1] : vector<32x4xf32> to vector<32xf32>
    %51 = vector.shape_cast %50 : vector<32xf32> to vector<32x1xf32>
    %52 = vector.broadcast %47 : vector<1x1xf32> to vector<32x1xf32>
    %53 = arith.addf %51, %52 : vector<32x1xf32>
    %54 = vector.broadcast %53 : vector<32x1xf32> to vector<32x128xf32>
    %55 = arith.addf %54, %45 : vector<32x128xf32>
    %cst_28 = arith.constant 5.000000e-01 : f32
    %56 = vector.broadcast %cst_28 : f32 to vector<32x128xf32>
    %57 = arith.mulf %56, %55 : vector<32x128xf32>
    %c0_29 = arith.constant 0 : index
    %c0_30 = arith.constant 0 : index
    %58 = vector.load %arg5[%c0_29, %c0_30] : memref<32x128xf32, #tpu.memory_space<vmem>>, vector<32x128xf32>
    tpu.vector_store %arg5[%c0_29, %c0_30], %57 {strides = array<i32>} : memref<32x128xf32, #tpu.memory_space<vmem>>, vector<32x128xf32>,
    return
  }
  func.func @transform_0(%arg0: i32) -> (i32, i32) {
    %c0_i32 = arith.constant 0 : i32
    %c0_i32_0 = arith.constant 0 : i32
    return %arg0, %c0_i32 : i32, i32
  }
  func.func @transform_1(%arg0: i32) -> (i32, i32) {
    %c0_i32 = arith.constant 0 : i32
    %c0_i32_0 = arith.constant 0 : i32
    %c0_i32_1 = arith.constant 0 : i32
    return %c0_i32, %c0_i32_0 : i32, i32
  }
  func.func @transform_2(%arg0: i32) -> (i32, i32) {
    %c0_i32 = arith.constant 0 : i32
    %c0_i32_0 = arith.constant 0 : i32
    %c0_i32_1 = arith.constant 0 : i32
    return %c0_i32, %c0_i32_0 : i32, i32
  }
  func.func @transform_3(%arg0: i32) -> (i32, i32) {
    %c0_i32 = arith.constant 0 : i32
    %c0_i32_0 = arith.constant 0 : i32
    %c0_i32_1 = arith.constant 0 : i32
    return %c0_i32, %c0_i32_0 : i32, i32
  }
  func.func @transform_4(%arg0: i32) -> (i32, i32) {
    %c0_i32 = arith.constant 0 : i32
    %c0_i32_0 = arith.constant 0 : i32
    return %arg0, %c0_i32 : i32, i32
  }
}

module attributes {stable_mosaic.version = 11 : i64} {
  func.func @kernel(%arg0: i32, %arg1: memref<32x6xf32, #tpu.memory_space<vmem>>, %arg2: memref<32x16xf32, #tpu.memory_space<vmem>>, %arg3: memref<32x384xf32, #tpu.memory_space<vmem>>, %arg4: memref<1x640xf32, #tpu.memory_space<vmem>>, %arg5: memref<32x128xf32, #tpu.memory_space<vmem>>) attributes {dimension_semantics = [#tpu.dimension_semantics<parallel>], iteration_bounds = array<i64: 2>, scalar_prefetch = 0 : i64, scratch_operands = 0 : i64, tpu.core_type = #tpu.core_type<tc>, window_params = [{transform_indices = @transform_0, window_bounds = array<i64: 32, 6>}, {pipeline_mode = #tpu.pipeline_mode<synchronous>, transform_indices = @transform_1, window_bounds = array<i64: 32, 16>}, {pipeline_mode = #tpu.pipeline_mode<synchronous>, transform_indices = @transform_2, window_bounds = array<i64: 32, 384>}, {pipeline_mode = #tpu.pipeline_mode<synchronous>, transform_indices = @transform_3, window_bounds = array<i64: 1, 640>}, {transform_indices = @transform_4, window_bounds = array<i64: 32, 128>}]} {
    %c0 = arith.constant 0 : index
    %c0_0 = arith.constant 0 : index
    %0 = vector.load %arg1[%c0, %c0_0] : memref<32x6xf32, #tpu.memory_space<vmem>>, vector<32x6xf32>
    %1 = vector.extract_strided_slice %0 {offsets = [0, 0], sizes = [32, 4], strides = [1, 1]} : vector<32x6xf32> to vector<32x4xf32>
    %2 = vector.extract_strided_slice %0 {offsets = [0, 4], sizes = [32, 2], strides = [1, 1]} : vector<32x6xf32> to vector<32x2xf32>
    %3 = arith.fptosi %2 : vector<32x2xf32> to vector<32x2xi32>
    %c16 = arith.constant 16 : index
    %c0_1 = arith.constant 0 : index
    %4 = vector.load %arg3[%c16, %c0_1] : memref<32x384xf32, #tpu.memory_space<vmem>>, vector<4x32xf32>
    %cst = arith.constant dense<0.000000e+00> : vector<32x32xf32>
    %5 = tpu.matmul %1, %4, %cst {dimension_numbers = #tpu.dot_dimension_numbers<[1], [0], [0], [1], [0, 0, 1, 1], [], []>, precision = #tpu.contract_precision<fp32>} : vector<32x4xf32>, vector<4x32xf32>, vector<32x32xf32> -> vector<32x32xf32>
    %6 = tpu.iota {dimensions = array<i32: 1>} : vector<1x32xi32>
    %7 = vector.extract_strided_slice %3 {offsets = [0, 0], sizes = [32, 1], strides = [1, 1]} : vector<32x2xi32> to vector<32x1xi32>
    %8 = vector.broadcast %7 : vector<32x1xi32> to vector<32x32xi32>
    %9 = vector.broadcast %6 : vector<1x32xi32> to vector<32x32xi32>
    %10 = arith.cmpi eq, %8, %9 : vector<32x32xi32>
    %11 = arith.extui %10 : vector<32x32xi1> to vector<32x32xi32>
    %12 = arith.sitofp %11 : vector<32x32xi32> to vector<32x32xf32>
    %c0_2 = arith.constant 0 : index
    %c0_3 = arith.constant 0 : index
    %13 = vector.load %arg2[%c0_2, %c0_3] : memref<32x16xf32, #tpu.memory_space<vmem>>, vector<32x8xf32>
    %cst_4 = arith.constant dense<0.000000e+00> : vector<32x8xf32>
    %14 = tpu.matmul %12, %13, %cst_4 {dimension_numbers = #tpu.dot_dimension_numbers<[1], [0], [0], [1], [0, 0, 1, 1], [], []>, precision = #tpu.contract_precision<fp32>} : vector<32x32xf32>, vector<32x8xf32>, vector<32x8xf32> -> vector<32x8xf32>
    %c0_5 = arith.constant 0 : index
    %c0_6 = arith.constant 0 : index
    %15 = vector.load %arg3[%c0_5, %c0_6] : memref<32x384xf32, #tpu.memory_space<vmem>>, vector<8x32xf32>
    %cst_7 = arith.constant dense<0.000000e+00> : vector<32x32xf32>
    %16 = tpu.matmul %14, %15, %cst_7 {dimension_numbers = #tpu.dot_dimension_numbers<[1], [0], [0], [1], [0, 0, 1, 1], [], []>, precision = #tpu.contract_precision<fp32>} : vector<32x8xf32>, vector<8x32xf32>, vector<32x32xf32> -> vector<32x32xf32>
    %17 = arith.addf %5, %16 : vector<32x32xf32>
    %18 = vector.extract_strided_slice %3 {offsets = [0, 1], sizes = [32, 1], strides = [1, 1]} : vector<32x2xi32> to vector<32x1xi32>
    %19 = vector.broadcast %18 : vector<32x1xi32> to vector<32x32xi32>
    %20 = vector.broadcast %6 : vector<1x32xi32> to vector<32x32xi32>
    %21 = arith.cmpi eq, %19, %20 : vector<32x32xi32>
    %22 = arith.extui %21 : vector<32x32xi1> to vector<32x32xi32>
    %23 = arith.sitofp %22 : vector<32x32xi32> to vector<32x32xf32>
    %c0_8 = arith.constant 0 : index
    %c8 = arith.constant 8 : index
    %24 = vector.load %arg2[%c0_8, %c8] : memref<32x16xf32, #tpu.memory_space<vmem>>, vector<32x8xf32>
    %cst_9 = arith.constant dense<0.000000e+00> : vector<32x8xf32>
    %25 = tpu.matmul %23, %24, %cst_9 {dimension_numbers = #tpu.dot_dimension_numbers<[1], [0], [0], [1], [0, 0, 1, 1], [], []>, precision = #tpu.contract_precision<fp32>} : vector<32x32xf32>, vector<32x8xf32>, vector<32x8xf32> -> vector<32x8xf32>
    %c8_10 = arith.constant 8 : index
    %c0_11 = arith.constant 0 : index
    %26 = vector.load %arg3[%c8_10, %c0_11] : memref<32x384xf32, #tpu.memory_space<vmem>>, vector<8x32xf32>
    %cst_12 = arith.constant dense<0.000000e+00> : vector<32x32xf32>
    %27 = tpu.matmul %25, %26, %cst_12 {dimension_numbers = #tpu.dot_dimension_numbers<[1], [0], [0], [1], [0, 0, 1, 1], [], []>, precision = #tpu.contract_precision<fp32>} : vector<32x8xf32>, vector<8x32xf32>, vector<32x32xf32> -> vector<32x32xf32>
    %28 = arith.addf %17, %27 : vector<32x32xf32>
    %c0_13 = arith.constant 0 : index
    %c0_14 = arith.constant 0 : index
    %29 = vector.load %arg4[%c0_13, %c0_14] : memref<1x640xf32, #tpu.memory_space<vmem>>, vector<1x32xf32>
    %30 = vector.broadcast %29 : vector<1x32xf32> to vector<32x32xf32>
    %31 = arith.addf %28, %30 : vector<32x32xf32>
    %cst_15 = arith.constant 0.000000e+00 : f32
    %32 = vector.broadcast %cst_15 : f32 to vector<32x32xf32>
    %33 = arith.maximumf %31, %32 : vector<32x32xf32>
    %c0_16 = arith.constant 0 : index
    %c128 = arith.constant 128 : index
    %34 = vector.load %arg3[%c0_16, %c128] : memref<32x384xf32, #tpu.memory_space<vmem>>, vector<32x16xf32>
    %cst_17 = arith.constant dense<0.000000e+00> : vector<32x16xf32>
    %35 = tpu.matmul %33, %34, %cst_17 {dimension_numbers = #tpu.dot_dimension_numbers<[1], [0], [0], [1], [0, 0, 1, 1], [], []>, precision = #tpu.contract_precision<fp32>} : vector<32x32xf32>, vector<32x16xf32>, vector<32x16xf32> -> vector<32x16xf32>
    %c0_18 = arith.constant 0 : index
    %c128_19 = arith.constant 128 : index
    %36 = vector.load %arg4[%c0_18, %c128_19] : memref<1x640xf32, #tpu.memory_space<vmem>>, vector<1x16xf32>
    %37 = vector.broadcast %36 : vector<1x16xf32> to vector<32x16xf32>
    %38 = arith.addf %35, %37 : vector<32x16xf32>
    %cst_20 = arith.constant 0.000000e+00 : f32
    %39 = vector.broadcast %cst_20 : f32 to vector<32x16xf32>
    %40 = arith.maximumf %38, %39 : vector<32x16xf32>
    %c0_21 = arith.constant 0 : index
    %c256 = arith.constant 256 : index
    %41 = vector.load %arg3[%c0_21, %c256] : memref<32x384xf32, #tpu.memory_space<vmem>>, vector<16x128xf32>
    %cst_22 = arith.constant dense<0.000000e+00> : vector<32x128xf32>
    %42 = tpu.matmul %40, %41, %cst_22 {dimension_numbers = #tpu.dot_dimension_numbers<[1], [0], [0], [1], [0, 0, 1, 1], [], []>, precision = #tpu.contract_precision<fp32>} : vector<32x16xf32>, vector<16x128xf32>, vector<32x128xf32> -> vector<32x128xf32>
    %c0_23 = arith.constant 0 : index
    %c256_24 = arith.constant 256 : index
    %43 = vector.load %arg4[%c0_23, %c256_24] : memref<1x640xf32, #tpu.memory_space<vmem>>, vector<1x128xf32>
    %44 = vector.broadcast %43 : vector<1x128xf32> to vector<32x128xf32>
    %45 = arith.addf %42, %44 : vector<32x128xf32>
    %c0_25 = arith.constant 0 : index
    %c384 = arith.constant 384 : index
    %46 = vector.load %arg4[%c0_25, %c384] : memref<1x640xf32, #tpu.memory_space<vmem>>, vector<1x4xf32>
    %c0_26 = arith.constant 0 : index
    %c512 = arith.constant 512 : index
    %47 = vector.load %arg4[%c0_26, %c512] : memref<1x640xf32, #tpu.memory_space<vmem>>, vector<1x1xf32>
    %48 = vector.broadcast %46 : vector<1x4xf32> to vector<32x4xf32>
    %49 = arith.mulf %1, %48 : vector<32x4xf32>
    %cst_27 = arith.constant dense<0.000000e+00> : vector<32xf32>
    %50 = vector.multi_reduction <add>, %49, %cst_27 [1] : vector<32x4xf32> to vector<32xf32>
    %51 = vector.shape_cast %50 : vector<32xf32> to vector<32x1xf32>
    %52 = vector.broadcast %47 : vector<1x1xf32> to vector<32x1xf32>
    %53 = arith.addf %51, %52 : vector<32x1xf32>
    %54 = vector.broadcast %53 : vector<32x1xf32> to vector<32x128xf32>
    %55 = arith.addf %54, %45 : vector<32x128xf32>
    %cst_28 = arith.constant 5.000000e-01 : f32
    %56 = vector.broadcast %cst_28 : f32 to vector<32x128xf32>
    %57 = arith.mulf %56, %55 : vector<32x128xf32>
    %c0_29 = arith.constant 0 : index
    %c0_30 = arith.constant 0 : index
    %58 = vector.load %arg5[%c0_29, %c0_30] : memref<32x128xf32, #tpu.memory_space<vmem>>, vector<32x128xf32>
    tpu.vector_store %arg5[%c0_29, %c0_30], %57 {strides = array<i32>} : memref<32x128xf32, #tpu.memory_space<vmem>>, vector<32x128xf32>,
    return
  }
  func.func @transform_0(%arg0: i32) -> (i32, i32) {
    %c0_i32 = arith.constant 0 : i32
    %c0_i32_0 = arith.constant 0 : i32
    return %arg0, %c0_i32 : i32, i32
  }
  func.func @transform_1(%arg0: i32) -> (i32, i32) {
    %c0_i32 = arith.constant 0 : i32
    %c0_i32_0 = arith.constant 0 : i32
    %c0_i32_1 = arith.constant 0 : i32
    return %c0_i32, %c0_i32_0 : i32, i32
  }
  func.func @transform_2(%arg0: i32) -> (i32, i32) {
    %c0_i32 = arith.constant 0 : i32
    %c0_i32_0 = arith.constant 0 : i32
    %c0_i32_1 = arith.constant 0 : i32
    return %c0_i32, %c0_i32_0 : i32, i32
  }
  func.func @transform_3(%arg0: i32) -> (i32, i32) {
    %c0_i32 = arith.constant 0 : i32
    %c0_i32_0 = arith.constant 0 : i32
    %c0_i32_1 = arith.constant 0 : i32
    return %c0_i32, %c0_i32_0 : i32, i32
  }
  func.func @transform_4(%arg0: i32) -> (i32, i32) {
    %c0_i32 = arith.constant 0 : i32
    %c0_i32_0 = arith.constant 0 : i32
    return %arg0, %c0_i32 : i32, i32
  }
}

module attributes {stable_mosaic.version = 11 : i64} {
  func.func @kernel(%arg0: i32, %arg1: memref<32x6xf32, #tpu.memory_space<vmem>>, %arg2: memref<32x16xf32, #tpu.memory_space<vmem>>, %arg3: memref<32x384xf32, #tpu.memory_space<vmem>>, %arg4: memref<1x640xf32, #tpu.memory_space<vmem>>, %arg5: memref<32x128xf32, #tpu.memory_space<vmem>>) attributes {dimension_semantics = [#tpu.dimension_semantics<parallel>], iteration_bounds = array<i64: 2>, scalar_prefetch = 0 : i64, scratch_operands = 0 : i64, tpu.core_type = #tpu.core_type<tc>, window_params = [{transform_indices = @transform_0, window_bounds = array<i64: 32, 6>}, {pipeline_mode = #tpu.pipeline_mode<synchronous>, transform_indices = @transform_1, window_bounds = array<i64: 32, 16>}, {pipeline_mode = #tpu.pipeline_mode<synchronous>, transform_indices = @transform_2, window_bounds = array<i64: 32, 384>}, {pipeline_mode = #tpu.pipeline_mode<synchronous>, transform_indices = @transform_3, window_bounds = array<i64: 1, 640>}, {transform_indices = @transform_4, window_bounds = array<i64: 32, 128>}]} {
    %c0 = arith.constant 0 : index
    %c0_0 = arith.constant 0 : index
    %0 = vector.load %arg1[%c0, %c0_0] : memref<32x6xf32, #tpu.memory_space<vmem>>, vector<32x6xf32>
    %1 = vector.extract_strided_slice %0 {offsets = [0, 0], sizes = [32, 4], strides = [1, 1]} : vector<32x6xf32> to vector<32x4xf32>
    %2 = vector.extract_strided_slice %0 {offsets = [0, 4], sizes = [32, 2], strides = [1, 1]} : vector<32x6xf32> to vector<32x2xf32>
    %3 = arith.fptosi %2 : vector<32x2xf32> to vector<32x2xi32>
    %c16 = arith.constant 16 : index
    %c0_1 = arith.constant 0 : index
    %4 = vector.load %arg3[%c16, %c0_1] : memref<32x384xf32, #tpu.memory_space<vmem>>, vector<4x32xf32>
    %cst = arith.constant dense<0.000000e+00> : vector<32x32xf32>
    %5 = tpu.matmul %1, %4, %cst {dimension_numbers = #tpu.dot_dimension_numbers<[1], [0], [0], [1], [0, 0, 1, 1], [], []>} : vector<32x4xf32>, vector<4x32xf32>, vector<32x32xf32> -> vector<32x32xf32>
    %6 = tpu.iota {dimensions = array<i32: 1>} : vector<1x32xi32>
    %7 = vector.extract_strided_slice %3 {offsets = [0, 0], sizes = [32, 1], strides = [1, 1]} : vector<32x2xi32> to vector<32x1xi32>
    %8 = vector.broadcast %7 : vector<32x1xi32> to vector<32x32xi32>
    %9 = vector.broadcast %6 : vector<1x32xi32> to vector<32x32xi32>
    %10 = arith.cmpi eq, %8, %9 : vector<32x32xi32>
    %11 = arith.extui %10 : vector<32x32xi1> to vector<32x32xi32>
    %12 = arith.sitofp %11 : vector<32x32xi32> to vector<32x32xf32>
    %c0_2 = arith.constant 0 : index
    %c0_3 = arith.constant 0 : index
    %13 = vector.load %arg2[%c0_2, %c0_3] : memref<32x16xf32, #tpu.memory_space<vmem>>, vector<32x8xf32>
    %cst_4 = arith.constant dense<0.000000e+00> : vector<32x8xf32>
    %14 = tpu.matmul %12, %13, %cst_4 {dimension_numbers = #tpu.dot_dimension_numbers<[1], [0], [0], [1], [0, 0, 1, 1], [], []>} : vector<32x32xf32>, vector<32x8xf32>, vector<32x8xf32> -> vector<32x8xf32>
    %c0_5 = arith.constant 0 : index
    %c0_6 = arith.constant 0 : index
    %15 = vector.load %arg3[%c0_5, %c0_6] : memref<32x384xf32, #tpu.memory_space<vmem>>, vector<8x32xf32>
    %cst_7 = arith.constant dense<0.000000e+00> : vector<32x32xf32>
    %16 = tpu.matmul %14, %15, %cst_7 {dimension_numbers = #tpu.dot_dimension_numbers<[1], [0], [0], [1], [0, 0, 1, 1], [], []>} : vector<32x8xf32>, vector<8x32xf32>, vector<32x32xf32> -> vector<32x32xf32>
    %17 = arith.addf %5, %16 : vector<32x32xf32>
    %18 = vector.extract_strided_slice %3 {offsets = [0, 1], sizes = [32, 1], strides = [1, 1]} : vector<32x2xi32> to vector<32x1xi32>
    %19 = vector.broadcast %18 : vector<32x1xi32> to vector<32x32xi32>
    %20 = vector.broadcast %6 : vector<1x32xi32> to vector<32x32xi32>
    %21 = arith.cmpi eq, %19, %20 : vector<32x32xi32>
    %22 = arith.extui %21 : vector<32x32xi1> to vector<32x32xi32>
    %23 = arith.sitofp %22 : vector<32x32xi32> to vector<32x32xf32>
    %c0_8 = arith.constant 0 : index
    %c8 = arith.constant 8 : index
    %24 = vector.load %arg2[%c0_8, %c8] : memref<32x16xf32, #tpu.memory_space<vmem>>, vector<32x8xf32>
    %cst_9 = arith.constant dense<0.000000e+00> : vector<32x8xf32>
    %25 = tpu.matmul %23, %24, %cst_9 {dimension_numbers = #tpu.dot_dimension_numbers<[1], [0], [0], [1], [0, 0, 1, 1], [], []>} : vector<32x32xf32>, vector<32x8xf32>, vector<32x8xf32> -> vector<32x8xf32>
    %c8_10 = arith.constant 8 : index
    %c0_11 = arith.constant 0 : index
    %26 = vector.load %arg3[%c8_10, %c0_11] : memref<32x384xf32, #tpu.memory_space<vmem>>, vector<8x32xf32>
    %cst_12 = arith.constant dense<0.000000e+00> : vector<32x32xf32>
    %27 = tpu.matmul %25, %26, %cst_12 {dimension_numbers = #tpu.dot_dimension_numbers<[1], [0], [0], [1], [0, 0, 1, 1], [], []>} : vector<32x8xf32>, vector<8x32xf32>, vector<32x32xf32> -> vector<32x32xf32>
    %28 = arith.addf %17, %27 : vector<32x32xf32>
    %c0_13 = arith.constant 0 : index
    %c0_14 = arith.constant 0 : index
    %29 = vector.load %arg4[%c0_13, %c0_14] : memref<1x640xf32, #tpu.memory_space<vmem>>, vector<1x32xf32>
    %30 = vector.broadcast %29 : vector<1x32xf32> to vector<32x32xf32>
    %31 = arith.addf %28, %30 : vector<32x32xf32>
    %cst_15 = arith.constant 0.000000e+00 : f32
    %32 = vector.broadcast %cst_15 : f32 to vector<32x32xf32>
    %33 = arith.maximumf %31, %32 : vector<32x32xf32>
    %c0_16 = arith.constant 0 : index
    %c128 = arith.constant 128 : index
    %34 = vector.load %arg3[%c0_16, %c128] : memref<32x384xf32, #tpu.memory_space<vmem>>, vector<32x16xf32>
    %cst_17 = arith.constant dense<0.000000e+00> : vector<32x16xf32>
    %35 = tpu.matmul %33, %34, %cst_17 {dimension_numbers = #tpu.dot_dimension_numbers<[1], [0], [0], [1], [0, 0, 1, 1], [], []>} : vector<32x32xf32>, vector<32x16xf32>, vector<32x16xf32> -> vector<32x16xf32>
    %c0_18 = arith.constant 0 : index
    %c128_19 = arith.constant 128 : index
    %36 = vector.load %arg4[%c0_18, %c128_19] : memref<1x640xf32, #tpu.memory_space<vmem>>, vector<1x16xf32>
    %37 = vector.broadcast %36 : vector<1x16xf32> to vector<32x16xf32>
    %38 = arith.addf %35, %37 : vector<32x16xf32>
    %cst_20 = arith.constant 0.000000e+00 : f32
    %39 = vector.broadcast %cst_20 : f32 to vector<32x16xf32>
    %40 = arith.maximumf %38, %39 : vector<32x16xf32>
    %c0_21 = arith.constant 0 : index
    %c256 = arith.constant 256 : index
    %41 = vector.load %arg3[%c0_21, %c256] : memref<32x384xf32, #tpu.memory_space<vmem>>, vector<16x128xf32>
    %cst_22 = arith.constant dense<0.000000e+00> : vector<32x128xf32>
    %42 = tpu.matmul %40, %41, %cst_22 {dimension_numbers = #tpu.dot_dimension_numbers<[1], [0], [0], [1], [0, 0, 1, 1], [], []>} : vector<32x16xf32>, vector<16x128xf32>, vector<32x128xf32> -> vector<32x128xf32>
    %c0_23 = arith.constant 0 : index
    %c256_24 = arith.constant 256 : index
    %43 = vector.load %arg4[%c0_23, %c256_24] : memref<1x640xf32, #tpu.memory_space<vmem>>, vector<1x128xf32>
    %44 = vector.broadcast %43 : vector<1x128xf32> to vector<32x128xf32>
    %45 = arith.addf %42, %44 : vector<32x128xf32>
    %c0_25 = arith.constant 0 : index
    %c384 = arith.constant 384 : index
    %46 = vector.load %arg4[%c0_25, %c384] : memref<1x640xf32, #tpu.memory_space<vmem>>, vector<1x4xf32>
    %c0_26 = arith.constant 0 : index
    %c512 = arith.constant 512 : index
    %47 = vector.load %arg4[%c0_26, %c512] : memref<1x640xf32, #tpu.memory_space<vmem>>, vector<1x1xf32>
    %48 = vector.broadcast %46 : vector<1x4xf32> to vector<32x4xf32>
    %49 = arith.mulf %1, %48 : vector<32x4xf32>
    %cst_27 = arith.constant dense<0.000000e+00> : vector<32xf32>
    %50 = vector.multi_reduction <add>, %49, %cst_27 [1] : vector<32x4xf32> to vector<32xf32>
    %51 = vector.shape_cast %50 : vector<32xf32> to vector<32x1xf32>
    %52 = vector.broadcast %47 : vector<1x1xf32> to vector<32x1xf32>
    %53 = arith.addf %51, %52 : vector<32x1xf32>
    %54 = vector.broadcast %53 : vector<32x1xf32> to vector<32x128xf32>
    %55 = arith.addf %54, %45 : vector<32x128xf32>
    %cst_28 = arith.constant 5.000000e-01 : f32
    %56 = vector.broadcast %cst_28 : f32 to vector<32x128xf32>
    %57 = arith.mulf %56, %55 : vector<32x128xf32>
    %c0_29 = arith.constant 0 : index
    %c0_30 = arith.constant 0 : index
    %58 = vector.load %arg5[%c0_29, %c0_30] : memref<32x128xf32, #tpu.memory_space<vmem>>, vector<32x128xf32>
    tpu.vector_store %arg5[%c0_29, %c0_30], %57 {strides = array<i32>} : memref<32x128xf32, #tpu.memory_space<vmem>>, vector<32x128xf32>,
    return
  }
  func.func @transform_0(%arg0: i32) -> (i32, i32) {
    %c0_i32 = arith.constant 0 : i32
    %c0_i32_0 = arith.constant 0 : i32
    return %arg0, %c0_i32 : i32, i32
  }
  func.func @transform_1(%arg0: i32) -> (i32, i32) {
    %c0_i32 = arith.constant 0 : i32
    %c0_i32_0 = arith.constant 0 : i32
    %c0_i32_1 = arith.constant 0 : i32
    return %c0_i32, %c0_i32_0 : i32, i32
  }
  func.func @transform_2(%arg0: i32) -> (i32, i32) {
    %c0_i32 = arith.constant 0 : i32
    %c0_i32_0 = arith.constant 0 : i32
    %c0_i32_1 = arith.constant 0 : i32
    return %c0_i32, %c0_i32_0 : i32, i32
  }
  func.func @transform_3(%arg0: i32) -> (i32, i32) {
    %c0_i32 = arith.constant 0 : i32
    %c0_i32_0 = arith.constant 0 : i32
    %c0_i32_1 = arith.constant 0 : i32
    return %c0_i32, %c0_i32_0 : i32, i32
  }
  func.func @transform_4(%arg0: i32) -> (i32, i32) {
    %c0_i32 = arith.constant 0 : i32
    %c0_i32_0 = arith.constant 0 : i32
    return %arg0, %c0_i32 : i32, i32
  }
}

</mosaic_0001>

<bundles_post_ra>
// kernel: tpu_custom_call.1
= control target key start
LH: loop header
LB: loop body
LE: loop exit
PB: predicated region body
PF: predicated region fallthrough
CT: control target
= control target key end

     0   :  { %9 = vsyncpa [#allocation3], 0  ;;  %s6444_s0 = inlined_call_operand.vmem [shape: f32[64,6], index: 0, kind: input, shape index: {}]   ;;  %s6445_s1 = inlined_call_operand.vmem [shape: f32[32,16], index: 1, kind: input, shape index: {}]   ;;  %s6446_s2 = inlined_call_operand.vmem [shape: f32[32,384], index: 2, kind: input, shape index: {}]   ;;  %s6447_s3 = inlined_call_operand.vmem [shape: f32[1,640], index: 3, kind: input, shape index: {}]   ;;  %s6448_s4 = inlined_call_operand.hbm [shape: f32[64,128], index: 4, kind: output, shape index: {}]  }
   0x1   :  { %11 = vsyncpa [#allocation3 + $0x1], 0  ;;  %s5647_s15 = smov 0   ;;  %s5649_s16 = smov 0  }
   0x2   :  { %s5651_s17 = smov 0   ;;  %s5653_s18 = smov 0  }
   0x3 LB: > { %s5668_s19 = sadd.s32 4294967295, %s5612_s18   ;;  %s4712_s20 = sadd.s32 4294967294, %s5612_s18   ;;  %s5612_s18 = sphi %s5653_s18, %s6454_s18   ;;  %s5608_s17 = sphi %s5651_s17, %s6453_s17   ;;  %s5604_s16 = sphi %s5649_s16, %s6452_s16   ;;  %s5600_s15 = sphi %s5647_s15, %s6451_s15  }
   0x4   : > { %s5672_s21 = sadd.s32 1, %s5612_s18   ;;  %s113_s22 = sadd.s32 1, %s5608_s17 }
   0x5   : > { %s110_s23 = ssub.s32 %s5612_s18, %s5672_s21  ;;  %p123_p0 = scmp.ne.s32.totalorder %s5608_s17, %s5604_s16 }
   0x6   : > { %p111_p1 = scmp.eq.s32.totalorder %s110_s23, 0  ;;  %p124_p2 = scmp.eq.s32.totalorder %s5668_s19, 1 }
   0x7   : > { %p129_p3 = scmp.ne.s32.totalorder %s5604_s16, %s5600_s15  ;;  %p130_p4 = scmp.eq.s32.totalorder %s4712_s20, 1 }
   0x8   : > { %s5683_s24 = scalar_select %p111_p1, %s5608_s17, %s113_s22  }
   0x9   : > { %p5685_p5 = por %p124_p2, %p123_p0  ;;  %p5689_p6 = por %p130_p4, %p129_p3 }
   0xa   : > { %p4715_p7 = scmp.ge.s32.totalorder %s5612_s18, 1  ;;  %p166_p8 = scmp.lt.s32.totalorder %s5612_s18, 3 }
   0xc   : > { %p167_p9 = pnand %p4715_p7, %p166_p8 }
   0xd   : > { %s4717_s27 = sshll.u32 (!%p167_p9), %s5668_s19, 2  ;;  %s5616_s14 = smov (!%p167_p9), 120  }
   0xe   : > { %170 = sbr.rel (%p167_p9) target bundleno = 1385 (0x569), region = 36  ;;  %p193_p10 = scmp.lt.s32.totalorder (!%p167_p9), %s4717_s27, 7 }
   0xf   : > { %s189_s9 = sand.u32 (!%p167_p9), 1, %s5604_s16  }
  0x10   : > { %s6404_s23 = scalar_lea.sflag (!%p167_p9), [#allocation3], %s189_s9 }
  0x13   : > { %v5699_v0 = vld [vmem:[%s6445_s1 + $0x18] sm:$0xff]  ;;  %v5704_v1 = vld [vmem:[%s6445_s1 + $0x10] sm:$0xff]  ;;  %v5614_v2 = vmov 4   ;;  %v5715_v5 = vld [vmem:[%s6445_s1 + $0x8] sm:$0xff]  ;;  %s6456_s27 = smov (!%p193_p10, %s4717_s27), 7  ;;  %v5615_v37 = vmov 5   ;;  %v208_v38 = vlaneseq }
  0x14   : > { %5543 = vset.pattern.permute.xlu1 %v5614_v2  ;;  %5542 = vset.pattern.permute.xlu0 %v5614_v2  ;;  %v5707_v3 = vand.u32 4294901760, %v5699_v0  ;;  %v5710_v4 = vand.u32 4294901760, %v5704_v1  ;;  %v5720_v6 = vld [vmem:[%s6445_s1] sm:$0xff]  ;;  %v5723_v7 = vand.u32 4294901760, %v5715_v5  ;;  %s4718_s10 = sshll.u32 %s6456_s27, 3  ;;  %vm238_vm0 = vcmask 261120  }
  0x15   : > { %v5726_v8 = vand.u32 4294901760, %v5720_v6  ;;  %s5756_s13 = scalar_lea.vmem %s6444_s0, %s4718_s10  ;;  %v5799_v39 = vand.u32 127, %v208_v38  ;;  %v5617_v42 = vmov 0.0   ;;  %vm1467_vm5 = vcmask 1043456   ;;  %s4716_s10 = sshll.u32 %s189_s9, 5 }
  0x16   : > { %v5730_v9 = vsub.f32 %v5699_v0, %v5707_v3  ;;  %v5734_v10 = vsub.f32 %v5704_v1, %v5710_v4  ;;  %5032 = vmatprep.subr.mxu0 %v5707_v3  ;;  %v5739_v11 = vsub.f32 %v5715_v5, %v5723_v7  ;;  %v5760_v15 = vld [vmem:[%s5756_s13 + $0x10] sm:$0xff]  ;;  %v5763_v16 = vld [vmem:[%s5756_s13] sm:$0xff]  ;;  %v5766_v17 = vld [vmem:[%s5756_s13 + $0x18] sm:$0xff]  ;;  %vm866_vm6 = vcmask 64512   ;;  %s191_s11 = scalar_lea.vmem [#allocation2], %s4716_s10  ;;  %s5619_s27 = smov [#allocation2]  }
  0x17   : > { %v5743_v12 = vsub.f32 %v5720_v6, %v5726_v8  ;;  %5033 = vmatpush3.msra.mxu0 %v5707_v3  ;;  %v5492_v20 = vtrunc.f32 %v5760_v15  ;;  %v5488_v21 = vtrunc.f32 %v5763_v16  ;;  %v5777_v22 = vld [vmem:[%s5756_s13 + $0x8] sm:$0xff]  ;;  %v5494_v25 = vtrunc.f32 %v5766_v17  ;;  %s4650_s12 = sshll.u32 %s191_s11, 4  ;;  %s5556_s28 = sshll.u32 %s5619_s27, 4  ;;  %s6400_s12 = int_to_ptr.vmem [resolvable:$true] %s4650_s12  ;;  %s5557_s28 = int_to_ptr.vmem [resolvable:$false] %s5556_s28 }
  0x18   : > { %v5747_v13 = vand.u32 4294901760, %v5730_v9  ;;  %v5750_v14 = vand.u32 4294901760, %v5734_v10  ;;  %5034 = vmatprep.subr.mxu0 %v5710_v4  ;;  %v5771_v19 = vand.u32 4294901760, %v5739_v11  ;;  %v5490_v26 = vtrunc.f32 %v5777_v22  ;;  %s5558_s29 = scalar_lea.vmem %s5557_s28, 1024  ;;  %p5559_p0 = scmp.lt.s32.totalorder %s6400_s12, %s5557_s28 }
  0x19   : > { %5035 = vmatpush3.msra.mxu0 %v5710_v4  ;;  %v5782_v24 = vand.u32 4294901760, %v5743_v12  ;;  %v5493_v27 = vcvt.f32.s32 %v5492_v20  ;;  %v5489_v28 = vcvt.f32.s32 %v5488_v21  ;;  %v5495_v30 = vcvt.f32.s32 %v5494_v25 }
  0x1a   : > { %v388_v18 = vsub.f32 %v5730_v9, %v5747_v13  ;;  %5036 = vmatprep.subr.mxu0 %v5723_v7  ;;  %v395_v23 = vsub.f32 %v5734_v10, %v5750_v14  ;;  %v5491_v31 = vcvt.f32.s32 %v5490_v26  ;;  %v402_v33 = vsub.f32 %v5739_v11, %v5771_v19 }
  0x1b   : > { %5037 = vmatpush3.msra.mxu0 %v5723_v7  ;;  %217 = vperm.xlu1 %5543, %v5493_v27   ;;  %v409_v34 = vsub.f32 %v5743_v12, %v5782_v24  ;;  %vm1454_vm7 = vcmask 31744   ;;  %vm3969_vm12 = vcmask 130048  }
  0x1c   : > { %5038 = vmatprep.subr.mxu0 %v5726_v8  ;;  %v389_v29 = vand.u32 4294901760, %v388_v18  ;;  %211 = vperm.xlu0 %5542, %v5489_v28   ;;  %v396_v32 = vand.u32 4294901760, %v395_v23  ;;  %v403_v35 = vand.u32 4294901760, %v402_v33 }
  0x1d   : > { %5039 = vmatpush3.msra.mxu0 %v5726_v8  ;;  %v410_v36 = vand.u32 4294901760, %v409_v34  ;;  %v207_v34 = vld [vmem:[%s6446_s2 + $0x30] sm:$0xf] }
  0x1e   : > { %5060 = vmatprep.subr.mxu0 %v5730_v9  ;;  %5046 = vmatprep.subr.mxu1 %v389_v29 }
  0x1f   : > { %5047 = vmatpush3.msra.mxu1 %v389_v29  ;;  %220 = vperm.xlu1 %5543, %v5495_v30  }
  0x20   : > { %5048 = vmatprep.subr.mxu1 %v396_v32  ;;  %214 = vperm.xlu0 %5542, %v5491_v31  }
  0x21   : > { %5049 = vmatpush3.msra.mxu1 %v396_v32 }
  0x22   : > { %5050 = vmatprep.subr.mxu1 %v403_v35 }
  0x23   : > { %5051 = vmatpush3.msra.mxu1 %v403_v35  ;;  %2080 = vrot.lane.b32.xlu1 %v5699_v0, %s5616_s14 }
  0x24   : > { %5052 = vmatprep.subr.mxu1 %v410_v36  ;;  %5544 = vset.pattern.permute.xlu0 %v5615_v37 }
  0x25   : > { %5053 = vmatpush3.msra.mxu1 %v410_v36  ;;  %2047 = vperm.xlu0 %5544, %v5489_v28  }
  0x26   : > { %5074 = vmatprep.subr.mxu1 %v5707_v3  ;;  %5545 = vset.pattern.permute.xlu1 %v5615_v37 }
  0x27   : > { %2050 = vperm.xlu1 %5545, %v5491_v31  }
  0x29   : > { %2078 = vrot.lane.b32.xlu0 %v5704_v1, %s5616_s14 }
  0x2b   : > { %2053 = vperm.xlu1 %5545, %v5493_v27  }
  0x2d   : > { %2056 = vperm.xlu0 %5544, %v5495_v30  }
  0x2f   : > { %2076 = vrot.lane.b32.xlu1 %v5715_v5, %s5616_s14 }
  0x31   : > { %2074 = vrot.lane.b32.xlu0 %v5720_v6, %s5616_s14  ;;  %s4761_s14 = sshll.u32 %s5668_s19, 9  ;;  %s5552_s19 = scalar_lea.vmem %s6400_s12, 512 }
  0x32   : > { %s6398_s22 = scalar_lea.hbm %s6448_s4, %s4761_s14  ;;  %p5553_p11 = scmp.ne.s32.totalorder %s6400_s12, %s5552_s19 }
  0x33   : > { %p5560_p1 = scmp.lt.s32.totalorder %s5558_s29, %s5552_s19 }
  0x34   : > { %p5554_p12 = pnand %p5553_p11, %p5685_p5 }
  0x35   : > { %p5561_p2 = por %p5560_p1, %p5559_p0 }
  0x36   : > { %p5555_p13 = pneg %p5554_p12 }
  0x38   : > { %p5562_p3 = pnand %p5561_p2, %p5555_p13 }
  0x96   : > { %v218_v40 = vpop.permute.xlu1 %217 }
  0x97   : > { %v212_v41 = vpop.permute.xlu0 %211  ;;  %vm224_vm1 = vcmp.eq.s32.totalorder %v218_v40, %v5799_v39 }
  0x98   : > { %vm222_vm2 = vcmp.eq.s32.totalorder %v212_v41, %v5799_v39  ;;  %v5804_v43 = vsel %vm224_vm1, 1.0, %v5617_v42 }
  0x99   : > { %v5807_v44 = vsel %vm222_vm2, 1.0, %v5617_v42  ;;  %v246_v45 = vsel %vm238_vm0, %v5804_v43, 0 }
  0x9a   : > { %5054 = vmatprep.mubr.msk.f32.mxu1 %vm238_vm0, %v5807_v44  ;;  %v240_v46 = vsel %vm238_vm0, %v5807_v44, 0  ;;  %v5815_v47 = vsub.f32 %v246_v45, %v246_v45  ;;  %v221_v48 = vpop.permute.xlu1 %220 }
  0x9b   : > { %v215_v49 = vpop.permute.xlu0 %214  ;;  %v321_v50 = vsub.f32 %v240_v46, %v240_v46  ;;  %vm225_vm3 = vcmp.eq.s32.totalorder %v221_v48, %v5799_v39 }
  0x9c   : > { %vm223_vm4 = vcmp.eq.s32.totalorder %v215_v49, %v5799_v39  ;;  %v5820_v51 = vsel %vm225_vm3, 1.0, %v5617_v42  ;;  %v342_v59 = vand.u32 4294901760, %v5815_v47 }
  0x9d   : > { %v5823_v52 = vsel %vm223_vm4, 1.0, %v5617_v42  ;;  %v322_v53 = vand.u32 4294901760, %v321_v50  ;;  %v249_v54 = vsel %vm238_vm0, %v5820_v51, 0 }
  0x9e   : > { %v243_v55 = vsel %vm238_vm0, %v5823_v52, 0  ;;  %5055 = vmatmul.mubr.msk.f32.vlgmr.msra.gmra.mxu1 %vm238_vm0, %v5823_v52  ;;  %v351_v56 = vsub.f32 %v249_v54, %v249_v54  ;;  %v343_v63 = vsub.f32 %v5815_v47, %v342_v59 }
  0x9f   : > { %v331_v57 = vsub.f32 %v243_v55, %v243_v55  ;;  %5057 = vmatprep.mubr.msk.f32.mxu1 %vm238_vm0, %v5804_v43  ;;  %5075 = vmatpush3.msra.mxu1 %v5707_v3  ;;  %v323_v58 = vsub.f32 %v321_v50, %v322_v53 }
  0xa0   : > { %5076 = vmatprep.subr.mxu1 %v5710_v4  ;;  %v352_v0 = vand.u32 4294901760, %v351_v56  ;;  %v344_v2 = vand.u32 4294901760, %v343_v63 }
  0xa1   : > { %v332_v60 = vand.u32 4294901760, %v331_v57  ;;  %5077 = vmatpush3.msra.mxu1 %v5710_v4  ;;  %v324_v61 = vand.u32 4294901760, %v323_v58 }
  0xa2   : > { %5058 = vmatmul.mubr.msk.f32.gmra.mxu1 %vm238_vm0, %v5820_v51  ;;  %5078 = vmatprep.subr.mxu1 %v5723_v7  ;;  %v353_v5 = vsub.f32 %v351_v56, %v352_v0 }
  0xa3   : > { %5040 = vmatprep.mubr.f32.mxu0 %v324_v61  ;;  %5079 = vmatpush3.msra.mxu1 %v5723_v7  ;;  %v333_v62 = vsub.f32 %v331_v57, %v332_v60 }
  0xa4   : > { %5082 = vmatprep.mubr.f32.mxu1 %v322_v53  ;;  %5080 = vmatprep.subr.mxu1 %v5726_v8  ;;  %v354_v6 = vand.u32 4294901760, %v353_v5 }
  0xa5   : > { %5081 = vmatpush3.msra.mxu1 %v5726_v8  ;;  %v334_v1 = vand.u32 4294901760, %v333_v62 }
  0xa6   : > { %5083 = vmatmul.mubr.f32.vlgmr.msra.gmra.mxu1 %v332_v60  ;;  %5102 = vmatprep.subr.mxu1 %v5707_v3 }
  0xa7   : > { %5041 = vmatmul.mubr.f32.vlgmr.msra.gmra.mxu0 %v334_v1  ;;  %5085 = vmatprep.mubr.f32.mxu1 %v342_v59 }
  0xa8   : > { %5061 = vmatpush3.msra.mxu0 %v5730_v9  ;;  %5103 = vmatpush3.msra.mxu1 %v5707_v3  ;;  %v865_v3 = vld [vmem:[%s6446_s2] sm:$0xff] }
  0xa9   : > { %5043 = vmatprep.mubr.f32.mxu0 %v344_v2  ;;  %5062 = vmatprep.subr.mxu0 %v5734_v10 }
  0xaa   : > { %5104 = vmatprep.subr.mxu1 %v5710_v4  ;;  %5063 = vmatpush3.msra.mxu0 %v5734_v10 }
  0xab   : > { %5105 = vmatpush3.msra.mxu1 %v5710_v4  ;;  %5064 = vmatprep.subr.mxu0 %v5739_v11  ;;  %v5887_v4 = vand.u32 4294901760, %v865_v3 }
  0xac   : > { %5086 = vmatmul.mubr.f32.gmra.mxu1 %v352_v0  ;;  %5106 = vmatprep.subr.mxu1 %v5723_v7 }
  0xad   : > { %5044 = vmatmul.mubr.f32.gmra.mxu0 %v354_v6  ;;  %5107 = vmatpush3.msra.mxu1 %v5723_v7  ;;  %v5890_v7 = vsub.f32 %v865_v3, %v5887_v4 }
  0xae   : > { %5065 = vmatpush3.msra.mxu0 %v5739_v11  ;;  %5110 = vmatprep.mubr.msk.f32.mxu1 %vm238_vm0, %v5807_v44 }
  0xaf   : > { %5066 = vmatprep.subr.mxu0 %v5743_v12  ;;  %5068 = vmatprep.mubr.f32.mxu0 %v321_v50 }
  0xb0   : > { %5108 = vmatprep.subr.mxu1 %v5726_v8  ;;  %5067 = vmatpush3.msra.mxu0 %v5743_v12 }
  0xb1   : > { %5109 = vmatpush3.msra.mxu1 %v5726_v8  ;;  %5088 = vmatprep.subr.mxu0 %v5747_v13  ;;  %v5895_v8 = vand.u32 4294901760, %v5890_v7 }
  0xb2   : > { %5111 = vmatmul.mubr.msk.f32.vlgmr.msra.gmra.mxu1 %vm238_vm0, %v5823_v52  ;;  %5069 = vmatmul.mubr.f32.vlgmr.msra.gmra.mxu0 %v331_v57 }
  0xb3   : > { %5089 = vmatpush3.msra.mxu0 %v5747_v13  ;;  %5113 = vmatprep.mubr.msk.f32.mxu1 %vm238_vm0, %v5804_v43  ;;  %v1019_v9 = vsub.f32 %v5890_v7, %v5895_v8 }
  0xb4   : > { %5071 = vmatprep.mubr.f32.mxu0 %v5815_v47  ;;  %5090 = vmatprep.subr.mxu0 %v5750_v14 }
  0xb5   : > { %5091 = vmatpush3.msra.mxu0 %v5750_v14  ;;  %v1020_v10 = vand.u32 4294901760, %v1019_v9 }
  0xb6   : > { %5092 = vmatprep.subr.mxu0 %v5771_v19  ;;  %5114 = vmatmul.mubr.msk.f32.gmra.mxu1 %vm238_vm0, %v5820_v51 }
  0xb7   : > { %5072 = vmatmul.mubr.f32.gmra.mxu0 %v351_v56  ;;  %5124 = vmatprep.subr.mxu1 %v1020_v10 }
  0xb8   : > { %5093 = vmatpush3.msra.mxu0 %v5771_v19  ;;  %5096 = vmatprep.mubr.msk.f32.mxu0 %vm238_vm0, %v5807_v44 }
  0xb9   : > { %5094 = vmatprep.subr.mxu0 %v5782_v24  ;;  %5125 = vmatpush3.msra.mxu1 %v1020_v10 }
  0xba   : > { %5095 = vmatpush3.msra.mxu0 %v5782_v24  ;;  %5140 = vmatprep.subr.mxu1 %v5887_v4 }
  0xbb   : > { %5097 = vmatmul.mubr.msk.f32.vlgmr.msra.gmra.mxu0 %vm238_vm0, %v5823_v52  ;;  %5116 = vmatprep.subr.mxu0 %v5887_v4 }
  0xbc   : > { %5099 = vmatprep.mubr.msk.f32.mxu0 %vm238_vm0, %v5804_v43  ;;  %5117 = vmatpush3.msra.mxu0 %v5887_v4  ;;  %v1469_v43 = vsel %vm1467_vm5, %v207_v34, 0 }
  0xbd   : > { %5132 = vmatprep.subr.mxu0 %v5890_v7  ;;  %v5904_v50 = vand.u32 4294901760, %v1469_v43 }
  0xbf   : > { %5100 = vmatmul.mubr.msk.f32.gmra.mxu0 %vm238_vm0, %v5820_v51  ;;  %v5910_v62 = vsub.f32 %v1469_v43, %v5904_v50 }
 0x15e   : > { %v5056_v11 = vpop.f32.mrf.mxu1 }
 0x160   : > { %v447_v12 = vpop.f32.mrf.mxu1 }
 0x162   : > { %v5059_v13 = vpop.f32.mrf.mxu1 }
 0x164   : > { %v459_v14 = vpop.f32.mrf.mxu1 }
 0x166   : > { %v5084_v18 = vpop.f32.mrf.mxu1 }
 0x167   : > { %v5042_v19 = vpop.f32.mrf.mxu0 }
 0x168   : > { %v643_v21 = vpop.f32.mrf.mxu1  ;;  %v454_v28 = vadd.f32 %v5056_v11, %v5042_v19 }
 0x169   : > { %v326_v20 = vpop.f32.mrf.mxu0 }
 0x16a   : > { %v448_v30 = vadd.f32 %v447_v12, %v326_v20 }
 0x16c   : > { %v5087_v24 = vpop.f32.mrf.mxu1 }
 0x16d   : > { %v5045_v23 = vpop.f32.mrf.mxu0 }
 0x16e   : > { %v659_v27 = vpop.f32.mrf.mxu1  ;;  %v466_v35 = vadd.f32 %v5059_v13, %v5045_v23  ;;  %v5922_v13 = vand.u32 4294901760, %v5910_v62 }
 0x16f   : > { %v346_v25 = vpop.f32.mrf.mxu0 }
 0x170   : > { %v460_v38 = vadd.f32 %v459_v14, %v346_v25 }
 0x172   : > { %v5070_v26 = vpop.f32.mrf.mxu0  ;;  %v5112_v32 = vpop.f32.mrf.mxu1 }
 0x173   : > { %v553_v31 = vadd.f32 %v5070_v26, %v454_v28  ;;  %v1611_v26 = vsub.f32 %v5910_v62, %v5922_v13 }
 0x174   : > { %v545_v29 = vpop.f32.mrf.mxu0  ;;  %v843_v44 = vpop.f32.mrf.mxu1 }
 0x175   : > { %v546_v36 = vadd.f32 %v545_v29, %v448_v30  ;;  %v652_v41 = vadd.f32 %v5084_v18, %v553_v31  ;;  %v2081_v29 = vpop.permute.xlu1 %2080  ;;  %v1456_v30 = vsel %vm1454_vm7, %v5763_v16, 0  ;;  %v1612_v34 = vand.u32 4294901760, %v1611_v26 }
 0x176   : > { %v5115_v54 = vpop.f32.mrf.mxu1 }
 0x177   : > { %v5073_v33 = vpop.f32.mrf.mxu0  ;;  %v644_v48 = vadd.f32 %v643_v21, %v546_v36  ;;  %v5940_v36 = vand.u32 4294901760, %v1456_v30 }
 0x178   : > { %v567_v40 = vadd.f32 %v5073_v33, %v466_v35  ;;  %v855_v2 = vpop.f32.mrf.mxu1  ;;  %v5938_v35 = vpop.permute.xlu0 %2047 }
 0x179   : > { %v559_v37 = vpop.f32.mrf.mxu0  ;;  %vm2058_vm8 = vcmp.eq.s32.totalorder %v5938_v35, %v5799_v39 }
 0x17a   : > { %v560_v46 = vadd.f32 %v559_v37, %v460_v38  ;;  %v668_v53 = vadd.f32 %v5087_v24, %v567_v40  ;;  %v1459_v37 = vsel %vm1454_vm7, %v5777_v22, 0  ;;  %v5945_v40 = vpop.permute.xlu1 %2050  ;;  %v5954_v22 = vsub.f32 %v1456_v30, %v5940_v36 }
 0x17b   : > { %v5098_v45 = vpop.f32.mrf.mxu0  ;;  %v5951_v43 = vand.u32 4294901760, %v1459_v37  ;;  %vm2059_vm9 = vcmp.eq.s32.totalorder %v5945_v40, %v5799_v39 }
 0x17c   : > { %v757_v47 = vadd.f32 %v5098_v45, %v652_v41  ;;  %v660_v59 = vadd.f32 %v659_v27, %v560_v46  ;;  %v1462_v41 = vsel %vm1454_vm7, %v5760_v15, 0  ;;  %v5967_v46 = vand.u32 4294901760, %v2081_v29 }
 0x17d   : > { %v750_v49 = vpop.f32.mrf.mxu0  ;;  %v5964_v15 = vsub.f32 %v1459_v37, %v5951_v43 }
 0x17e   : > { %v850_v51 = vadd.f32 %v5112_v32, %v757_v47  ;;  %v751_v52 = vadd.f32 %v750_v49, %v644_v48  ;;  %v5961_v45 = vpop.permute.xlu1 %2053 }
 0x17f   : > { %v5101_v55 = vpop.f32.mrf.mxu0  ;;  %vm2060_vm10 = vcmp.eq.s32.totalorder %v5961_v45, %v5799_v39  ;;  %v2712_v45 = vld [vmem:[%s6446_s2 + $0x18] sm:$0xff] }
 0x180   : > { %v871_v56 = vsel %vm866_vm6, %v850_v51, 0  ;;  %v844_v57 = vadd.f32 %v843_v44, %v751_v52  ;;  %v769_v58 = vadd.f32 %v5101_v55, %v668_v53  ;;  %v5959_v44 = vand.u32 4294901760, %v1462_v41 }
 0x181   : > { %v5907_v60 = vand.u32 4294901760, %v871_v56  ;;  %v762_v61 = vpop.f32.mrf.mxu0  ;;  %v5981_v51 = vsub.f32 %v2081_v29, %v5967_v46 }
 0x182   : > { %v868_v63 = vsel %vm866_vm6, %v844_v57, 0  ;;  %v862_v0 = vadd.f32 %v5115_v54, %v769_v58  ;;  %v763_v1 = vadd.f32 %v762_v61, %v660_v59  ;;  %v5974_v48 = vsub.f32 %v1462_v41, %v5959_v44  ;;  %v2077_v54 = vpop.permute.xlu1 %2076 }
 0x183   : > { %v956_v5 = vsub.f32 %v871_v56, %v5907_v60  ;;  %v5914_v6 = vand.u32 4294901760, %v868_v63  ;;  %v5997_v57 = vand.u32 4294901760, %v2077_v54  ;;  %v6001_v59 = vand.u32 4294901760, %v5981_v51 }
 0x184   : > { %v877_v3 = vsel %vm866_vm6, %v862_v0, 0  ;;  %v856_v9 = vadd.f32 %v855_v2, %v763_v1  ;;  %v1559_v55 = vand.u32 4294901760, %v5974_v48 }
 0x185   : > { %v957_v10 = vand.u32 4294901760, %v956_v5  ;;  %v946_v11 = vsub.f32 %v868_v63, %v5914_v6  ;;  %v5918_v12 = vand.u32 4294901760, %v877_v3  ;;  %5126 = vmatprep.mubr.f32.mxu1 %v5914_v6 }
 0x186   : > { %v874_v14 = vsel %vm866_vm6, %v856_v9, 0  ;;  %5127 = vmatmul.mubr.f32.vlgmr.msra.gmra.mxu1 %v5907_v60 }
 0x187   : > { %v976_v18 = vsub.f32 %v877_v3, %v5918_v12  ;;  %v5927_v19 = vand.u32 4294901760, %v874_v14  ;;  %v947_v20 = vand.u32 4294901760, %v946_v11  ;;  %5141 = vmatpush3.msra.mxu1 %v5887_v4  ;;  %v958_v21 = vsub.f32 %v956_v5, %v957_v10 }
 0x188   : > { %5156 = vmatprep.subr.mxu1 %v5887_v4  ;;  %v2235_v3 = vsub.f32 %v5981_v51, %v6001_v59 }
 0x189   : > { %v966_v23 = vsub.f32 %v874_v14, %v5927_v19  ;;  %5129 = vmatprep.mubr.f32.mxu1 %v5927_v19  ;;  %v948_v24 = vsub.f32 %v946_v11, %v947_v20  ;;  %v977_v25 = vand.u32 4294901760, %v976_v18  ;;  %v959_v31 = vand.u32 4294901760, %v958_v21 }
 0x18a   : > { %5130 = vmatmul.mubr.f32.gmra.mxu1 %v5918_v12 }
 0x18b   : > { %5142 = vmatprep.mubr.f32.mxu1 %v947_v20  ;;  %v949_v27 = vand.u32 4294901760, %v948_v24  ;;  %v967_v28 = vand.u32 4294901760, %v966_v23  ;;  %v978_v32 = vsub.f32 %v976_v18, %v977_v25 }
 0x18d   : > { %5118 = vmatprep.mubr.f32.mxu0 %v949_v27  ;;  %v968_v33 = vsub.f32 %v966_v23, %v967_v28  ;;  %v979_v16 = vand.u32 4294901760, %v978_v32  ;;  %v6061_v27 = vsel %vm2059_vm9, 1.0, %v5617_v42 }
 0x18e   : > { %5119 = vmatmul.mubr.f32.vlgmr.msra.gmra.mxu0 %v959_v31  ;;  %5143 = vmatmul.mubr.f32.vlgmr.msra.gmra.mxu1 %v957_v10  ;;  %v2090_v31 = vsel %vm238_vm0, %v6061_v27, 0 }
 0x18f   : > { %5133 = vmatpush3.msra.mxu0 %v5890_v7  ;;  %5145 = vmatprep.mubr.f32.mxu1 %v967_v28  ;;  %v969_v38 = vand.u32 4294901760, %v968_v33  ;;  %v1465_v7 = vsel %vm1454_vm7, %v5766_v17, 0  ;;  %v1539_v17 = vand.u32 4294901760, %v5954_v22  ;;  %v6066_v28 = vsel %vm2060_vm10, 1.0, %v5617_v42 }
 0x190   : > { %5148 = vmatprep.subr.mxu0 %v5895_v8  ;;  %5157 = vmatpush3.msra.mxu1 %v5887_v4  ;;  %v2079_v4 = vpop.permute.xlu0 %2078  ;;  %v5969_v47 = vand.u32 4294901760, %v1465_v7  ;;  %v6082_v32 = vsub.f32 %v2090_v31, %v2090_v31 }
 0x191   : > { %5121 = vmatprep.mubr.f32.mxu0 %v969_v38  ;;  %5172 = vmatprep.subr.mxu1 %v1612_v34  ;;  %v1540_v53 = vsub.f32 %v5954_v22, %v1539_v17  ;;  %v5993_v56 = vand.u32 4294901760, %v2079_v4 }
 0x192   : > { %5122 = vmatmul.mubr.f32.gmra.mxu0 %v979_v16  ;;  %5146 = vmatmul.mubr.f32.gmra.mxu1 %v977_v25  ;;  %v5986_v52 = vsub.f32 %v1465_v7, %v5969_v47 }
 0x193   : > { %5134 = vmatprep.mubr.f32.mxu0 %v946_v11  ;;  %5158 = vmatprep.mubr.f32.mxu1 %v5914_v6  ;;  %v1541_v0 = vand.u32 4294901760, %v1540_v53  ;;  %v6010_v1 = vsub.f32 %v2079_v4, %v5993_v56 }
 0x194   : > { %v5978_v49 = vpop.permute.xlu0 %2056  ;;  %v1569_v63 = vand.u32 4294901760, %v5986_v52 }
 0x195   : > { %vm2061_vm11 = vcmp.eq.s32.totalorder %v5978_v49, %v5799_v39 }
 0x196   : > { %5135 = vmatmul.mubr.f32.vlgmr.msra.gmra.mxu0 %v956_v5  ;;  %5159 = vmatmul.mubr.f32.vlgmr.msra.gmra.mxu1 %v5907_v60  ;;  %v6019_v5 = vsub.f32 %v2077_v54, %v5997_v57  ;;  %v1570_v9 = vsub.f32 %v5986_v52, %v1569_v63  ;;  %v6085_v33 = vsel %vm2061_vm11, 1.0, %v5617_v42 }
 0x197   : > { %5149 = vmatpush3.msra.mxu0 %v5895_v8  ;;  %5137 = vmatprep.mubr.f32.mxu0 %v966_v23  ;;  %v1549_v8 = vand.u32 4294901760, %v5964_v15  ;;  %v2096_v35 = vsel %vm238_vm0, %v6085_v33, 0 }
 0x198   : > { %5161 = vmatprep.mubr.f32.mxu1 %v5927_v19  ;;  %5164 = vmatprep.subr.mxu0 %v5904_v50  ;;  %v2075_v61 = vpop.permute.xlu0 %2074  ;;  %v1571_v14 = vand.u32 4294901760, %v1570_v9  ;;  %v2198_v37 = vsub.f32 %v2096_v35, %v2096_v35 }
 0x199   : > { %5173 = vmatpush3.msra.mxu1 %v1612_v34  ;;  %v1550_v58 = vsub.f32 %v5964_v15, %v1549_v8  ;;  %v6014_v2 = vand.u32 4294901760, %v2075_v61 }
 0x19a   : > { %5138 = vmatmul.mubr.f32.gmra.mxu0 %v976_v18  ;;  %5162 = vmatmul.mubr.f32.gmra.mxu1 %v5918_v12  ;;  %v6028_v18 = vand.u32 4294901760, %v6010_v1 }
 0x19b   : > { %5150 = vmatprep.mubr.f32.mxu0 %v5914_v6  ;;  %5174 = vmatprep.mubr.f32.mxu1 %v5940_v36  ;;  %v1551_v6 = vand.u32 4294901760, %v1550_v58  ;;  %v6025_v11 = vsub.f32 %v2075_v61, %v6014_v2 }
 0x19c   : > { %5188 = vmatprep.subr.mxu1 %v5904_v50  ;;  %v2242_v21 = vsub.f32 %v6010_v1, %v6028_v18 }
 0x19d   : > { %v6039_v20 = vand.u32 4294901760, %v6025_v11 }
 0x19e   : > { %5151 = vmatmul.mubr.f32.vlgmr.msra.gmra.mxu0 %v5907_v60  ;;  %5175 = vmatmul.mubr.f32.vlgmr.msra.gmra.mxu1 %v5951_v43  ;;  %v1560_v60 = vsub.f32 %v5974_v48, %v1559_v55  ;;  %v2243_v24 = vand.u32 4294901760, %v2242_v21 }
 0x19f   : > { %5165 = vmatpush3.msra.mxu0 %v5904_v50  ;;  %5153 = vmatprep.mubr.f32.mxu0 %v5927_v19  ;;  %v6031_v19 = vand.u32 4294901760, %v6019_v5  ;;  %v2256_v23 = vsub.f32 %v6025_v11, %v6039_v20 }
 0x1a0   : > { %5177 = vmatprep.mubr.f32.mxu1 %v5959_v44  ;;  %5189 = vmatpush3.msra.mxu1 %v5904_v50  ;;  %v1561_v10 = vand.u32 4294901760, %v1560_v60 }
 0x1a1   : > { %5180 = vmatprep.subr.mxu0 %v5910_v62  ;;  %5204 = vmatprep.subr.mxu1 %v5904_v50  ;;  %v2257_v29 = vand.u32 4294901760, %v2256_v23 }
 0x1a2   : > { %5154 = vmatmul.mubr.f32.gmra.mxu0 %v5918_v12  ;;  %5178 = vmatmul.mubr.f32.gmra.mxu1 %v5969_v47  ;;  %v2236_v12 = vand.u32 4294901760, %v2235_v3 }
 0x1a3   : > { %5166 = vmatprep.mubr.f32.mxu0 %v1541_v0  ;;  %5190 = vmatprep.mubr.f32.mxu1 %v1539_v17 }
 0x1a6   : > { %5167 = vmatmul.mubr.f32.vlgmr.msra.gmra.mxu0 %v1551_v6  ;;  %5191 = vmatmul.mubr.f32.vlgmr.msra.gmra.mxu1 %v1549_v8 }
 0x1a7   : > { %5181 = vmatpush3.msra.mxu0 %v5910_v62  ;;  %5205 = vmatpush3.msra.mxu1 %v5904_v50  ;;  %v2249_v62 = vsub.f32 %v6019_v5, %v6031_v19  ;;  %v6048_v50 = vsel %vm2058_vm8, 1.0, %v5617_v42  ;;  %v2179_v42 = vand.u32 4294901760, %v6082_v32 }
 0x1a8   : > { %5226 = vmatprep.subr.mxu1 %v2236_v12  ;;  %5169 = vmatprep.mubr.f32.mxu0 %v1561_v10  ;;  %v2087_v26 = vsel %vm238_vm0, %v6048_v50, 0 }
 0x1a9   : > { %5193 = vmatprep.mubr.f32.mxu1 %v1559_v55  ;;  %5196 = vmatprep.subr.mxu0 %v5922_v13  ;;  %v2250_v25 = vand.u32 4294901760, %v2249_v62  ;;  %v6069_v30 = vsub.f32 %v2087_v26, %v2087_v26  ;;  %v2180_v40 = vsub.f32 %v6082_v32, %v2179_v42 }
 0x1aa   : > { %5170 = vmatmul.mubr.f32.gmra.mxu0 %v1571_v14  ;;  %5194 = vmatmul.mubr.f32.gmra.mxu1 %v1569_v63 }
 0x1ab   : > { %5182 = vmatprep.mubr.f32.mxu0 %v5954_v22  ;;  %5206 = vmatprep.mubr.f32.mxu1 %v5940_v36  ;;  %v2169_v39 = vand.u32 4294901760, %v6069_v30  ;;  %v2181_v22 = vand.u32 4294901760, %v2180_v40 }
 0x1ae   : > { %5183 = vmatmul.mubr.f32.vlgmr.msra.gmra.mxu0 %v5964_v15  ;;  %5207 = vmatmul.mubr.f32.vlgmr.msra.gmra.mxu1 %v5951_v43  ;;  %v6168_v15 = vand.u32 4294901760, %v2712_v45 }
 0x1af   : > { %5197 = vmatpush3.msra.mxu0 %v5922_v13  ;;  %5227 = vmatpush3.msra.mxu1 %v2236_v12  ;;  %v2093_v13 = vsel %vm238_vm0, %v6066_v28, 0 }
 0x1b0   : > { %5212 = vmatprep.subr.mxu0 %v5967_v46  ;;  %5228 = vmatprep.subr.mxu1 %v2243_v24  ;;  %v6089_v34 = vsub.f32 %v2093_v13, %v2093_v13 }
 0x1b1   : > { %5229 = vmatpush3.msra.mxu1 %v2243_v24  ;;  %5185 = vmatprep.mubr.f32.mxu0 %v5974_v48 }
 0x1b2   : > { %5209 = vmatprep.mubr.f32.mxu1 %v5959_v44  ;;  %5230 = vmatprep.subr.mxu1 %v2250_v25  ;;  %v2189_v38 = vand.u32 4294901760, %v6089_v34 }
 0x1b3   : > { %5186 = vmatmul.mubr.f32.gmra.mxu0 %v5986_v52  ;;  %5210 = vmatmul.mubr.f32.gmra.mxu1 %v5969_v47 }
 0x1b4   : > { %5231 = vmatpush3.msra.mxu1 %v2250_v25  ;;  %5234 = vmatprep.mubr.msk.f32.mxu1 %vm238_vm0, %v6048_v50  ;;  %v2190_v41 = vsub.f32 %v6089_v34, %v2189_v38 }
 0x1b5   : > { %5232 = vmatprep.subr.mxu1 %v2257_v29  ;;  %5198 = vmatprep.mubr.f32.mxu0 %v5940_v36  ;;  %v2170_v36 = vsub.f32 %v6069_v30, %v2169_v39 }
 0x1b6   : > { %5233 = vmatpush3.msra.mxu1 %v2257_v29  ;;  %v2191_v7 = vand.u32 4294901760, %v2190_v41 }
 0x1b7   : > { %5254 = vmatprep.subr.mxu1 %v5967_v46  ;;  %5199 = vmatmul.mubr.f32.vlgmr.msra.gmra.mxu0 %v5951_v43  ;;  %v2171_v16 = vand.u32 4294901760, %v2170_v36  ;;  %v2199_v43 = vand.u32 4294901760, %v2198_v37 }
 0x1b8   : > { %5213 = vmatpush3.msra.mxu0 %v5967_v46  ;;  %5235 = vmatmul.mubr.msk.f32.vlgmr.msra.gmra.mxu1 %vm238_vm0, %v6061_v27 }
 0x1b9   : > { %5255 = vmatpush3.msra.mxu1 %v5967_v46  ;;  %5214 = vmatprep.subr.mxu0 %v5993_v56 }
 0x1ba   : > { %5237 = vmatprep.mubr.msk.f32.mxu1 %vm238_vm0, %v6066_v28  ;;  %5256 = vmatprep.subr.mxu1 %v5993_v56 }
 0x1bb   : > { %5215 = vmatpush3.msra.mxu0 %v5993_v56  ;;  %5257 = vmatpush3.msra.mxu1 %v5993_v56 }
 0x1bc   : > { %5201 = vmatprep.mubr.f32.mxu0 %v5959_v44  ;;  %5216 = vmatprep.subr.mxu0 %v5997_v57  ;;  %v2200_v44 = vsub.f32 %v2198_v37, %v2199_v43 }
 0x1bd   : > { %5258 = vmatprep.subr.mxu1 %v5997_v57  ;;  %5202 = vmatmul.mubr.f32.gmra.mxu0 %v5969_v47 }
 0x1be   : > { %5217 = vmatpush3.msra.mxu0 %v5997_v57  ;;  %5238 = vmatmul.mubr.msk.f32.gmra.mxu1 %vm238_vm0, %v6085_v33  ;;  %v2201_v4 = vand.u32 4294901760, %v2200_v44 }
 0x1bf   : > { %5259 = vmatpush3.msra.mxu1 %v5997_v57  ;;  %5218 = vmatprep.subr.mxu0 %v6014_v2 }
 0x1c0   : > { %5220 = vmatprep.mubr.f32.mxu0 %v2171_v16  ;;  %5260 = vmatprep.subr.mxu1 %v6014_v2 }
 0x1c1   : > { %5262 = vmatprep.mubr.f32.mxu1 %v2169_v39  ;;  %5219 = vmatpush3.msra.mxu0 %v6014_v2 }
 0x1c2   : > { %5261 = vmatpush3.msra.mxu1 %v6014_v2  ;;  %5240 = vmatprep.subr.mxu0 %v5981_v51 }
 0x1c3   : > { %5282 = vmatprep.subr.mxu1 %v5967_v46  ;;  %5221 = vmatmul.mubr.f32.vlgmr.msra.gmra.mxu0 %v2181_v22 }
 0x1c4   : > { %5241 = vmatpush3.msra.mxu0 %v5981_v51  ;;  %5263 = vmatmul.mubr.f32.vlgmr.msra.gmra.mxu1 %v2179_v42 }
 0x1c5   : > { %5283 = vmatpush3.msra.mxu1 %v5967_v46  ;;  %5223 = vmatprep.mubr.f32.mxu0 %v2191_v7  ;;  %v6171_v46 = vsub.f32 %v2712_v45, %v6168_v15 }
 0x1c6   : > { %5242 = vmatprep.subr.mxu0 %v6010_v1  ;;  %5265 = vmatprep.mubr.f32.mxu1 %v2189_v38 }
 0x1c7   : > { %5284 = vmatprep.subr.mxu1 %v5993_v56  ;;  %5243 = vmatpush3.msra.mxu0 %v6010_v1  ;;  %v6176_v47 = vand.u32 4294901760, %v6171_v46 }
 0x1c8   : > { %5285 = vmatpush3.msra.mxu1 %v5993_v56  ;;  %5244 = vmatprep.subr.mxu0 %v6019_v5 }
 0x1c9   : > { %5286 = vmatprep.subr.mxu1 %v5997_v57  ;;  %5224 = vmatmul.mubr.f32.gmra.mxu0 %v2201_v4  ;;  %v2865_v17 = vsub.f32 %v6171_v46, %v6176_v47 }
 0x1ca   : > { %5245 = vmatpush3.msra.mxu0 %v6019_v5  ;;  %5266 = vmatmul.mubr.f32.gmra.mxu1 %v2199_v43 }
 0x1cb   : > { %5287 = vmatpush3.msra.mxu1 %v5997_v57  ;;  %5246 = vmatprep.subr.mxu0 %v6025_v11  ;;  %v2866_v48 = vand.u32 4294901760, %v2865_v17 }
 0x1cc   : > { %5248 = vmatprep.mubr.f32.mxu0 %v6069_v30  ;;  %5288 = vmatprep.subr.mxu1 %v6014_v2 }
 0x1cd   : > { %5290 = vmatprep.mubr.msk.f32.mxu1 %vm238_vm0, %v6048_v50  ;;  %5247 = vmatpush3.msra.mxu0 %v6025_v11 }
 0x1ce   : > { %5289 = vmatpush3.msra.mxu1 %v6014_v2  ;;  %5268 = vmatprep.subr.mxu0 %v6001_v59 }
 0x1cf   : > { %5249 = vmatmul.mubr.f32.vlgmr.msra.gmra.mxu0 %v6082_v32  ;;  %5291 = vmatmul.mubr.msk.f32.vlgmr.msra.gmra.mxu1 %vm238_vm0, %v6061_v27 }
 0x1d0   : > { %5269 = vmatpush3.msra.mxu0 %v6001_v59  ;;  %5251 = vmatprep.mubr.f32.mxu0 %v6089_v34 }
 0x1d1   : > { %5270 = vmatprep.subr.mxu0 %v6028_v18  ;;  %5293 = vmatprep.mubr.msk.f32.mxu1 %vm238_vm0, %v6066_v28 }
 0x1d2   : > { %5271 = vmatpush3.msra.mxu0 %v6028_v18  ;;  %5304 = vmatprep.subr.mxu1 %v2866_v48 }
 0x1d3   : > { %5272 = vmatprep.subr.mxu0 %v6031_v19  ;;  %5252 = vmatmul.mubr.f32.gmra.mxu0 %v2198_v37 }
 0x1d4   : > { %5273 = vmatpush3.msra.mxu0 %v6031_v19  ;;  %5294 = vmatmul.mubr.msk.f32.gmra.mxu1 %vm238_vm0, %v6085_v33 }
 0x1d5   : > { %5274 = vmatprep.subr.mxu0 %v6039_v20  ;;  %5276 = vmatprep.mubr.msk.f32.mxu0 %vm238_vm0, %v6048_v50 }
 0x1d6   : > { %5275 = vmatpush3.msra.mxu0 %v6039_v20  ;;  %5305 = vmatpush3.msra.mxu1 %v2866_v48 }
 0x1d7   : > { %5277 = vmatmul.mubr.msk.f32.vlgmr.msra.gmra.mxu0 %vm238_vm0, %v6061_v27  ;;  %5296 = vmatprep.subr.mxu0 %v6168_v15 }
 0x1d8   : > { %5279 = vmatprep.mubr.msk.f32.mxu0 %vm238_vm0, %v6066_v28  ;;  %5297 = vmatpush3.msra.mxu0 %v6168_v15 }
 0x1d9   : > { %5312 = vmatprep.subr.mxu0 %v6171_v46  ;;  %5320 = vmatprep.subr.mxu1 %v6168_v15 }
 0x1db   : > { %5280 = vmatmul.mubr.msk.f32.gmra.mxu0 %vm238_vm0, %v6085_v33 }
 0x246   : > { %v5128_v49 = vpop.f32.mrf.mxu1 }
 0x248   : > { %v1057_v51 = vpop.f32.mrf.mxu1 }
 0x24a   : > { %v5131_v8 = vpop.f32.mrf.mxu1 }
 0x24c   : > { %v1069_v52 = vpop.f32.mrf.mxu1 }
 0x24e   : > { %v5120_v53 = vpop.f32.mrf.mxu0  ;;  %v5144_v54 = vpop.f32.mrf.mxu1 }
 0x24f   : > { %v1064_v55 = vadd.f32 %v5128_v49, %v5120_v53 }
 0x250   : > { %v951_v56 = vpop.f32.mrf.mxu0  ;;  %v1244_v57 = vpop.f32.mrf.mxu1 }
 0x251   : > { %v1058_v58 = vadd.f32 %v1057_v51, %v951_v56 }
 0x252   : > { %v5123_v59 = vpop.f32.mrf.mxu0  ;;  %v5147_v61 = vpop.f32.mrf.mxu1 }
 0x253   : > { %v1076_v63 = vadd.f32 %v5131_v8, %v5123_v59 }
 0x254   : > { %v971_v0 = vpop.f32.mrf.mxu0  ;;  %v1260_v60 = vpop.f32.mrf.mxu1 }
 0x255   : > { %v1070_v1 = vadd.f32 %v1069_v52, %v971_v0 }
 0x256   : > { %v5136_v2 = vpop.f32.mrf.mxu0  ;;  %v5160_v5 = vpop.f32.mrf.mxu1 }
 0x257   : > { %v1157_v6 = vadd.f32 %v5136_v2, %v1064_v55 }
 0x258   : > { %v1149_v3 = vpop.f32.mrf.mxu0  ;;  %v1432_v9 = vpop.f32.mrf.mxu1 }
 0x259   : > { %v1150_v10 = vadd.f32 %v1149_v3, %v1058_v58  ;;  %v1253_v11 = vadd.f32 %v5144_v54, %v1157_v6 }
 0x25a   : > { %v5139_v12 = vpop.f32.mrf.mxu0  ;;  %v5163_v14 = vpop.f32.mrf.mxu1 }
 0x25b   : > { %v1171_v18 = vadd.f32 %v5139_v12, %v1076_v63  ;;  %v1245_v19 = vadd.f32 %v1244_v57, %v1150_v10 }
 0x25c   : > { %v1163_v20 = vpop.f32.mrf.mxu0  ;;  %v1444_v21 = vpop.f32.mrf.mxu1 }
 0x25d   : > { %v1164_v62 = vadd.f32 %v1163_v20, %v1070_v1  ;;  %v1269_v50 = vadd.f32 %v5147_v61, %v1171_v18 }
 0x25e   : > { %v5152_v23 = vpop.f32.mrf.mxu0  ;;  %v5176_v24 = vpop.f32.mrf.mxu1 }
 0x25f   : > { %v1349_v25 = vadd.f32 %v5152_v23, %v1253_v11  ;;  %v1261_v26 = vadd.f32 %v1260_v60, %v1164_v62 }
 0x260   : > { %v1342_v27 = vpop.f32.mrf.mxu0  ;;  %v1649_v28 = vpop.f32.mrf.mxu1 }
 0x261   : > { %v1343_v29 = vadd.f32 %v1342_v27, %v1245_v19  ;;  %v1439_v30 = vadd.f32 %v5160_v5, %v1349_v25 }
 0x262   : > { %v5155_v31 = vpop.f32.mrf.mxu0  ;;  %v5179_v13 = vpop.f32.mrf.mxu1 }
 0x263   : > { %v1361_v32 = vadd.f32 %v5155_v31, %v1269_v50  ;;  %v1433_v33 = vadd.f32 %v1432_v9, %v1343_v29 }
 0x264   : > { %v1354_v39 = vpop.f32.mrf.mxu0  ;;  %v1661_v34 = vpop.f32.mrf.mxu1 }
 0x265   : > { %v1355_v35 = vadd.f32 %v1354_v39, %v1261_v26  ;;  %v1451_v42 = vadd.f32 %v5163_v14, %v1361_v32 }
 0x266   : > { %v5168_v36 = vpop.f32.mrf.mxu0  ;;  %v5192_v37 = vpop.f32.mrf.mxu1 }
 0x267   : > { %v1554_v38 = vadd.f32 %v5168_v36, %v1439_v30  ;;  %v1445_v40 = vadd.f32 %v1444_v21, %v1355_v35 }
 0x268   : > { %v1543_v16 = vpop.f32.mrf.mxu0  ;;  %v1836_v41 = vpop.f32.mrf.mxu1 }
 0x269   : > { %v1544_v43 = vadd.f32 %v1543_v16, %v1433_v33  ;;  %v1656_v22 = vadd.f32 %v5176_v24, %v1554_v38 }
 0x26a   : > { %v5171_v7 = vpop.f32.mrf.mxu0  ;;  %v5195_v44 = vpop.f32.mrf.mxu1 }
 0x26b   : > { %v1574_v4 = vadd.f32 %v5171_v7, %v1451_v42  ;;  %v1650_v45 = vadd.f32 %v1649_v28, %v1544_v43 }
 0x26c   : > { %v1563_v17 = vpop.f32.mrf.mxu0  ;;  %v1852_v48 = vpop.f32.mrf.mxu1 }
 0x26d   : > { %v1564_v49 = vadd.f32 %v1563_v17, %v1445_v40  ;;  %v1668_v51 = vadd.f32 %v5179_v13, %v1574_v4 }
 0x26e   : > { %v5184_v8 = vpop.f32.mrf.mxu0  ;;  %v5208_v52 = vpop.f32.mrf.mxu1 }
 0x26f   : > { %v1749_v53 = vadd.f32 %v5184_v8, %v1656_v22  ;;  %v1662_v54 = vadd.f32 %v1661_v34, %v1564_v49 }
 0x270   : > { %v1741_v55 = vpop.f32.mrf.mxu0  ;;  %v2024_v56 = vpop.f32.mrf.mxu1 }
 0x271   : > { %v1742_v57 = vadd.f32 %v1741_v55, %v1650_v45  ;;  %v1845_v58 = vadd.f32 %v5192_v37, %v1749_v53 }
 0x273   : > { %v5187_v59 = vpop.f32.mrf.mxu0  ;;  %v5211_v61 = vpop.f32.mrf.mxu1  ;;  %v1837_v63 = vadd.f32 %v1836_v41, %v1742_v57 }
 0x274   : > { %v1763_v0 = vadd.f32 %v5187_v59, %v1668_v51 }
 0x275   : > { %v1755_v60 = vpop.f32.mrf.mxu0  ;;  %v2036_v1 = vpop.f32.mrf.mxu1 }
 0x276   : > { %v1756_v2 = vadd.f32 %v1755_v60, %v1662_v54  ;;  %v1861_v5 = vadd.f32 %v5195_v44, %v1763_v0 }
 0x277   : > { %v5200_v6 = vpop.f32.mrf.mxu0 }
 0x278   : > { %v1941_v3 = vadd.f32 %v5200_v6, %v1845_v58  ;;  %v5236_v9 = vpop.f32.mrf.mxu1  ;;  %v1853_v10 = vadd.f32 %v1852_v48, %v1756_v2 }
 0x279   : > { %v1934_v11 = vpop.f32.mrf.mxu0 }
 0x27a   : > { %v6182_v12 = vadd.f32 %v5208_v52, %v1941_v3  ;;  %v1935_v14 = vadd.f32 %v1934_v11, %v1837_v63  ;;  %v2294_v18 = vpop.f32.mrf.mxu1 }
 0x27c   : > { %v6184_v19 = vadd.f32 %v2024_v56, %v1935_v14 }
 0x27d   : > { %v5203_v20 = vpop.f32.mrf.mxu0 }
 0x27e   : > { %v1953_v21 = vadd.f32 %v5203_v20, %v1861_v5  ;;  %v5239_v62 = vpop.f32.mrf.mxu1 }
 0x27f   : > { %v1946_v50 = vpop.f32.mrf.mxu0 }
 0x280   : > { %v6186_v23 = vadd.f32 %v5211_v61, %v1953_v21  ;;  %v1947_v24 = vadd.f32 %v1946_v50, %v1853_v10  ;;  %v2306_v25 = vpop.f32.mrf.mxu1 }
 0x282   : > { %v6188_v26 = vadd.f32 %v2036_v1, %v1947_v24 }
 0x283   : > { %v5222_v27 = vpop.f32.mrf.mxu0 }
 0x284   : > { %v5264_v28 = vpop.f32.mrf.mxu1  ;;  %v2301_v34 = vadd.f32 %v5236_v9, %v5222_v27 }
 0x285   : > { %v2173_v29 = vpop.f32.mrf.mxu0 }
 0x286   : > { %v2490_v30 = vpop.f32.mrf.mxu1  ;;  %v2295_v42 = vadd.f32 %v2294_v18, %v2173_v29 }
 0x289   : > { %v5225_v31 = vpop.f32.mrf.mxu0 }
 0x28a   : > { %v5267_v13 = vpop.f32.mrf.mxu1  ;;  %v2313_v40 = vadd.f32 %v5239_v62, %v5225_v31 }
 0x28b   : > { %v2193_v32 = vpop.f32.mrf.mxu0 }
 0x28c   : > { %v2506_v33 = vpop.f32.mrf.mxu1  ;;  %v2307_v43 = vadd.f32 %v2306_v25, %v2193_v32 }
 0x28f   : > { %v5250_v39 = vpop.f32.mrf.mxu0  ;;  %v5292_v37 = vpop.f32.mrf.mxu1 }
 0x290   : > { %v2400_v36 = vadd.f32 %v5250_v39, %v2301_v34  ;;  %v3320_v34 = vld [vmem:[%s6446_s2 + $0x20] sm:$0xff] }
 0x291   : > { %v2392_v35 = vpop.f32.mrf.mxu0  ;;  %v2690_v44 = vpop.f32.mrf.mxu1 }
 0x292   : > { %v2393_v16 = vadd.f32 %v2392_v35, %v2295_v42  ;;  %v2499_v7 = vadd.f32 %v5264_v28, %v2400_v36  ;;  %v6224_v36 = vand.u32 4294901760, %v3320_v34 }
 0x293   : > { %v5253_v38 = vpop.f32.mrf.mxu0 }
 0x294   : > { %v2414_v22 = vadd.f32 %v5253_v38, %v2313_v40  ;;  %v2491_v48 = vadd.f32 %v2490_v30, %v2393_v16  ;;  %v5295_v53 = vpop.f32.mrf.mxu1  ;;  %v6237_v16 = vsub.f32 %v3320_v34, %v6224_v36 }
 0x295   : > { %v2406_v41 = vpop.f32.mrf.mxu0 }
 0x296   : > { %v2407_v45 = vadd.f32 %v2406_v41, %v2307_v43  ;;  %v2515_v52 = vadd.f32 %v5267_v13, %v2414_v22  ;;  %v2702_v1 = vpop.f32.mrf.mxu1 }
 0x297   : > { %v5278_v4 = vpop.f32.mrf.mxu0 }
 0x298   : > { %v2604_v17 = vadd.f32 %v5278_v4, %v2499_v7  ;;  %v2507_v58 = vadd.f32 %v2506_v33, %v2407_v45  ;;  %v3321_v33 = vld [vmem:[%s6446_s2 + $0x38] sm:$0xff]  ;;  %v6246_v7 = vand.u32 4294901760, %v6237_v16 }
 0x299   : > { %v2597_v49 = vpop.f32.mrf.mxu0  ;;  %v6211_v39 = vand.u32 4294901760, %v3321_v33 }
 0x29a   : > { %v2697_v51 = vadd.f32 %v5292_v37, %v2604_v17  ;;  %v2598_v8 = vadd.f32 %v2597_v49, %v2491_v48  ;;  %v3319_v37 = vld [vmem:[%s6446_s2 + $0x8] sm:$0xff]  ;;  %v3493_v45 = vsub.f32 %v6237_v16, %v6246_v7 }
 0x29b   : > { %v5281_v54 = vpop.f32.mrf.mxu0  ;;  %v6222_v42 = vsub.f32 %v3321_v33, %v6211_v39  ;;  %v6239_v41 = vand.u32 4294901760, %v3319_v37 }
 0x29c   : > { %v2717_v55 = vsel %vm866_vm6, %v2697_v51, 0  ;;  %v2691_v56 = vadd.f32 %v2690_v44, %v2598_v8  ;;  %v2616_v57 = vadd.f32 %v5281_v54, %v2515_v52  ;;  %v3494_v48 = vand.u32 4294901760, %v3493_v45  ;;  %v4754_v8 = vld [vmem:[%s6447_s3 + $0x3] ss:$0 sm:$0xff]  ;;  %v5548_v52 = vld [vmem:[%s5756_s13 + $0x8] sm:$0xff] }
 0x29d   : > { %v2801_v59 = vand.u32 4294901760, %v2717_v55  ;;  %v2609_v61 = vpop.f32.mrf.mxu0  ;;  %v6234_v40 = vand.u32 4294901760, %v6222_v42  ;;  %v6249_v44 = vsub.f32 %v3319_v37, %v6239_v41  ;;  %v5549_v54 = vld [vmem:[%s5756_s13] sm:$0xff] }
 0x29e   : > { %v2714_v63 = vsel %vm866_vm6, %v2691_v56, 0  ;;  %v2709_v0 = vadd.f32 %v5295_v53, %v2616_v57  ;;  %v2610_v60 = vadd.f32 %v2609_v61, %v2507_v58  ;;  %v4579_v53 = vmul.f32 %v5548_v52, %v4754_v8  ;;  %v5550_v56 = vld [vmem:[%s5756_s13 + $0x10] sm:$0xff]  ;;  %v5551_v58 = vld [vmem:[%s5756_s13 + $0x18] sm:$0xff] }
 0x29f   : > { %v2802_v2 = vsub.f32 %v2717_v55, %v2801_v59  ;;  %v2791_v5 = vand.u32 4294901760, %v2714_v63  ;;  %v3486_v22 = vsub.f32 %v6222_v42, %v6234_v40  ;;  %v6256_v17 = vand.u32 4294901760, %v6249_v44 }
 0x2a0   : > { %v2723_v6 = vsel %vm866_vm6, %v2709_v0, 0  ;;  %v2703_v3 = vadd.f32 %v2702_v1, %v2610_v60  ;;  %v4578_v55 = vmul.f32 %v5549_v54, %v4754_v8  ;;  %v4580_v57 = vmul.f32 %v5550_v56, %v4754_v8 }
 0x2a1   : > { %v2803_v9 = vand.u32 4294901760, %v2802_v2  ;;  %v2792_v10 = vsub.f32 %v2714_v63, %v2791_v5  ;;  %v2821_v11 = vand.u32 4294901760, %v2723_v6  ;;  %5306 = vmatprep.mubr.f32.mxu1 %v2791_v5  ;;  %v3487_v4 = vand.u32 4294901760, %v3486_v22 }
 0x2a2   : > { %v2720_v14 = vsel %vm866_vm6, %v2703_v3, 0  ;;  %5307 = vmatmul.mubr.f32.vlgmr.msra.gmra.mxu1 %v2801_v59  ;;  %v3500_v49 = vsub.f32 %v6249_v44, %v6256_v17  ;;  %v4585_v61 = vsel %vm1454_vm7, %v4579_v53, 0.0  ;;  %v4582_v63 = vsel %vm1454_vm7, %v4578_v55, 0.0 }
 0x2a3   : > { %v2822_v18 = vsub.f32 %v2723_v6, %v2821_v11  ;;  %v2811_v20 = vand.u32 4294901760, %v2720_v14  ;;  %v2793_v21 = vand.u32 4294901760, %v2792_v10  ;;  %5321 = vmatpush3.msra.mxu1 %v6168_v15  ;;  %v2804_v62 = vsub.f32 %v2802_v2, %v2803_v9  ;;  %4586 = vadd.xlane.f32.xlu0 %v4585_v61 }
 0x2a4   : > { %5336 = vmatprep.subr.mxu1 %v6168_v15  ;;  %v3501_v51 = vand.u32 4294901760, %v3500_v49  ;;  %4583 = vadd.xlane.f32.xlu1 %v4582_v63  ;;  %v4588_v0 = vsel %vm1454_vm7, %v4580_v57, 0.0 }
 0x2a5   : > { %v2812_v50 = vsub.f32 %v2720_v14, %v2811_v20  ;;  %5309 = vmatprep.mubr.f32.mxu1 %v2811_v20  ;;  %v2794_v24 = vsub.f32 %v2792_v10, %v2793_v21  ;;  %v2823_v25 = vand.u32 4294901760, %v2822_v18  ;;  %v2805_v29 = vand.u32 4294901760, %v2804_v62 }
 0x2a6   : > { %5310 = vmatmul.mubr.f32.gmra.mxu1 %v2821_v11 }
 0x2a7   : > { %5322 = vmatprep.mubr.f32.mxu1 %v2793_v21  ;;  %v2795_v27 = vand.u32 4294901760, %v2794_v24  ;;  %v2813_v28 = vand.u32 4294901760, %v2812_v50  ;;  %v2824_v30 = vsub.f32 %v2822_v18, %v2823_v25  ;;  %4589 = vadd.xlane.f32.xlu0 %v4588_v0 }
 0x2a9   : > { %5298 = vmatprep.mubr.f32.mxu0 %v2795_v27  ;;  %v2814_v31 = vsub.f32 %v2812_v50, %v2813_v28  ;;  %v2825_v32 = vand.u32 4294901760, %v2824_v30 }
 0x2aa   : > { %5299 = vmatmul.mubr.f32.vlgmr.msra.gmra.mxu0 %v2805_v29  ;;  %5323 = vmatmul.mubr.f32.vlgmr.msra.gmra.mxu1 %v2803_v9 }
 0x2ab   : > { %5313 = vmatpush3.msra.mxu0 %v6171_v46  ;;  %5325 = vmatprep.mubr.f32.mxu1 %v2813_v28  ;;  %v2815_v13 = vand.u32 4294901760, %v2814_v31 }
 0x2ac   : > { %5328 = vmatprep.subr.mxu0 %v6176_v47  ;;  %5337 = vmatpush3.msra.mxu1 %v6168_v15  ;;  %v3322_v15 = vld [vmem:[%s6446_s2 + $0x50] sm:$0xff] }
 0x2ad   : > { %5301 = vmatprep.mubr.f32.mxu0 %v2815_v13  ;;  %v6203_v46 = vand.u32 4294901760, %v3322_v15 }
 0x2ae   : > { %5302 = vmatmul.mubr.f32.gmra.mxu0 %v2825_v32  ;;  %5326 = vmatmul.mubr.f32.gmra.mxu1 %v2823_v25 }
 0x2af   : > { %5314 = vmatprep.mubr.f32.mxu0 %v2792_v10  ;;  %5338 = vmatprep.mubr.f32.mxu1 %v2791_v5 }
 0x2b2   : > { %5315 = vmatmul.mubr.f32.vlgmr.msra.gmra.mxu0 %v2802_v2  ;;  %5339 = vmatmul.mubr.f32.vlgmr.msra.gmra.mxu1 %v2801_v59 }
 0x2b3   : > { %5329 = vmatpush3.msra.mxu0 %v6176_v47  ;;  %5317 = vmatprep.mubr.f32.mxu0 %v2812_v50  ;;  %v6209_v47 = vsub.f32 %v3322_v15, %v6203_v46 }
 0x2b4   : > { %5341 = vmatprep.mubr.f32.mxu1 %v2811_v20  ;;  %5344 = vmatprep.subr.mxu0 %v6203_v46 }
 0x2b5   : > { %v6219_v35 = vand.u32 4294901760, %v6209_v47 }
 0x2b6   : > { %5318 = vmatmul.mubr.f32.gmra.mxu0 %v2822_v18  ;;  %5342 = vmatmul.mubr.f32.gmra.mxu1 %v2821_v11 }
 0x2b7   : > { %5330 = vmatprep.mubr.f32.mxu0 %v2791_v5  ;;  %v3479_v38 = vsub.f32 %v6209_v47, %v6219_v35 }
 0x2b9   : > { %v3480_v43 = vand.u32 4294901760, %v3479_v38 }
 0x2ba   : > { %5331 = vmatmul.mubr.f32.vlgmr.msra.gmra.mxu0 %v2801_v59  ;;  %v4581_v59 = vmul.f32 %v5551_v58, %v4754_v8  ;;  %v4751_v8 = vld [vmem:[%s6447_s3] ss:$0 sm:$0xff] }
 0x2bb   : > { %5333 = vmatprep.mubr.f32.mxu0 %v2811_v20  ;;  %5345 = vmatpush3.msra.mxu0 %v6203_v46 }
 0x2bc   : > { %5346 = vmatprep.subr.mxu0 %v6211_v39  ;;  %5358 = vmatprep.subr.mxu1 %v3480_v43  ;;  %v4591_v60 = vsel %vm1454_vm7, %v4581_v59, 0.0 }
 0x2bd   : > { %5347 = vmatpush3.msra.mxu0 %v6211_v39  ;;  %5359 = vmatpush3.msra.mxu1 %v3480_v43 }
 0x2be   : > { %5334 = vmatmul.mubr.f32.gmra.mxu0 %v2821_v11  ;;  %5348 = vmatprep.subr.mxu0 %v6224_v36 }
 0x2bf   : > { %5349 = vmatpush3.msra.mxu0 %v6224_v36  ;;  %5360 = vmatprep.subr.mxu1 %v3487_v4 }
 0x2c0   : > { %5350 = vmatprep.subr.mxu0 %v6239_v41  ;;  %5361 = vmatpush3.msra.mxu1 %v3487_v4 }
 0x2c1   : > { %5351 = vmatpush3.msra.mxu0 %v6239_v41  ;;  %5362 = vmatprep.subr.mxu1 %v3494_v48 }
 0x2c2   : > { %5372 = vmatprep.subr.mxu0 %v6209_v47  ;;  %5363 = vmatpush3.msra.mxu1 %v3494_v48 }
 0x2c3   : > { %5364 = vmatprep.subr.mxu1 %v3501_v51  ;;  %4592 = vadd.xlane.f32.xlu1 %v4591_v60 }
 0x2c4   : > { %5365 = vmatpush3.msra.mxu1 %v3501_v51 }
 0x2c5   : > { %5386 = vmatprep.subr.mxu1 %v6203_v46 }
 0x362   : > { %v5308_v1 = vpop.f32.mrf.mxu1 }
 0x364   : > { %v2903_v2 = vpop.f32.mrf.mxu1 }
 0x366   : > { %v5311_v5 = vpop.f32.mrf.mxu1 }
 0x368   : > { %v2915_v6 = vpop.f32.mrf.mxu1 }
 0x36a   : > { %v5300_v3 = vpop.f32.mrf.mxu0  ;;  %v5324_v9 = vpop.f32.mrf.mxu1 }
 0x36b   : > { %v2910_v50 = vadd.f32 %v5308_v1, %v5300_v3 }
 0x36c   : > { %v2797_v10 = vpop.f32.mrf.mxu0  ;;  %v3090_v11 = vpop.f32.mrf.mxu1 }
 0x36d   : > { %v2904_v25 = vadd.f32 %v2903_v2, %v2797_v10 }
 0x36e   : > { %v5303_v14 = vpop.f32.mrf.mxu0  ;;  %v5327_v18 = vpop.f32.mrf.mxu1 }
 0x36f   : > { %v2922_v30 = vadd.f32 %v5311_v5, %v5303_v14 }
 0x370   : > { %v2817_v20 = vpop.f32.mrf.mxu0  ;;  %v3106_v21 = vpop.f32.mrf.mxu1 }
 0x371   : > { %v2916_v32 = vadd.f32 %v2915_v6, %v2817_v20 }
 0x372   : > { %v5316_v62 = vpop.f32.mrf.mxu0  ;;  %v5340_v28 = vpop.f32.mrf.mxu1 }
 0x373   : > { %v3003_v27 = vadd.f32 %v5316_v62, %v2910_v50 }
 0x374   : > { %v2995_v24 = vpop.f32.mrf.mxu0  ;;  %v3278_v34 = vpop.f32.mrf.mxu1 }
 0x375   : > { %v2996_v31 = vadd.f32 %v2995_v24, %v2904_v25  ;;  %v3099_v33 = vadd.f32 %v5324_v9, %v3003_v27 }
 0x376   : > { %v5319_v29 = vpop.f32.mrf.mxu0  ;;  %v5343_v51 = vpop.f32.mrf.mxu1 }
 0x377   : > { %v3017_v15 = vadd.f32 %v5319_v29, %v2922_v30  ;;  %v3091_v22 = vadd.f32 %v3090_v11, %v2996_v31 }
 0x378   : > { %v3009_v13 = vpop.f32.mrf.mxu0  ;;  %v3290_v0 = vpop.f32.mrf.mxu1 }
 0x379   : > { %v3010_v38 = vadd.f32 %v3009_v13, %v2916_v32  ;;  %v3115_v49 = vadd.f32 %v5327_v18, %v3017_v15 }
 0x37a   : > { %v5332_v37 = vpop.f32.mrf.mxu0 }
 0x37b   : > { %v3195_v43 = vadd.f32 %v5332_v37, %v3099_v33  ;;  %v3107_v56 = vadd.f32 %v3106_v21, %v3010_v38 }
 0x37c   : > { %v3188_v4 = vpop.f32.mrf.mxu0 }
 0x37d   : > { %v3285_v45 = vadd.f32 %v5340_v28, %v3195_v43  ;;  %v3189_v48 = vadd.f32 %v3188_v4, %v3091_v22  ;;  %v4755_v22 = vld [vmem:[%s6447_s3 + $0x4] ss:$0 sm:$0xff]  ;;  %v4587_v4 = vpop.xlane.xlu0 %4586 }
 0x37e   : > { %v5335_v52 = vpop.f32.mrf.mxu0 }
 0x37f   : > { %v3301_v53 = vadd.f32 %v3285_v45, %v6182_v12  ;;  %v3279_v54 = vadd.f32 %v3278_v34, %v3189_v48  ;;  %v3207_v55 = vadd.f32 %v5335_v52, %v3115_v49  ;;  %v4584_v45 = vpop.xlane.xlu1 %4583  ;;  %v4601_v48 = vadd.f32 %v4755_v22, %v4587_v4 }
 0x380   : > { %v3200_v57 = vpop.f32.mrf.mxu0  ;;  %v5618_v49 = vmov 0  }
 0x381   : > { %v3312_v58 = vadd.f32 %v4751_v8, %v3301_v53  ;;  %v3300_v59 = vadd.f32 %v3279_v54, %v6184_v19  ;;  %v3297_v61 = vadd.f32 %v5343_v51, %v3207_v55  ;;  %v3201_v63 = vadd.f32 %v3200_v57, %v3107_v56  ;;  %5547 = vset.pattern.permute.xlu1 %v5618_v49 }
 0x382   : > { %v4600_v51 = vadd.f32 %v4755_v22, %v4584_v45  ;;  %5546 = vset.pattern.permute.xlu0 %v5618_v49  ;;  %4611 = vperm.xlu1 %5547, %v4601_v48  }
 0x383   : > { %v3316_v60 = vmax.f32 %v3312_v58, 0.0  ;;  %v3311_v1 = vadd.f32 %v4751_v8, %v3300_v59  ;;  %v3303_v2 = vadd.f32 %v3297_v61, %v6186_v23  ;;  %v3291_v5 = vadd.f32 %v3290_v0, %v3201_v63  ;;  %v4593_v52 = vpop.xlane.xlu1 %4592 }
 0x384   : > { %4606 = vperm.xlu0 %5546, %v4600_v51   ;;  %v4603_v54 = vadd.f32 %v4755_v22, %v4593_v52 }
 0x385   : > { %v3334_v6 = vsel %vm238_vm0, %v3316_v60, 0  ;;  %v3315_v3 = vmax.f32 %v3311_v1, 0.0  ;;  %v3314_v9 = vadd.f32 %v4751_v8, %v3303_v2  ;;  %v3302_v12 = vadd.f32 %v3291_v5, %v6188_v26  ;;  %v4752_v60 = vld [vmem:[%s6447_s3 + $0x1] ss:$0 sm:$0xff] }
 0x386   : > { %v6281_v10 = vand.u32 4294901760, %v3334_v6 }
 0x387   : > { %v3318_v11 = vmax.f32 %v3314_v9, 0.0  ;;  %v3313_v14 = vadd.f32 %v4751_v8, %v3302_v12  ;;  %v3331_v19 = vsel %vm238_vm0, %v3315_v3, 0  ;;  %v4590_v8 = vpop.xlane.xlu0 %4589 }
 0x388   : > { %v3422_v18 = vsub.f32 %v3334_v6, %v6281_v10  ;;  %v6285_v20 = vand.u32 4294901760, %v3331_v19  ;;  %v4602_v53 = vadd.f32 %v4755_v22, %v4590_v8 }
 0x389   : > { %v3317_v21 = vmax.f32 %v3313_v14, 0.0  ;;  %v3340_v23 = vsel %vm238_vm0, %v3318_v11, 0 }
 0x38a   : > { %5366 = vmatprep.mubr.f32.mxu1 %v6285_v20  ;;  %v6289_v62 = vand.u32 4294901760, %v3340_v23  ;;  %v3412_v50 = vsub.f32 %v3331_v19, %v6285_v20  ;;  %v3423_v26 = vand.u32 4294901760, %v3422_v18  ;;  %4616 = vperm.xlu1 %5547, %v4602_v53  }
 0x38b   : > { %5367 = vmatmul.mubr.f32.vlgmr.msra.gmra.mxu1 %v6281_v10  ;;  %v3337_v24 = vsel %vm238_vm0, %v3317_v21, 0 }
 0x38c   : > { %5387 = vmatpush3.msra.mxu1 %v6203_v46  ;;  %v3431_v25 = vand.u32 4294901760, %v3337_v24  ;;  %v3413_v27 = vand.u32 4294901760, %v3412_v50  ;;  %v3442_v28 = vsub.f32 %v3340_v23, %v6289_v62  ;;  %v3424_v29 = vsub.f32 %v3422_v18, %v3423_v26 }
 0x38d   : > { %5388 = vmatprep.subr.mxu1 %v6211_v39 }
 0x38e   : > { %5369 = vmatprep.mubr.f32.mxu1 %v3431_v25  ;;  %5389 = vmatpush3.msra.mxu1 %v6211_v39  ;;  %v3414_v30 = vsub.f32 %v3412_v50, %v3413_v27  ;;  %v3432_v31 = vsub.f32 %v3337_v24, %v3431_v25  ;;  %v3443_v13 = vand.u32 4294901760, %v3442_v28  ;;  %v3425_v33 = vand.u32 4294901760, %v3424_v29 }
 0x38f   : > { %5370 = vmatmul.mubr.f32.gmra.mxu1 %v6289_v62  ;;  %5390 = vmatprep.subr.mxu1 %v6224_v36 }
 0x390   : > { %5391 = vmatpush3.msra.mxu1 %v6224_v36  ;;  %5394 = vmatprep.mubr.f32.mxu1 %v3413_v27  ;;  %v3415_v32 = vand.u32 4294901760, %v3414_v30  ;;  %v3433_v15 = vand.u32 4294901760, %v3432_v31  ;;  %v3444_v37 = vsub.f32 %v3442_v28, %v3443_v13 }
 0x391   : > { %5392 = vmatprep.subr.mxu1 %v6239_v41  ;;  %4621 = vperm.xlu1 %5547, %v4603_v54  }
 0x392   : > { %5352 = vmatprep.mubr.f32.mxu0 %v3415_v32  ;;  %5393 = vmatpush3.msra.mxu1 %v6239_v41  ;;  %v3434_v34 = vsub.f32 %v3432_v31, %v3433_v15  ;;  %v3445_v43 = vand.u32 4294901760, %v3444_v37 }
 0x393   : > { %5353 = vmatmul.mubr.f32.vlgmr.msra.gmra.mxu0 %v3425_v33  ;;  %5395 = vmatmul.mubr.f32.vlgmr.msra.gmra.mxu1 %v3423_v26 }
 0x394   : > { %5373 = vmatpush3.msra.mxu0 %v6209_v47  ;;  %5414 = vmatprep.subr.mxu1 %v6203_v46  ;;  %v3435_v38 = vand.u32 4294901760, %v3434_v34 }
 0x395   : > { %5374 = vmatprep.subr.mxu0 %v6222_v42  ;;  %5397 = vmatprep.mubr.f32.mxu1 %v3433_v15 }
 0x396   : > { %5415 = vmatpush3.msra.mxu1 %v6203_v46  ;;  %5375 = vmatpush3.msra.mxu0 %v6222_v42  ;;  %v3961_v46 = vld [vmem:[%s6446_s2 + $0x28] sm:$0xff] }
 0x397   : > { %5416 = vmatprep.subr.mxu1 %v6211_v39  ;;  %5355 = vmatprep.mubr.f32.mxu0 %v3435_v38  ;;  %v6335_v47 = vand.u32 4294901760, %v3961_v46 }
 0x398   : > { %5376 = vmatprep.subr.mxu0 %v6237_v16  ;;  %5417 = vmatpush3.msra.mxu1 %v6211_v39  ;;  %v3960_v39 = vld [vmem:[%s6446_s2 + $0x10] sm:$0xff] }
 0x399   : > { %5356 = vmatmul.mubr.f32.gmra.mxu0 %v3445_v43  ;;  %5398 = vmatmul.mubr.f32.gmra.mxu1 %v3443_v13  ;;  %v6343_v42 = vand.u32 4294901760, %v3960_v39 }
 0x39a   : > { %5377 = vmatpush3.msra.mxu0 %v6237_v16  ;;  %5418 = vmatprep.subr.mxu1 %v6224_v36 }
 0x39b   : > { %5378 = vmatprep.subr.mxu0 %v6249_v44  ;;  %5380 = vmatprep.mubr.f32.mxu0 %v3412_v50 }
 0x39c   : > { %5419 = vmatpush3.msra.mxu1 %v6224_v36  ;;  %5422 = vmatprep.mubr.f32.mxu1 %v6285_v20 }
 0x39d   : > { %5379 = vmatpush3.msra.mxu0 %v6249_v44  ;;  %5420 = vmatprep.subr.mxu1 %v6239_v41 }
 0x39e   : > { %5400 = vmatprep.subr.mxu0 %v6219_v35  ;;  %5421 = vmatpush3.msra.mxu1 %v6239_v41 }
 0x39f   : > { %5381 = vmatmul.mubr.f32.vlgmr.msra.gmra.mxu0 %v3422_v18  ;;  %5423 = vmatmul.mubr.f32.vlgmr.msra.gmra.mxu1 %v6281_v10 }
 0x3a0   : > { %5401 = vmatpush3.msra.mxu0 %v6219_v35  ;;  %5383 = vmatprep.mubr.f32.mxu0 %v3432_v31  ;;  %v6341_v35 = vsub.f32 %v3961_v46, %v6335_v47 }
 0x3a1   : > { %5402 = vmatprep.subr.mxu0 %v6234_v40  ;;  %5425 = vmatprep.mubr.f32.mxu1 %v3431_v25 }
 0x3a2   : > { %5403 = vmatpush3.msra.mxu0 %v6234_v40  ;;  %v6348_v36 = vand.u32 4294901760, %v6341_v35  ;;  %v6351_v40 = vsub.f32 %v3960_v39, %v6343_v42 }
 0x3a3   : > { %5404 = vmatprep.subr.mxu0 %v6246_v7  ;;  %5384 = vmatmul.mubr.f32.gmra.mxu0 %v3442_v28 }
 0x3a4   : > { %5405 = vmatpush3.msra.mxu0 %v6246_v7  ;;  %5426 = vmatmul.mubr.f32.gmra.mxu1 %v6289_v62  ;;  %v4121_v16 = vsub.f32 %v6341_v35, %v6348_v36  ;;  %v6358_v41 = vand.u32 4294901760, %v6351_v40 }
 0x3a5   : > { %5406 = vmatprep.subr.mxu0 %v6256_v17  ;;  %5408 = vmatprep.mubr.f32.mxu0 %v6285_v20 }
 0x3a6   : > { %5407 = vmatpush3.msra.mxu0 %v6256_v17  ;;  %v4122_v7 = vand.u32 4294901760, %v4121_v16  ;;  %v4128_v44 = vsub.f32 %v6351_v40, %v6358_v41 }
 0x3a7   : > { %5409 = vmatmul.mubr.f32.vlgmr.msra.gmra.mxu0 %v6281_v10  ;;  %5428 = vmatprep.subr.mxu0 %v6335_v47 }
 0x3a8   : > { %5411 = vmatprep.mubr.f32.mxu0 %v3431_v25  ;;  %5429 = vmatpush3.msra.mxu0 %v6335_v47  ;;  %v4129_v17 = vand.u32 4294901760, %v4128_v44 }
 0x3a9   : > { %5430 = vmatprep.subr.mxu0 %v6343_v42  ;;  %5438 = vmatprep.subr.mxu1 %v4122_v7 }
 0x3aa   : > { %5431 = vmatpush3.msra.mxu0 %v6343_v42  ;;  %5439 = vmatpush3.msra.mxu1 %v4122_v7 }
 0x3ab   : > { %5412 = vmatmul.mubr.f32.gmra.mxu0 %v6289_v62  ;;  %5448 = vmatprep.subr.mxu0 %v6341_v35 }
 0x3ac   : > { %5440 = vmatprep.subr.mxu1 %v4129_v17 }
 0x3ad   : > { %5441 = vmatpush3.msra.mxu1 %v4129_v17 }
 0x3ae   : > { %5458 = vmatprep.subr.mxu1 %v6335_v47 }
 0x44b   : > { %v5368_v55 = vpop.f32.mrf.mxu1 }
 0x44d   : > { %v3538_v56 = vpop.f32.mrf.mxu1 }
 0x44f   : > { %v5371_v57 = vpop.f32.mrf.mxu1 }
 0x451   : > { %v3550_v58 = vpop.f32.mrf.mxu1 }
 0x453   : > { %v5354_v59 = vpop.f32.mrf.mxu0  ;;  %v5396_v61 = vpop.f32.mrf.mxu1 }
 0x454   : > { %v3428_v6 = vadd.f32 %v5354_v59, %v4752_v60 }
 0x455   : > { %v3417_v63 = vpop.f32.mrf.mxu0  ;;  %v3734_v0 = vpop.f32.mrf.mxu1 }
 0x456   : > { %v3418_v3 = vadd.f32 %v4752_v60, %v3417_v63  ;;  %v3545_v11 = vadd.f32 %v5368_v55, %v3428_v6 }
 0x458   : > { %v3539_v20 = vadd.f32 %v3538_v56, %v3418_v3 }
 0x459   : > { %v5357_v1 = vpop.f32.mrf.mxu0  ;;  %v5399_v2 = vpop.f32.mrf.mxu1 }
 0x45a   : > { %v3448_v10 = vadd.f32 %v5357_v1, %v4752_v60 }
 0x45b   : > { %v3437_v5 = vpop.f32.mrf.mxu0  ;;  %v3750_v9 = vpop.f32.mrf.mxu1 }
 0x45c   : > { %v3438_v19 = vadd.f32 %v4752_v60, %v3437_v5  ;;  %v3557_v50 = vadd.f32 %v5371_v57, %v3448_v10 }
 0x45e   : > { %v3551_v25 = vadd.f32 %v3550_v58, %v3438_v19 }
 0x45f   : > { %v5382_v12 = vpop.f32.mrf.mxu0  ;;  %v5424_v21 = vpop.f32.mrf.mxu1 }
 0x460   : > { %v3644_v18 = vadd.f32 %v5382_v12, %v3545_v11 }
 0x461   : > { %v3636_v14 = vpop.f32.mrf.mxu0  ;;  %v3934_v28 = vpop.f32.mrf.mxu1 }
 0x462   : > { %v3637_v62 = vadd.f32 %v3636_v14, %v3539_v20  ;;  %v3743_v27 = vadd.f32 %v5396_v61, %v3644_v18 }
 0x463   : > { %v5385_v23 = vpop.f32.mrf.mxu0 }
 0x464   : > { %v3658_v24 = vadd.f32 %v5385_v23, %v3557_v50  ;;  %v3735_v13 = vadd.f32 %v3734_v0, %v3637_v62  ;;  %v5427_v37 = vpop.f32.mrf.mxu1 }
 0x465   : > { %v3650_v26 = vpop.f32.mrf.mxu0 }
 0x466   : > { %v3651_v30 = vadd.f32 %v3650_v26, %v3551_v25  ;;  %v3759_v34 = vadd.f32 %v5399_v2, %v3658_v24  ;;  %v3946_v45 = vpop.f32.mrf.mxu1 }
 0x467   : > { %v5410_v29 = vpop.f32.mrf.mxu0 }
 0x468   : > { %v3848_v31 = vadd.f32 %v5410_v29, %v3743_v27  ;;  %v3751_v16 = vadd.f32 %v3750_v9, %v3651_v30 }
 0x469   : > { %v3841_v32 = vpop.f32.mrf.mxu0 }
 0x46a   : > { %v3941_v15 = vadd.f32 %v5424_v21, %v3848_v31  ;;  %v3842_v33 = vadd.f32 %v3841_v32, %v3735_v13  ;;  %v4612_v32 = vpop.permute.xlu1 %4611 }
 0x46b   : > { %v5413_v38 = vpop.f32.mrf.mxu0 }
 0x46c   : > { %v3957_v43 = vmax.f32 %v3941_v15, 0.0  ;;  %v3935_v46 = vadd.f32 %v3934_v28, %v3842_v33  ;;  %v3860_v39 = vadd.f32 %v5413_v38, %v3759_v34 }
 0x46d   : > { %v3853_v7 = vpop.f32.mrf.mxu0 }
 0x46e   : > { %v3974_v44 = vsel %vm3969_vm12, %v3957_v43, 0  ;;  %v3956_v17 = vmax.f32 %v3935_v46, 0.0  ;;  %v3953_v22 = vadd.f32 %v5427_v37, %v3860_v39  ;;  %v3854_v4 = vadd.f32 %v3853_v7, %v3751_v16 }
 0x46f   : > { %v4059_v48 = vand.u32 4294901760, %v3974_v44 }
 0x470   : > { %v3971_v49 = vsel %vm3969_vm12, %v3956_v17, 0  ;;  %v3959_v51 = vmax.f32 %v3953_v22, 0.0  ;;  %v3947_v8 = vadd.f32 %v3946_v45, %v3854_v4  ;;  %v4617_v4 = vpop.permute.xlu1 %4616 }
 0x471   : > { %v4060_v52 = vsub.f32 %v3974_v44, %v4059_v48  ;;  %v4049_v53 = vand.u32 4294901760, %v3971_v49 }
 0x472   : > { %v3980_v54 = vsel %vm3969_vm12, %v3959_v51, 0  ;;  %v3958_v55 = vmax.f32 %v3947_v8, 0.0  ;;  %v4607_v8 = vpop.permute.xlu0 %4606 }
 0x473   : > { %v4061_v56 = vand.u32 4294901760, %v4060_v52  ;;  %v4050_v57 = vsub.f32 %v3971_v49, %v4049_v53  ;;  %v4079_v58 = vand.u32 4294901760, %v3980_v54  ;;  %5442 = vmatprep.mubr.f32.mxu1 %v4049_v53 }
 0x474   : > { %v3977_v59 = vsel %vm3969_vm12, %v3958_v55, 0  ;;  %5443 = vmatmul.mubr.f32.vlgmr.msra.gmra.mxu1 %v4059_v48 }
 0x475   : > { %v4080_v61 = vsub.f32 %v3980_v54, %v4079_v58  ;;  %v4069_v63 = vand.u32 4294901760, %v3977_v59  ;;  %5459 = vmatpush3.msra.mxu1 %v6335_v47  ;;  %v4051_v0 = vand.u32 4294901760, %v4050_v57  ;;  %v4062_v60 = vsub.f32 %v4060_v52, %v4061_v56 }
 0x476   : > { %5460 = vmatprep.subr.mxu1 %v6343_v42 }
 0x477   : > { %v4070_v1 = vsub.f32 %v3977_v59, %v4069_v63  ;;  %5445 = vmatprep.mubr.f32.mxu1 %v4069_v63  ;;  %v4052_v2 = vsub.f32 %v4050_v57, %v4051_v0  ;;  %5461 = vmatpush3.msra.mxu1 %v6343_v42  ;;  %v4081_v5 = vand.u32 4294901760, %v4080_v61  ;;  %v4063_v9 = vand.u32 4294901760, %v4062_v60 }
 0x478   : > { %5446 = vmatmul.mubr.f32.gmra.mxu1 %v4079_v58  ;;  %5478 = vmatprep.subr.mxu1 %v6335_v47 }
 0x479   : > { %5462 = vmatprep.mubr.f32.mxu1 %v4051_v0  ;;  %v4053_v6 = vand.u32 4294901760, %v4052_v2  ;;  %v4071_v3 = vand.u32 4294901760, %v4070_v1  ;;  %v4082_v12 = vsub.f32 %v4080_v61, %v4081_v5 }
 0x47b   : > { %5432 = vmatprep.mubr.f32.mxu0 %v4053_v6  ;;  %v4072_v10 = vsub.f32 %v4070_v1, %v4071_v3  ;;  %v4083_v14 = vand.u32 4294901760, %v4082_v12 }
 0x47c   : > { %5433 = vmatmul.mubr.f32.vlgmr.msra.gmra.mxu0 %v4063_v9  ;;  %5463 = vmatmul.mubr.f32.vlgmr.msra.gmra.mxu1 %v4061_v56 }
 0x47d   : > { %5449 = vmatpush3.msra.mxu0 %v6341_v35  ;;  %5465 = vmatprep.mubr.f32.mxu1 %v4071_v3  ;;  %v4073_v11 = vand.u32 4294901760, %v4072_v10 }
 0x47e   : > { %5450 = vmatprep.subr.mxu0 %v6351_v40  ;;  %5479 = vmatpush3.msra.mxu1 %v6335_v47 }
 0x47f   : > { %5435 = vmatprep.mubr.f32.mxu0 %v4073_v11  ;;  %5451 = vmatpush3.msra.mxu0 %v6351_v40 }
 0x480   : > { %5436 = vmatmul.mubr.f32.gmra.mxu0 %v4083_v14  ;;  %5466 = vmatmul.mubr.f32.gmra.mxu1 %v4081_v5 }
 0x481   : > { %5452 = vmatprep.mubr.f32.mxu0 %v4050_v57  ;;  %5482 = vmatprep.mubr.f32.mxu1 %v4049_v53 }
 0x482   : > { %5480 = vmatprep.subr.mxu1 %v6343_v42  ;;  %5468 = vmatprep.subr.mxu0 %v6348_v36 }
 0x483   : > { %5481 = vmatpush3.msra.mxu1 %v6343_v42 }
 0x484   : > { %5453 = vmatmul.mubr.f32.vlgmr.msra.gmra.mxu0 %v4060_v52  ;;  %5483 = vmatmul.mubr.f32.vlgmr.msra.gmra.mxu1 %v4059_v48 }
 0x485   : > { %5469 = vmatpush3.msra.mxu0 %v6348_v36  ;;  %5455 = vmatprep.mubr.f32.mxu0 %v4070_v1  ;;  %v4753_v36 = vld [vmem:[%s6447_s3 + $0x2] ss:$0 sm:$0xff]  ;;  %v4622_v1 = vpop.permute.xlu1 %4621 }
 0x486   : > { %5485 = vmatprep.mubr.f32.mxu1 %v4069_v63  ;;  %5470 = vmatprep.subr.mxu0 %v6358_v41 }
 0x487   : > { %5471 = vmatpush3.msra.mxu0 %v6358_v41 }
 0x488   : > { %5456 = vmatmul.mubr.f32.gmra.mxu0 %v4080_v61  ;;  %5486 = vmatmul.mubr.f32.gmra.mxu1 %v4079_v58 }
 0x489   : > { %5472 = vmatprep.mubr.f32.mxu0 %v4049_v53 }
 0x48c   : > { %5473 = vmatmul.mubr.f32.vlgmr.msra.gmra.mxu0 %v4059_v48 }
 0x48d   : > { %5475 = vmatprep.mubr.f32.mxu0 %v4069_v63 }
 0x490   : > { %5476 = vmatmul.mubr.f32.gmra.mxu0 %v4079_v58 }
 0x534   : > { %v5444_v47 = vpop.f32.mrf.mxu1 }
 0x536   : > { %v4166_v35 = vpop.f32.mrf.mxu1 }
 0x538   : > { %v5447_v40 = vpop.f32.mrf.mxu1 }
 0x53a   : > { %v4178_v42 = vpop.f32.mrf.mxu1 }
 0x53c   : > { %v5434_v19 = vpop.f32.mrf.mxu0  ;;  %v5464_v18 = vpop.f32.mrf.mxu1 }
 0x53d   : > { %v4066_v62 = vadd.f32 %v5434_v19, %v4753_v36 }
 0x53e   : > { %v4055_v20 = vpop.f32.mrf.mxu0  ;;  %v4356_v21 = vpop.f32.mrf.mxu1 }
 0x53f   : > { %v4056_v26 = vadd.f32 %v4753_v36, %v4055_v20  ;;  %v4173_v28 = vadd.f32 %v5444_v47, %v4066_v62 }
 0x540   : > { %v5437_v23 = vpop.f32.mrf.mxu0  ;;  %v5467_v41 = vpop.f32.mrf.mxu1 }
 0x541   : > { %v4086_v27 = vadd.f32 %v5437_v23, %v4753_v36  ;;  %v4167_v13 = vadd.f32 %v4166_v35, %v4056_v26 }
 0x542   : > { %v4075_v50 = vpop.f32.mrf.mxu0  ;;  %v4372_v24 = vpop.f32.mrf.mxu1 }
 0x543   : > { %v4076_v30 = vadd.f32 %v4753_v36, %v4075_v50  ;;  %v4185_v37 = vadd.f32 %v5447_v40, %v4086_v27 }
 0x544   : > { %v5454_v25 = vpop.f32.mrf.mxu0  ;;  %v5484_v15 = vpop.f32.mrf.mxu1 }
 0x545   : > { %v4268_v31 = vadd.f32 %v5454_v25, %v4173_v28  ;;  %v4179_v46 = vadd.f32 %v4178_v42, %v4076_v30 }
 0x546   : > { %v4260_v29 = vpop.f32.mrf.mxu0  ;;  %v4548_v16 = vpop.f32.mrf.mxu1 }
 0x547   : > { %v4261_v34 = vadd.f32 %v4260_v29, %v4167_v13  ;;  %v4365_v39 = vadd.f32 %v5464_v18, %v4268_v31 }
 0x548   : > { %v5457_v33 = vpop.f32.mrf.mxu0  ;;  %v5487_v52 = vpop.f32.mrf.mxu1 }
 0x549   : > { %v4282_v43 = vadd.f32 %v5457_v33, %v4185_v37  ;;  %v4357_v22 = vadd.f32 %v4356_v21, %v4261_v34 }
 0x54a   : > { %v4274_v38 = vpop.f32.mrf.mxu0  ;;  %v4560_v60 = vpop.f32.mrf.mxu1 }
 0x54b   : > { %v4275_v44 = vadd.f32 %v4274_v38, %v4179_v46  ;;  %v4381_v51 = vadd.f32 %v5467_v41, %v4282_v43 }
 0x54c   : > { %v5474_v7 = vpop.f32.mrf.mxu0 }
 0x54d   : > { %v4464_v17 = vadd.f32 %v5474_v7, %v4365_v39  ;;  %v4373_v56 = vadd.f32 %v4372_v24, %v4275_v44 }
 0x54e   : > { %v4457_v45 = vpop.f32.mrf.mxu0 }
 0x54f   : > { %v4555_v48 = vadd.f32 %v5484_v15, %v4464_v17  ;;  %v4458_v49 = vadd.f32 %v4457_v45, %v4357_v22 }
 0x550   : > { %v5477_v53 = vpop.f32.mrf.mxu0 }
 0x551   : > { %v4625_v54 = vadd.f32 %v4612_v32, %v4555_v48  ;;  %v4476_v55 = vadd.f32 %v5477_v53, %v4381_v51  ;;  %v4549_v57 = vadd.f32 %v4548_v16, %v4458_v49 }
 0x552   : > { %v4469_v58 = vpop.f32.mrf.mxu0 }
 0x553   : > { %v4629_v59 = vmul.f32 0.5, %v4625_v54  ;;  %v4567_v61 = vadd.f32 %v5487_v52, %v4476_v55  ;;  %v4470_v63 = vadd.f32 %v4469_v58, %v4373_v56  ;;  %v4624_v0 = vadd.f32 %v4607_v8, %v4549_v57 }
 0x555   : > { %4633 = vst [vmem:[%s191_s11 + $0x8] sm:$0xff] %v4629_v59  ;;  %v4627_v2 = vadd.f32 %v4622_v1, %v4567_v61  ;;  %v4561_v5 = vadd.f32 %v4560_v60, %v4470_v63  ;;  %v4628_v6 = vmul.f32 0.5, %v4624_v0 }
 0x557   : > { %v4631_v3 = vmul.f32 0.5, %v4627_v2  ;;  %v4626_v9 = vadd.f32 %v4617_v4, %v4561_v5  ;;  %4632 = vst [vmem:[%s191_s11] sm:$0xff] %v4628_v6 }
 0x559   : > { %4635 = vst [vmem:[%s191_s11 + $0x18] sm:$0xff] %v4631_v3  ;;  %v4630_v12 = vmul.f32 0.5, %v4626_v9 }
 0x55b   : > { %4634 = vst [vmem:[%s191_s11 + $0x10] sm:$0xff] %v4630_v12 }
 0x55c   : > { %5565 = shalt.err (!%p5562_p3)
}
 0x55d   : > { %s5566_s30 = scalar_lea.hbm %s6398_s22, 512  ;;  %s5570_s7 = scalar_lea.hbm %s6448_s4, 1024 }
 0x55e   : > { %p5567_p4 = scmp.ne.s32.totalorder %s6398_s22, %s5566_s30  ;;  %p5571_p9 = scmp.lt.s32.totalorder %s6398_s22, %s6448_s4 }
 0x55f   : > { %p5572_p10 = scmp.lt.s32.totalorder %s5570_s7, %s5566_s30 }
 0x560   : > { %p5568_p7 = pnand %p5567_p4, %p5685_p5 }
 0x561   : > { %p5573_p11 = por %p5572_p10, %p5571_p9 }
 0x562   : > { %p5569_p8 = pneg %p5568_p7 }
 0x564   : > { %p5574_p12 = pnand %p5573_p11, %p5569_p8 }
 0x566   : > { %5577 = shalt.err (!%p5574_p12)
}
 0x567   : > { %s5620_s10 = smov 128   ;;  %s5621_s11 = smov 8  }
 0x568   : > { %5496 = dma.vmem_to_hbm [thread:$0]  (%p5685_p5), %s6400_s12, 512, %s6398_s22, %s6404_s23, %s5620_s10, %s5620_s10, %s5621_s11  }
 0x569 PF: > { %p5502_p13 = scmp.ge.s32.totalorder %s5612_s18, 2  ;;  %s4665_s14 = sand.u32 1, %s5600_s15  }
 0x56a   : > { %s4666_s13 = scalar_lea.sflag [#allocation3], %s4665_s14 }
 0x56b   : > { %p5499_p0 = pnand %p5502_p13, %p5689_p6 }
 0x56d   : > { %p5500_p1 = pneg %p5499_p0 }
 0x56f   : > { %5595 = dma.done.wait (%p5500_p1), %s4666_s13, 512  }
 0x570   : > { %5597 = vsyncadd (%p5500_p1), %s4666_s13, 4294966784  ;;  %p14_p2 = scmp.ge.s32.totalorder %s5672_s21, 4   ;;  %s6451_s15 = smov %s5604_s16 }
 0x571   : > { %s6452_s16 = smov %s5608_s17  ;;  %s6453_s17 = smov %s5683_s24 }
 0x572   : > { %s6454_s18 = smov %s5672_s21  ;;  %16 = sbr.rel (!%p14_p2) target bundleno = 3 (0x3), region = 71 }
 0x577   :  { %4671 = vsyncpa [#allocation3], 1 }
 0x578   :  { %4673 = vsyncpa [#allocation3 + $0x1], 1 }

// kernel: tpu_custom_call.1
= control target key start
LH: loop header
LB: loop body
LE: loop exit
PB: predicated region body
PF: predicated region fallthrough
CT: control target
= control target key end

     0   :  { %9 = vsyncpa [#allocation3], 0  ;;  %s1690_s0 = inlined_call_operand.vmem [shape: f32[64,6], index: 0, kind: input, shape index: {}]   ;;  %s1691_s1 = inlined_call_operand.vmem [shape: f32[32,16], index: 1, kind: input, shape index: {}]   ;;  %s1692_s2 = inlined_call_operand.vmem [shape: f32[32,384], index: 2, kind: input, shape index: {}]   ;;  %s1693_s3 = inlined_call_operand.vmem [shape: f32[1,640], index: 3, kind: input, shape index: {}]   ;;  %s1694_s4 = inlined_call_operand.hbm [shape: f32[64,128], index: 4, kind: output, shape index: {}]  }
   0x1   :  { %11 = vsyncpa [#allocation3 + $0x1], 0  ;;  %s1483_s15 = smov 0   ;;  %s1485_s16 = smov 0  }
   0x2   :  { %s1487_s17 = smov 0   ;;  %s1489_s18 = smov 0  }
   0x3 LB: > { %s1504_s19 = sadd.s32 4294967295, %s1448_s18   ;;  %s1152_s20 = sadd.s32 4294967294, %s1448_s18   ;;  %s1448_s18 = sphi %s1489_s18, %s1700_s18   ;;  %s1444_s17 = sphi %s1487_s17, %s1699_s17   ;;  %s1440_s16 = sphi %s1485_s16, %s1698_s16   ;;  %s1436_s15 = sphi %s1483_s15, %s1697_s15  }
   0x4   : > { %s1508_s21 = sadd.s32 1, %s1448_s18   ;;  %s113_s22 = sadd.s32 1, %s1444_s17 }
   0x5   : > { %s110_s23 = ssub.s32 %s1448_s18, %s1508_s21  ;;  %p123_p0 = scmp.ne.s32.totalorder %s1444_s17, %s1440_s16 }
   0x6   : > { %p111_p1 = scmp.eq.s32.totalorder %s110_s23, 0  ;;  %p124_p2 = scmp.eq.s32.totalorder %s1504_s19, 1 }
   0x7   : > { %p129_p3 = scmp.ne.s32.totalorder %s1440_s16, %s1436_s15  ;;  %p130_p4 = scmp.eq.s32.totalorder %s1152_s20, 1 }
   0x8   : > { %s1519_s24 = scalar_select %p111_p1, %s1444_s17, %s113_s22  }
   0x9   : > { %p1521_p5 = por %p124_p2, %p123_p0  ;;  %p1525_p6 = por %p130_p4, %p129_p3 }
   0xa   : > { %p1155_p7 = scmp.ge.s32.totalorder %s1448_s18, 1  ;;  %p166_p8 = scmp.lt.s32.totalorder %s1448_s18, 3 }
   0xc   : > { %p167_p9 = pnand %p1155_p7, %p166_p8 }
   0xd   : > { %s1157_s27 = sshll.u32 (!%p167_p9), %s1504_s19, 2  ;;  %s1451_s14 = smov (!%p167_p9), 120  }
   0xe   : > { %170 = sbr.rel (%p167_p9) target bundleno = 992 (0x3e0), region = 36  ;;  %p193_p10 = scmp.lt.s32.totalorder (!%p167_p9), %s1157_s27, 7 }
   0xf   : > { %s189_s7 = sand.u32 (!%p167_p9), 1, %s1440_s16   ;;  %s1206_s13 = sshll.u32 (!%p167_p9), %s1504_s19, 9 }
  0x10   : > { %s1156_s10 = sshll.u32 (!%p167_p9), %s189_s7, 5  ;;  %s1646_s22 = scalar_lea.hbm (!%p167_p9), %s1694_s4, %s1206_s13 }
  0x11   : > { %s1650_s23 = scalar_lea.sflag (!%p167_p9), [#allocation3], %s189_s7 }
  0x13   : > { %v1450_v0 = vmov 4   ;;  %v237_v1 = vld [vmem:[%s1691_s1 + $0x18] sm:$0xff]  ;;  %s1702_s27 = smov (!%p193_p10, %s1157_s27), 7  ;;  %v236_v2 = vld [vmem:[%s1691_s1 + $0x10] sm:$0xff]  ;;  %v235_v3 = vld [vmem:[%s1691_s1 + $0x8] sm:$0xff]  ;;  %v1452_v17 = vmov 5   ;;  %v208_v18 = vlaneseq }
  0x14   : > { %1383 = vset.pattern.permute.xlu1 %v1450_v0  ;;  %1382 = vset.pattern.permute.xlu0 %v1450_v0  ;;  %s1158_s6 = sshll.u32 %s1702_s27, 3  ;;  %v234_v4 = vld [vmem:[%s1691_s1] sm:$0xff]  ;;  %vm238_vm0 = vcmask 261120   ;;  %v1453_v22 = vmov 0.0   ;;  %v207_v42 = vld [vmem:[%s1692_s2 + $0x30] sm:$0xf] }
  0x15   : > { %1252 = vmatprep.subr.mxu0 %v237_v1  ;;  %s196_s11 = scalar_lea.vmem %s1690_s0, %s1158_s6  ;;  %v209_v19 = vand.u32 127, %v208_v18  ;;  %v336_v41 = vld [vmem:[%s1692_s2] sm:$0xff]  ;;  %vm448_vm9 = vcmask 1043456   ;;  %vm337_vm10 = vcmask 64512   ;;  %v674_v45 = vld [vmem:[%s1692_s2 + $0x18] sm:$0xff]  ;;  %vm435_vm11 = vcmask 31744  }
  0x16   : > { %1253 = vmatpush3.msra.mxu0 %v237_v1  ;;  %v1547_v5 = vld [vmem:[%s196_s11 + $0x10] sm:$0xff]  ;;  %v1549_v6 = vld [vmem:[%s196_s11] sm:$0xff]  ;;  %v1551_v7 = vld [vmem:[%s196_s11 + $0x18] sm:$0xff]  ;;  %1266 = vmatprep.subr.mxu1 %v336_v41  ;;  %vm912_vm12 = vcmask 130048   ;;  %s1455_s27 = smov [#allocation2]  }
  0x17   : > { %1254 = vmatprep.subr.mxu0 %v236_v2  ;;  %v1332_v8 = vtrunc.f32 %v1547_v5  ;;  %v1328_v9 = vtrunc.f32 %v1549_v6  ;;  %v1334_v10 = vtrunc.f32 %v1551_v7  ;;  %v1556_v11 = vld [vmem:[%s196_s11 + $0x8] sm:$0xff]  ;;  %1267 = vmatpush3.msra.mxu1 %v336_v41  ;;  %v794_v52 = vld [vmem:[%s1692_s2 + $0x50] sm:$0xff]  ;;  %v793_v53 = vld [vmem:[%s1692_s2 + $0x38] sm:$0xff]  ;;  %s191_s11 = scalar_lea.vmem [#allocation2], %s1156_s10  ;;  %s1392_s28 = sshll.u32 %s1455_s27, 4  ;;  %s1393_s28 = int_to_ptr.vmem [resolvable:$false] %s1392_s28 }
  0x18   : > { %1255 = vmatpush3.msra.mxu0 %v236_v2  ;;  %v1330_v12 = vtrunc.f32 %v1556_v11  ;;  %1274 = vmatprep.subr.msk.mxu1 %vm448_vm9, %v207_v42  ;;  %v792_v54 = vld [vmem:[%s1692_s2 + $0x20] sm:$0xff]  ;;  %v791_v55 = vld [vmem:[%s1692_s2 + $0x8] sm:$0xff]  ;;  %s1090_s12 = sshll.u32 %s191_s11, 4  ;;  %s1394_s29 = scalar_lea.vmem %s1393_s28, 1024  ;;  %s1641_s12 = int_to_ptr.vmem [resolvable:$true] %s1090_s12 }
  0x19   : > { %1256 = vmatprep.subr.mxu0 %v235_v3  ;;  %v1333_v13 = vcvt.f32.s32 %v1332_v8  ;;  %v1329_v14 = vcvt.f32.s32 %v1328_v9  ;;  %v1335_v15 = vcvt.f32.s32 %v1334_v10  ;;  %v1199_v56 = vld [vmem:[%s1693_s3 + $0x3] ss:$0 sm:$0xff]  ;;  %s1388_s19 = scalar_lea.vmem %s1641_s12, 512  ;;  %p1395_p0 = scmp.lt.s32.totalorder %s1641_s12, %s1393_s28 }
  0x1a   : > { %1257 = vmatpush3.msra.mxu0 %v235_v3  ;;  %v1331_v16 = vcvt.f32.s32 %v1330_v12  ;;  %v1019_v57 = vmul.f32 %v1199_v56, %v1556_v11  ;;  %v1018_v58 = vmul.f32 %v1199_v56, %v1549_v6  ;;  %v1020_v59 = vmul.f32 %v1199_v56, %v1547_v5  ;;  %p1389_p11 = scmp.ne.s32.totalorder %s1641_s12, %s1388_s19  ;;  %p1396_p1 = scmp.lt.s32.totalorder %s1394_s29, %s1388_s19 }
  0x1b   : > { %1258 = vmatprep.subr.mxu0 %v234_v4  ;;  %217 = vperm.xlu1 %1383, %v1333_v13   ;;  %v1021_v60 = vmul.f32 %v1199_v56, %v1551_v7  ;;  %v1194_v56 = vld [vmem:[%s1693_s3 + $0x2] ss:$0 sm:$0xff] }
  0x1c   : > { %1259 = vmatpush3.msra.mxu0 %v234_v4  ;;  %211 = vperm.xlu0 %1382, %v1329_v14   ;;  %v1025_v61 = vsel %vm435_vm11, %v1019_v57, 0.0  ;;  %v1022_v62 = vsel %vm435_vm11, %v1018_v58, 0.0  ;;  %v1028_v63 = vsel %vm435_vm11, %v1020_v59, 0.0  ;;  %p1390_p12 = pnand %p1389_p11, %p1521_p5  ;;  %p1397_p2 = por %p1396_p1, %p1395_p0 }
  0x1d   : > { %v1031_v0 = vsel %vm435_vm11, %v1021_v60, 0.0 }
  0x1e   : > { %p1391_p13 = pneg %p1390_p12 }
  0x1f   : > { %220 = vperm.xlu1 %1383, %v1335_v15  }
  0x20   : > { %214 = vperm.xlu0 %1382, %v1331_v16   ;;  %p1398_p3 = pnand %p1397_p2, %p1391_p13 }
  0x23   : > { %571 = vrot.lane.b32.xlu1 %v237_v1, %s1451_s14 }
  0x24   : > { %1384 = vset.pattern.permute.xlu0 %v1452_v17  ;;  %1385 = vset.pattern.permute.xlu1 %v1452_v17 }
  0x25   : > { %538 = vperm.xlu0 %1384, %v1329_v14  }
  0x27   : > { %541 = vperm.xlu1 %1385, %v1331_v16  }
  0x29   : > { %569 = vrot.lane.b32.xlu0 %v236_v2, %s1451_s14 }
  0x2b   : > { %544 = vperm.xlu1 %1385, %v1333_v13   ;;  %v1188_v13 = vld [vmem:[%s1693_s3] ss:$0 sm:$0xff] }
  0x2d   : > { %567 = vrot.lane.b32.xlu0 %v235_v3, %s1451_s14 }
  0x2f   : > { %547 = vperm.xlu1 %1385, %v1335_v15  }
  0x31   : > { %565 = vrot.lane.b32.xlu0 %v234_v4, %s1451_s14 }
  0x50   : > { %1026 = vadd.xlane.f32.xlu0 %v1025_v61 }
  0x53   : > { %1023 = vadd.xlane.f32.xlu1 %v1022_v62 }
  0x54   : > { %1029 = vadd.xlane.f32.xlu0 %v1028_v63 }
  0x57   : > { %1032 = vadd.xlane.f32.xlu1 %v1031_v0 }
  0x96   : > { %v218_v20 = vpop.permute.xlu1 %217 }
  0x97   : > { %v212_v21 = vpop.permute.xlu0 %211  ;;  %vm224_vm2 = vcmp.eq.s32.totalorder %v218_v20, %v209_v19 }
  0x98   : > { %vm222_vm1 = vcmp.eq.s32.totalorder %v212_v21, %v209_v19  ;;  %v1161_v26 = vsel %vm224_vm2, 1.0, %v1453_v22 }
  0x99   : > { %v1159_v23 = vsel %vm222_vm1, 1.0, %v1453_v22 }
  0x9a   : > { %1260 = vmatprep.mubr.msk.f32.mxu0 %vm238_vm0, %v1159_v23  ;;  %v221_v24 = vpop.permute.xlu1 %220 }
  0x9b   : > { %v215_v25 = vpop.permute.xlu0 %214  ;;  %vm225_vm4 = vcmp.eq.s32.totalorder %v221_v24, %v209_v19 }
  0x9c   : > { %vm223_vm3 = vcmp.eq.s32.totalorder %v215_v25, %v209_v19  ;;  %v1162_v30 = vsel %vm225_vm4, 1.0, %v1453_v22 }
  0x9d   : > { %v1160_v27 = vsel %vm223_vm3, 1.0, %v1453_v22 }
  0x9e   : > { %1261 = vmatmul.mubr.msk.f32.vlgmr.msra.gmra.mxu0 %vm238_vm0, %v1160_v27  ;;  %v572_v28 = vpop.permute.xlu1 %571 }
  0x9f   : > { %1263 = vmatprep.mubr.msk.f32.mxu0 %vm238_vm0, %v1161_v26  ;;  %1282 = vmatprep.subr.mxu0 %v572_v28 }
  0xa0   : > { %v539_v29 = vpop.permute.xlu0 %538  ;;  %1283 = vmatpush3.msra.mxu0 %v572_v28 }
  0xa1   : > { %vm549_vm5 = vcmp.eq.s32.totalorder %v539_v29, %v209_v19 }
  0xa2   : > { %v1176_v31 = vsel %vm549_vm5, 1.0, %v1453_v22  ;;  %1264 = vmatmul.mubr.msk.f32.gmra.mxu0 %vm238_vm0, %v1162_v30  ;;  %v542_v32 = vpop.permute.xlu1 %541  ;;  %v904_v30 = vld [vmem:[%s1692_s2 + $0x28] sm:$0xff] }
  0xa3   : > { %1290 = vmatprep.mubr.msk.f32.mxu0 %vm238_vm0, %v1176_v31  ;;  %vm550_vm6 = vcmp.eq.s32.totalorder %v542_v32, %v209_v19  ;;  %v903_v31 = vld [vmem:[%s1692_s2 + $0x10] sm:$0xff]  ;;  %v1200_v32 = vld [vmem:[%s1693_s3 + $0x4] ss:$0 sm:$0xff] }
  0xa4   : > { %v570_v33 = vpop.permute.xlu0 %569  ;;  %v1177_v38 = vsel %vm550_vm6, 1.0, %v1453_v22 }
  0xa5   : > { %1284 = vmatprep.subr.mxu0 %v570_v33 }
  0xa6   : > { %1285 = vmatpush3.msra.mxu0 %v570_v33  ;;  %v545_v34 = vpop.permute.xlu1 %544 }
  0xa7   : > { %vm551_vm7 = vcmp.eq.s32.totalorder %v545_v34, %v209_v19 }
  0xa8   : > { %v568_v35 = vpop.permute.xlu0 %567  ;;  %v1178_v39 = vsel %vm551_vm7, 1.0, %v1453_v22 }
  0xa9   : > { %1286 = vmatprep.subr.mxu0 %v568_v35 }
  0xaa   : > { %1287 = vmatpush3.msra.mxu0 %v568_v35  ;;  %v548_v36 = vpop.permute.xlu1 %547 }
  0xab   : > { %vm552_vm8 = vcmp.eq.s32.totalorder %v548_v36, %v209_v19  ;;  %v1454_v36 = vmov 0  }
  0xac   : > { %v566_v37 = vpop.permute.xlu0 %565  ;;  %v1179_v40 = vsel %vm552_vm8, 1.0, %v1453_v22  ;;  %1387 = vset.pattern.permute.xlu1 %v1454_v36  ;;  %1386 = vset.pattern.permute.xlu0 %v1454_v36 }
  0xad   : > { %1288 = vmatprep.subr.mxu0 %v566_v37 }
  0xae   : > { %1289 = vmatpush3.msra.mxu0 %v566_v37 }
  0xaf   : > { %1291 = vmatmul.mubr.msk.f32.vlgmr.msra.gmra.mxu0 %vm238_vm0, %v1177_v38  ;;  %1304 = vmatprep.subr.mxu0 %v794_v52 }
  0xb0   : > { %1293 = vmatprep.mubr.msk.f32.mxu0 %vm238_vm0, %v1178_v39  ;;  %1305 = vmatpush3.msra.mxu0 %v794_v52 }
  0xb1   : > { %1306 = vmatprep.subr.mxu0 %v793_v53 }
  0xb2   : > { %1307 = vmatpush3.msra.mxu0 %v793_v53 }
  0xb3   : > { %1294 = vmatmul.mubr.msk.f32.gmra.mxu0 %vm238_vm0, %v1179_v40  ;;  %1308 = vmatprep.subr.mxu0 %v792_v54 }
  0xb4   : > { %1309 = vmatpush3.msra.mxu0 %v792_v54 }
  0xb5   : > { %1310 = vmatprep.subr.mxu0 %v791_v55 }
  0xb6   : > { %1311 = vmatpush3.msra.mxu0 %v791_v55 }
  0xd9   : > { %v1027_v33 = vpop.xlane.xlu0 %1026 }
  0xda   : > { %v1041_v35 = vadd.f32 %v1200_v32, %v1027_v33 }
  0xdc   : > { %v1024_v34 = vpop.xlane.xlu1 %1023  ;;  %1051 = vperm.xlu1 %1387, %v1041_v35  }
  0xdd   : > { %v1040_v37 = vadd.f32 %v1200_v32, %v1024_v34  ;;  %v1030_v38 = vpop.xlane.xlu0 %1029 }
  0xde   : > { %v1042_v40 = vadd.f32 %v1200_v32, %v1030_v38 }
  0xdf   : > { %1046 = vperm.xlu0 %1386, %v1040_v37  }
  0xe0   : > { %v1033_v39 = vpop.xlane.xlu1 %1032  ;;  %1056 = vperm.xlu1 %1387, %v1042_v40  }
  0xe1   : > { %v1043_v41 = vadd.f32 %v1200_v32, %v1033_v39 }
  0xe4   : > { %1061 = vperm.xlu1 %1387, %v1043_v41  }
 0x157   : > { %v1052_v55 = vpop.permute.xlu1 %1051 }
 0x15a   : > { %v1047_v61 = vpop.permute.xlu0 %1046 }
 0x15b   : > { %v1057_v57 = vpop.permute.xlu1 %1056 }
 0x15e   : > { %v1262_v43 = vpop.f32.mrf.mxu0 }
 0x160   : > { %v317_v44 = vpop.f32.mrf.mxu0 }
 0x161   : > { %1268 = vmatprep.mubr.msk.f32.mxu1 %vm337_vm10, %v317_v44 }
 0x162   : > { %v1265_v46 = vpop.f32.mrf.mxu0  ;;  %1269 = vmatmul.mubr.msk.f32.vlgmr.msra.gmra.mxu1 %vm337_vm10, %v1262_v43 }
 0x163   : > { %1275 = vmatpush3.msk.msra.mxu1 %vm448_vm9, %v207_v42  ;;  %v1189_v42 = vld [vmem:[%s1693_s3 + $0x1] ss:$0 sm:$0xff] }
 0x164   : > { %v327_v47 = vpop.f32.mrf.mxu0  ;;  %1296 = vmatprep.subr.mxu1 %v674_v45 }
 0x165   : > { %1271 = vmatprep.mubr.msk.f32.mxu1 %vm337_vm10, %v327_v47 }
 0x166   : > { %1272 = vmatmul.mubr.msk.f32.gmra.mxu1 %vm337_vm10, %v1265_v46 }
 0x167   : > { %1276 = vmatprep.mubr.msk.f32.mxu1 %vm435_vm11, %v1549_v6 }
 0x16a   : > { %1277 = vmatmul.mubr.msk.f32.vlgmr.msra.gmra.mxu1 %vm435_vm11, %v1556_v11 }
 0x16b   : > { %1297 = vmatpush3.msra.mxu1 %v674_v45  ;;  %1279 = vmatprep.mubr.msk.f32.mxu1 %vm435_vm11, %v1547_v5 }
 0x16c   : > { %1318 = vmatprep.subr.mxu1 %v904_v30 }
 0x16e   : > { %1280 = vmatmul.mubr.msk.f32.gmra.mxu1 %vm435_vm11, %v1551_v7 }
 0x16f   : > { %v1292_v48 = vpop.f32.mrf.mxu0 }
 0x171   : > { %v655_v49 = vpop.f32.mrf.mxu0 }
 0x172   : > { %1298 = vmatprep.mubr.msk.f32.mxu1 %vm337_vm10, %v655_v49 }
 0x173   : > { %v1295_v50 = vpop.f32.mrf.mxu0  ;;  %1299 = vmatmul.mubr.msk.f32.vlgmr.msra.gmra.mxu1 %vm337_vm10, %v1292_v48 }
 0x174   : > { %1319 = vmatpush3.msra.mxu1 %v904_v30 }
 0x175   : > { %v665_v51 = vpop.f32.mrf.mxu0  ;;  %1320 = vmatprep.subr.mxu1 %v903_v31 }
 0x176   : > { %1301 = vmatprep.mubr.msk.f32.mxu1 %vm337_vm10, %v665_v51  ;;  %1321 = vmatpush3.msra.mxu1 %v903_v31 }
 0x177   : > { %1302 = vmatmul.mubr.msk.f32.gmra.mxu1 %vm337_vm10, %v1295_v50 }
 0x222   : > { %v1270_v1 = vpop.f32.mrf.mxu1 }
 0x224   : > { %v416_v2 = vpop.f32.mrf.mxu1 }
 0x226   : > { %v1273_v3 = vpop.f32.mrf.mxu1 }
 0x228   : > { %v426_v4 = vpop.f32.mrf.mxu1 }
 0x22a   : > { %v1278_v6 = vpop.f32.mrf.mxu1 }
 0x22b   : > { %v524_v9 = vadd.f32 %v1278_v6, %v1270_v1 }
 0x22c   : > { %v518_v5 = vpop.f32.mrf.mxu1 }
 0x22d   : > { %v519_v11 = vadd.f32 %v518_v5, %v416_v2 }
 0x22e   : > { %v1281_v8 = vpop.f32.mrf.mxu1 }
 0x22f   : > { %v534_v15 = vadd.f32 %v1281_v8, %v1273_v3 }
 0x230   : > { %v528_v7 = vpop.f32.mrf.mxu1 }
 0x231   : > { %v529_v19 = vadd.f32 %v528_v7, %v426_v4  ;;  %v1062_v4 = vpop.permute.xlu1 %1061 }
 0x233   : > { %v1300_v10 = vpop.f32.mrf.mxu1 }
 0x234   : > { %v773_v12 = vadd.f32 %v1300_v10, %v524_v9 }
 0x235   : > { %v753_v14 = vpop.f32.mrf.mxu1 }
 0x236   : > { %v772_v16 = vadd.f32 %v753_v14, %v519_v11  ;;  %v784_v17 = vadd.f32 %v1188_v13, %v773_v12 }
 0x237   : > { %v1303_v18 = vpop.f32.mrf.mxu1 }
 0x238   : > { %v783_v20 = vadd.f32 %v1188_v13, %v772_v16  ;;  %v775_v21 = vadd.f32 %v1303_v18, %v534_v15  ;;  %v788_v25 = vmax.f32 %v784_v17, 0.0 }
 0x239   : > { %v763_v22 = vpop.f32.mrf.mxu1 }
 0x23a   : > { %v787_v23 = vmax.f32 %v783_v20, 0.0  ;;  %v774_v24 = vadd.f32 %v763_v22, %v529_v19  ;;  %v786_v26 = vadd.f32 %v1188_v13, %v775_v21 }
 0x23c   : > { %v785_v27 = vadd.f32 %v1188_v13, %v774_v24  ;;  %1312 = vmatprep.mubr.msk.f32.mxu0 %vm238_vm0, %v787_v23  ;;  %v790_v29 = vmax.f32 %v786_v26, 0.0 }
 0x23d   : > { %1313 = vmatmul.mubr.msk.f32.vlgmr.msra.gmra.mxu0 %vm238_vm0, %v788_v25 }
 0x23e   : > { %v789_v28 = vmax.f32 %v785_v27, 0.0 }
 0x240   : > { %1315 = vmatprep.mubr.msk.f32.mxu0 %vm238_vm0, %v789_v28 }
 0x241   : > { %1316 = vmatmul.mubr.msk.f32.gmra.mxu0 %vm238_vm0, %v790_v29 }
 0x2fd   : > { %v1314_v43 = vpop.f32.mrf.mxu0 }
 0x2fe   : > { %v886_v44 = vadd.f32 %v1314_v43, %v1189_v42 }
 0x2ff   : > { %v880_v45 = vpop.f32.mrf.mxu0 }
 0x300   : > { %v881_v46 = vadd.f32 %v1189_v42, %v880_v45  ;;  %v900_v49 = vmax.f32 %v886_v44, 0.0 }
 0x301   : > { %v1317_v47 = vpop.f32.mrf.mxu0 }
 0x302   : > { %v899_v48 = vmax.f32 %v881_v46, 0.0  ;;  %v896_v50 = vadd.f32 %v1317_v47, %v1189_v42 }
 0x303   : > { %v890_v51 = vpop.f32.mrf.mxu0 }
 0x304   : > { %v891_v52 = vadd.f32 %v1189_v42, %v890_v51  ;;  %1322 = vmatprep.mubr.msk.f32.mxu1 %vm912_vm12, %v899_v48  ;;  %v902_v54 = vmax.f32 %v896_v50, 0.0 }
 0x305   : > { %1323 = vmatmul.mubr.msk.f32.vlgmr.msra.gmra.mxu1 %vm912_vm12, %v900_v49 }
 0x306   : > { %v901_v53 = vmax.f32 %v891_v52, 0.0 }
 0x308   : > { %1325 = vmatprep.mubr.msk.f32.mxu1 %vm912_vm12, %v901_v53 }
 0x309   : > { %1326 = vmatmul.mubr.msk.f32.gmra.mxu1 %vm912_vm12, %v902_v54 }
 0x3c5   : > { %v1324_v58 = vpop.f32.mrf.mxu1 }
 0x3c6   : > { %v997_v59 = vadd.f32 %v1324_v58, %v1194_v56 }
 0x3c7   : > { %v991_v60 = vpop.f32.mrf.mxu1 }
 0x3c8   : > { %v1065_v62 = vadd.f32 %v1052_v55, %v997_v59  ;;  %v992_v63 = vadd.f32 %v1194_v56, %v991_v60 }
 0x3c9   : > { %v1327_v0 = vpop.f32.mrf.mxu1 }
 0x3ca   : > { %v1069_v1 = vmul.f32 0.5, %v1065_v62  ;;  %v1007_v2 = vadd.f32 %v1327_v0, %v1194_v56  ;;  %v1064_v3 = vadd.f32 %v1047_v61, %v992_v63 }
 0x3cb   : > { %v1001_v6 = vpop.f32.mrf.mxu1 }
 0x3cc   : > { %1073 = vst [vmem:[%s191_s11 + $0x8] sm:$0xff] %v1069_v1  ;;  %v1067_v5 = vadd.f32 %v1062_v4, %v1007_v2  ;;  %v1068_v8 = vmul.f32 0.5, %v1064_v3  ;;  %v1002_v7 = vadd.f32 %v1194_v56, %v1001_v6 }
 0x3ce   : > { %v1071_v9 = vmul.f32 0.5, %v1067_v5  ;;  %1072 = vst [vmem:[%s191_s11] sm:$0xff] %v1068_v8  ;;  %v1066_v10 = vadd.f32 %v1057_v57, %v1002_v7 }
 0x3d0   : > { %1075 = vst [vmem:[%s191_s11 + $0x18] sm:$0xff] %v1071_v9  ;;  %v1070_v11 = vmul.f32 0.5, %v1066_v10 }
 0x3d2   : > { %1074 = vst [vmem:[%s191_s11 + $0x10] sm:$0xff] %v1070_v11 }
 0x3d3   : > { %1401 = shalt.err (!%p1398_p3)
}
 0x3d4   : > { %s1402_s30 = scalar_lea.hbm %s1646_s22, 512  ;;  %s1406_s7 = scalar_lea.hbm %s1694_s4, 1024 }
 0x3d5   : > { %p1403_p4 = scmp.ne.s32.totalorder %s1646_s22, %s1402_s30  ;;  %p1407_p9 = scmp.lt.s32.totalorder %s1646_s22, %s1694_s4 }
 0x3d6   : > { %p1408_p10 = scmp.lt.s32.totalorder %s1406_s7, %s1402_s30 }
 0x3d7   : > { %p1404_p7 = pnand %p1403_p4, %p1521_p5 }
 0x3d8   : > { %p1409_p11 = por %p1408_p10, %p1407_p9 }
 0x3d9   : > { %p1405_p8 = pneg %p1404_p7 }
 0x3db   : > { %p1410_p12 = pnand %p1409_p11, %p1405_p8 }
 0x3dd   : > { %1413 = shalt.err (!%p1410_p12)
}
 0x3de   : > { %s1456_s10 = smov 128   ;;  %s1457_s11 = smov 8  }
 0x3df   : > { %1336 = dma.vmem_to_hbm [thread:$0]  (%p1521_p5), %s1641_s12, 512, %s1646_s22, %s1650_s23, %s1456_s10, %s1456_s10, %s1457_s11  }
 0x3e0 PF: > { %p1342_p13 = scmp.ge.s32.totalorder %s1448_s18, 2  ;;  %s1105_s13 = sand.u32 1, %s1436_s15  }
 0x3e1   : > { %s1106_s14 = scalar_lea.sflag [#allocation3], %s1105_s13 }
 0x3e2   : > { %p1339_p0 = pnand %p1342_p13, %p1525_p6 }
 0x3e4   : > { %p1340_p1 = pneg %p1339_p0 }
 0x3e6   : > { %1431 = dma.done.wait (%p1340_p1), %s1106_s14, 512  }
 0x3e7   : > { %1433 = vsyncadd (%p1340_p1), %s1106_s14, 4294966784  ;;  %p14_p2 = scmp.ge.s32.totalorder %s1508_s21, 4   ;;  %s1697_s15 = smov %s1440_s16 }
 0x3e8   : > { %s1698_s16 = smov %s1444_s17  ;;  %s1699_s17 = smov %s1519_s24 }
 0x3e9   : > { %s1700_s18 = smov %s1508_s21  ;;  %16 = sbr.rel (!%p14_p2) target bundleno = 3 (0x3), region = 71 }
 0x3ee   :  { %1111 = vsyncpa [#allocation3], 1 }
 0x3ef   :  { %1113 = vsyncpa [#allocation3 + $0x1], 1 }

// kernel: tpu_custom_call.1
= control target key start
LH: loop header
LB: loop body
LE: loop exit
PB: predicated region body
PF: predicated region fallthrough
CT: control target
= control target key end

     0   :  { %9 = vsyncpa [#allocation3], 0  ;;  %s6444_s0 = inlined_call_operand.vmem [shape: f32[64,6], index: 0, kind: input, shape index: {}]   ;;  %s6445_s1 = inlined_call_operand.vmem [shape: f32[32,16], index: 1, kind: input, shape index: {}]   ;;  %s6446_s2 = inlined_call_operand.vmem [shape: f32[32,384], index: 2, kind: input, shape index: {}]   ;;  %s6447_s3 = inlined_call_operand.vmem [shape: f32[1,640], index: 3, kind: input, shape index: {}]   ;;  %s6448_s4 = inlined_call_operand.hbm [shape: f32[64,128], index: 4, kind: output, shape index: {}]  }
   0x1   :  { %11 = vsyncpa [#allocation3 + $0x1], 0  ;;  %s5647_s15 = smov 0   ;;  %s5649_s16 = smov 0  }
   0x2   :  { %s5651_s17 = smov 0   ;;  %s5653_s18 = smov 0  }
   0x3 LB: > { %s5668_s19 = sadd.s32 4294967295, %s5612_s18   ;;  %s4712_s20 = sadd.s32 4294967294, %s5612_s18   ;;  %s5612_s18 = sphi %s5653_s18, %s6454_s18   ;;  %s5608_s17 = sphi %s5651_s17, %s6453_s17   ;;  %s5604_s16 = sphi %s5649_s16, %s6452_s16   ;;  %s5600_s15 = sphi %s5647_s15, %s6451_s15  }
   0x4   : > { %s5672_s21 = sadd.s32 1, %s5612_s18   ;;  %s113_s22 = sadd.s32 1, %s5608_s17 }
   0x5   : > { %s110_s23 = ssub.s32 %s5612_s18, %s5672_s21  ;;  %p123_p0 = scmp.ne.s32.totalorder %s5608_s17, %s5604_s16 }
   0x6   : > { %p111_p1 = scmp.eq.s32.totalorder %s110_s23, 0  ;;  %p124_p2 = scmp.eq.s32.totalorder %s5668_s19, 1 }
   0x7   : > { %p129_p3 = scmp.ne.s32.totalorder %s5604_s16, %s5600_s15  ;;  %p130_p4 = scmp.eq.s32.totalorder %s4712_s20, 1 }
   0x8   : > { %s5683_s24 = scalar_select %p111_p1, %s5608_s17, %s113_s22  }
   0x9   : > { %p5685_p5 = por %p124_p2, %p123_p0  ;;  %p5689_p6 = por %p130_p4, %p129_p3 }
   0xa   : > { %p4715_p7 = scmp.ge.s32.totalorder %s5612_s18, 1  ;;  %p166_p8 = scmp.lt.s32.totalorder %s5612_s18, 3 }
   0xc   : > { %p167_p9 = pnand %p4715_p7, %p166_p8 }
   0xd   : > { %s4717_s27 = sshll.u32 (!%p167_p9), %s5668_s19, 2  ;;  %s5616_s14 = smov (!%p167_p9), 120  }
   0xe   : > { %170 = sbr.rel (%p167_p9) target bundleno = 1385 (0x569), region = 36  ;;  %p193_p10 = scmp.lt.s32.totalorder (!%p167_p9), %s4717_s27, 7 }
   0xf   : > { %s189_s9 = sand.u32 (!%p167_p9), 1, %s5604_s16  }
  0x10   : > { %s6404_s23 = scalar_lea.sflag (!%p167_p9), [#allocation3], %s189_s9 }
  0x13   : > { %v5699_v0 = vld [vmem:[%s6445_s1 + $0x18] sm:$0xff]  ;;  %v5704_v1 = vld [vmem:[%s6445_s1 + $0x10] sm:$0xff]  ;;  %v5614_v2 = vmov 4   ;;  %v5715_v5 = vld [vmem:[%s6445_s1 + $0x8] sm:$0xff]  ;;  %s6456_s27 = smov (!%p193_p10, %s4717_s27), 7  ;;  %v5615_v37 = vmov 5   ;;  %v208_v38 = vlaneseq }
  0x14   : > { %5543 = vset.pattern.permute.xlu1 %v5614_v2  ;;  %5542 = vset.pattern.permute.xlu0 %v5614_v2  ;;  %v5707_v3 = vand.u32 4294901760, %v5699_v0  ;;  %v5710_v4 = vand.u32 4294901760, %v5704_v1  ;;  %v5720_v6 = vld [vmem:[%s6445_s1] sm:$0xff]  ;;  %v5723_v7 = vand.u32 4294901760, %v5715_v5  ;;  %s4718_s10 = sshll.u32 %s6456_s27, 3  ;;  %vm238_vm0 = vcmask 261120  }
  0x15   : > { %v5726_v8 = vand.u32 4294901760, %v5720_v6  ;;  %s5756_s13 = scalar_lea.vmem %s6444_s0, %s4718_s10  ;;  %v5799_v39 = vand.u32 127, %v208_v38  ;;  %v5617_v42 = vmov 0.0   ;;  %vm1467_vm5 = vcmask 1043456   ;;  %s4716_s10 = sshll.u32 %s189_s9, 5 }
  0x16   : > { %v5730_v9 = vsub.f32 %v5699_v0, %v5707_v3  ;;  %v5734_v10 = vsub.f32 %v5704_v1, %v5710_v4  ;;  %5032 = vmatprep.subr.mxu0 %v5707_v3  ;;  %v5739_v11 = vsub.f32 %v5715_v5, %v5723_v7  ;;  %v5760_v15 = vld [vmem:[%s5756_s13 + $0x10] sm:$0xff]  ;;  %v5763_v16 = vld [vmem:[%s5756_s13] sm:$0xff]  ;;  %v5766_v17 = vld [vmem:[%s5756_s13 + $0x18] sm:$0xff]  ;;  %vm866_vm6 = vcmask 64512   ;;  %s191_s11 = scalar_lea.vmem [#allocation2], %s4716_s10  ;;  %s5619_s27 = smov [#allocation2]  }
  0x17   : > { %v5743_v12 = vsub.f32 %v5720_v6, %v5726_v8  ;;  %5033 = vmatpush3.msra.mxu0 %v5707_v3  ;;  %v5492_v20 = vtrunc.f32 %v5760_v15  ;;  %v5488_v21 = vtrunc.f32 %v5763_v16  ;;  %v5777_v22 = vld [vmem:[%s5756_s13 + $0x8] sm:$0xff]  ;;  %v5494_v25 = vtrunc.f32 %v5766_v17  ;;  %s4650_s12 = sshll.u32 %s191_s11, 4  ;;  %s5556_s28 = sshll.u32 %s5619_s27, 4  ;;  %s6400_s12 = int_to_ptr.vmem [resolvable:$true] %s4650_s12  ;;  %s5557_s28 = int_to_ptr.vmem [resolvable:$false] %s5556_s28 }
  0x18   : > { %v5747_v13 = vand.u32 4294901760, %v5730_v9  ;;  %v5750_v14 = vand.u32 4294901760, %v5734_v10  ;;  %5034 = vmatprep.subr.mxu0 %v5710_v4  ;;  %v5771_v19 = vand.u32 4294901760, %v5739_v11  ;;  %v5490_v26 = vtrunc.f32 %v5777_v22  ;;  %s5558_s29 = scalar_lea.vmem %s5557_s28, 1024  ;;  %p5559_p0 = scmp.lt.s32.totalorder %s6400_s12, %s5557_s28 }
  0x19   : > { %5035 = vmatpush3.msra.mxu0 %v5710_v4  ;;  %v5782_v24 = vand.u32 4294901760, %v5743_v12  ;;  %v5493_v27 = vcvt.f32.s32 %v5492_v20  ;;  %v5489_v28 = vcvt.f32.s32 %v5488_v21  ;;  %v5495_v30 = vcvt.f32.s32 %v5494_v25 }
  0x1a   : > { %v388_v18 = vsub.f32 %v5730_v9, %v5747_v13  ;;  %5036 = vmatprep.subr.mxu0 %v5723_v7  ;;  %v395_v23 = vsub.f32 %v5734_v10, %v5750_v14  ;;  %v5491_v31 = vcvt.f32.s32 %v5490_v26  ;;  %v402_v33 = vsub.f32 %v5739_v11, %v5771_v19 }
  0x1b   : > { %5037 = vmatpush3.msra.mxu0 %v5723_v7  ;;  %217 = vperm.xlu1 %5543, %v5493_v27   ;;  %v409_v34 = vsub.f32 %v5743_v12, %v5782_v24  ;;  %vm1454_vm7 = vcmask 31744   ;;  %vm3969_vm12 = vcmask 130048  }
  0x1c   : > { %5038 = vmatprep.subr.mxu0 %v5726_v8  ;;  %v389_v29 = vand.u32 4294901760, %v388_v18  ;;  %211 = vperm.xlu0 %5542, %v5489_v28   ;;  %v396_v32 = vand.u32 4294901760, %v395_v23  ;;  %v403_v35 = vand.u32 4294901760, %v402_v33 }
  0x1d   : > { %5039 = vmatpush3.msra.mxu0 %v5726_v8  ;;  %v410_v36 = vand.u32 4294901760, %v409_v34  ;;  %v207_v34 = vld [vmem:[%s6446_s2 + $0x30] sm:$0xf] }
  0x1e   : > { %5060 = vmatprep.subr.mxu0 %v5730_v9  ;;  %5046 = vmatprep.subr.mxu1 %v389_v29 }
  0x1f   : > { %5047 = vmatpush3.msra.mxu1 %v389_v29  ;;  %220 = vperm.xlu1 %5543, %v5495_v30  }
  0x20   : > { %5048 = vmatprep.subr.mxu1 %v396_v32  ;;  %214 = vperm.xlu0 %5542, %v5491_v31  }
  0x21   : > { %5049 = vmatpush3.msra.mxu1 %v396_v32 }
  0x22   : > { %5050 = vmatprep.subr.mxu1 %v403_v35 }
  0x23   : > { %5051 = vmatpush3.msra.mxu1 %v403_v35  ;;  %2080 = vrot.lane.b32.xlu1 %v5699_v0, %s5616_s14 }
  0x24   : > { %5052 = vmatprep.subr.mxu1 %v410_v36  ;;  %5544 = vset.pattern.permute.xlu0 %v5615_v37 }
  0x25   : > { %5053 = vmatpush3.msra.mxu1 %v410_v36  ;;  %2047 = vperm.xlu0 %5544, %v5489_v28  }
  0x26   : > { %5074 = vmatprep.subr.mxu1 %v5707_v3  ;;  %5545 = vset.pattern.permute.xlu1 %v5615_v37 }
  0x27   : > { %2050 = vperm.xlu1 %5545, %v5491_v31  }
  0x29   : > { %2078 = vrot.lane.b32.xlu0 %v5704_v1, %s5616_s14 }
  0x2b   : > { %2053 = vperm.xlu1 %5545, %v5493_v27  }
  0x2d   : > { %2056 = vperm.xlu0 %5544, %v5495_v30  }
  0x2f   : > { %2076 = vrot.lane.b32.xlu1 %v5715_v5, %s5616_s14 }
  0x31   : > { %2074 = vrot.lane.b32.xlu0 %v5720_v6, %s5616_s14  ;;  %s4761_s14 = sshll.u32 %s5668_s19, 9  ;;  %s5552_s19 = scalar_lea.vmem %s6400_s12, 512 }
  0x32   : > { %s6398_s22 = scalar_lea.hbm %s6448_s4, %s4761_s14  ;;  %p5553_p11 = scmp.ne.s32.totalorder %s6400_s12, %s5552_s19 }
  0x33   : > { %p5560_p1 = scmp.lt.s32.totalorder %s5558_s29, %s5552_s19 }
  0x34   : > { %p5554_p12 = pnand %p5553_p11, %p5685_p5 }
  0x35   : > { %p5561_p2 = por %p5560_p1, %p5559_p0 }
  0x36   : > { %p5555_p13 = pneg %p5554_p12 }
  0x38   : > { %p5562_p3 = pnand %p5561_p2, %p5555_p13 }
  0x96   : > { %v218_v40 = vpop.permute.xlu1 %217 }
  0x97   : > { %v212_v41 = vpop.permute.xlu0 %211  ;;  %vm224_vm1 = vcmp.eq.s32.totalorder %v218_v40, %v5799_v39 }
  0x98   : > { %vm222_vm2 = vcmp.eq.s32.totalorder %v212_v41, %v5799_v39  ;;  %v5804_v43 = vsel %vm224_vm1, 1.0, %v5617_v42 }
  0x99   : > { %v5807_v44 = vsel %vm222_vm2, 1.0, %v5617_v42  ;;  %v246_v45 = vsel %vm238_vm0, %v5804_v43, 0 }
  0x9a   : > { %5054 = vmatprep.mubr.msk.f32.mxu1 %vm238_vm0, %v5807_v44  ;;  %v240_v46 = vsel %vm238_vm0, %v5807_v44, 0  ;;  %v5815_v47 = vsub.f32 %v246_v45, %v246_v45  ;;  %v221_v48 = vpop.permute.xlu1 %220 }
  0x9b   : > { %v215_v49 = vpop.permute.xlu0 %214  ;;  %v321_v50 = vsub.f32 %v240_v46, %v240_v46  ;;  %vm225_vm3 = vcmp.eq.s32.totalorder %v221_v48, %v5799_v39 }
  0x9c   : > { %vm223_vm4 = vcmp.eq.s32.totalorder %v215_v49, %v5799_v39  ;;  %v5820_v51 = vsel %vm225_vm3, 1.0, %v5617_v42  ;;  %v342_v59 = vand.u32 4294901760, %v5815_v47 }
  0x9d   : > { %v5823_v52 = vsel %vm223_vm4, 1.0, %v5617_v42  ;;  %v322_v53 = vand.u32 4294901760, %v321_v50  ;;  %v249_v54 = vsel %vm238_vm0, %v5820_v51, 0 }
  0x9e   : > { %v243_v55 = vsel %vm238_vm0, %v5823_v52, 0  ;;  %5055 = vmatmul.mubr.msk.f32.vlgmr.msra.gmra.mxu1 %vm238_vm0, %v5823_v52  ;;  %v351_v56 = vsub.f32 %v249_v54, %v249_v54  ;;  %v343_v63 = vsub.f32 %v5815_v47, %v342_v59 }
  0x9f   : > { %v331_v57 = vsub.f32 %v243_v55, %v243_v55  ;;  %5057 = vmatprep.mubr.msk.f32.mxu1 %vm238_vm0, %v5804_v43  ;;  %5075 = vmatpush3.msra.mxu1 %v5707_v3  ;;  %v323_v58 = vsub.f32 %v321_v50, %v322_v53 }
  0xa0   : > { %5076 = vmatprep.subr.mxu1 %v5710_v4  ;;  %v352_v0 = vand.u32 4294901760, %v351_v56  ;;  %v344_v2 = vand.u32 4294901760, %v343_v63 }
  0xa1   : > { %v332_v60 = vand.u32 4294901760, %v331_v57  ;;  %5077 = vmatpush3.msra.mxu1 %v5710_v4  ;;  %v324_v61 = vand.u32 4294901760, %v323_v58 }
  0xa2   : > { %5058 = vmatmul.mubr.msk.f32.gmra.mxu1 %vm238_vm0, %v5820_v51  ;;  %5078 = vmatprep.subr.mxu1 %v5723_v7  ;;  %v353_v5 = vsub.f32 %v351_v56, %v352_v0 }
  0xa3   : > { %5040 = vmatprep.mubr.f32.mxu0 %v324_v61  ;;  %5079 = vmatpush3.msra.mxu1 %v5723_v7  ;;  %v333_v62 = vsub.f32 %v331_v57, %v332_v60 }
  0xa4   : > { %5082 = vmatprep.mubr.f32.mxu1 %v322_v53  ;;  %5080 = vmatprep.subr.mxu1 %v5726_v8  ;;  %v354_v6 = vand.u32 4294901760, %v353_v5 }
  0xa5   : > { %5081 = vmatpush3.msra.mxu1 %v5726_v8  ;;  %v334_v1 = vand.u32 4294901760, %v333_v62 }
  0xa6   : > { %5083 = vmatmul.mubr.f32.vlgmr.msra.gmra.mxu1 %v332_v60  ;;  %5102 = vmatprep.subr.mxu1 %v5707_v3 }
  0xa7   : > { %5041 = vmatmul.mubr.f32.vlgmr.msra.gmra.mxu0 %v334_v1  ;;  %5085 = vmatprep.mubr.f32.mxu1 %v342_v59 }
  0xa8   : > { %5061 = vmatpush3.msra.mxu0 %v5730_v9  ;;  %5103 = vmatpush3.msra.mxu1 %v5707_v3  ;;  %v865_v3 = vld [vmem:[%s6446_s2] sm:$0xff] }
  0xa9   : > { %5043 = vmatprep.mubr.f32.mxu0 %v344_v2  ;;  %5062 = vmatprep.subr.mxu0 %v5734_v10 }
  0xaa   : > { %5104 = vmatprep.subr.mxu1 %v5710_v4  ;;  %5063 = vmatpush3.msra.mxu0 %v5734_v10 }
  0xab   : > { %5105 = vmatpush3.msra.mxu1 %v5710_v4  ;;  %5064 = vmatprep.subr.mxu0 %v5739_v11  ;;  %v5887_v4 = vand.u32 4294901760, %v865_v3 }
  0xac   : > { %5086 = vmatmul.mubr.f32.gmra.mxu1 %v352_v0  ;;  %5106 = vmatprep.subr.mxu1 %v5723_v7 }
  0xad   : > { %5044 = vmatmul.mubr.f32.gmra.mxu0 %v354_v6  ;;  %5107 = vmatpush3.msra.mxu1 %v5723_v7  ;;  %v5890_v7 = vsub.f32 %v865_v3, %v5887_v4 }
  0xae   : > { %5065 = vmatpush3.msra.mxu0 %v5739_v11  ;;  %5110 = vmatprep.mubr.msk.f32.mxu1 %vm238_vm0, %v5807_v44 }
  0xaf   : > { %5066 = vmatprep.subr.mxu0 %v5743_v12  ;;  %5068 = vmatprep.mubr.f32.mxu0 %v321_v50 }
  0xb0   : > { %5108 = vmatprep.subr.mxu1 %v5726_v8  ;;  %5067 = vmatpush3.msra.mxu0 %v5743_v12 }
  0xb1   : > { %5109 = vmatpush3.msra.mxu1 %v5726_v8  ;;  %5088 = vmatprep.subr.mxu0 %v5747_v13  ;;  %v5895_v8 = vand.u32 4294901760, %v5890_v7 }
  0xb2   : > { %5111 = vmatmul.mubr.msk.f32.vlgmr.msra.gmra.mxu1 %vm238_vm0, %v5823_v52  ;;  %5069 = vmatmul.mubr.f32.vlgmr.msra.gmra.mxu0 %v331_v57 }
  0xb3   : > { %5089 = vmatpush3.msra.mxu0 %v5747_v13  ;;  %5113 = vmatprep.mubr.msk.f32.mxu1 %vm238_vm0, %v5804_v43  ;;  %v1019_v9 = vsub.f32 %v5890_v7, %v5895_v8 }
  0xb4   : > { %5071 = vmatprep.mubr.f32.mxu0 %v5815_v47  ;;  %5090 = vmatprep.subr.mxu0 %v5750_v14 }
  0xb5   : > { %5091 = vmatpush3.msra.mxu0 %v5750_v14  ;;  %v1020_v10 = vand.u32 4294901760, %v1019_v9 }
  0xb6   : > { %5092 = vmatprep.subr.mxu0 %v5771_v19  ;;  %5114 = vmatmul.mubr.msk.f32.gmra.mxu1 %vm238_vm0, %v5820_v51 }
  0xb7   : > { %5072 = vmatmul.mubr.f32.gmra.mxu0 %v351_v56  ;;  %5124 = vmatprep.subr.mxu1 %v1020_v10 }
  0xb8   : > { %5093 = vmatpush3.msra.mxu0 %v5771_v19  ;;  %5096 = vmatprep.mubr.msk.f32.mxu0 %vm238_vm0, %v5807_v44 }
  0xb9   : > { %5094 = vmatprep.subr.mxu0 %v5782_v24  ;;  %5125 = vmatpush3.msra.mxu1 %v1020_v10 }
  0xba   : > { %5095 = vmatpush3.msra.mxu0 %v5782_v24  ;;  %5140 = vmatprep.subr.mxu1 %v5887_v4 }
  0xbb   : > { %5097 = vmatmul.mubr.msk.f32.vlgmr.msra.gmra.mxu0 %vm238_vm0, %v5823_v52  ;;  %5116 = vmatprep.subr.mxu0 %v5887_v4 }
  0xbc   : > { %5099 = vmatprep.mubr.msk.f32.mxu0 %vm238_vm0, %v5804_v43  ;;  %5117 = vmatpush3.msra.mxu0 %v5887_v4  ;;  %v1469_v43 = vsel %vm1467_vm5, %v207_v34, 0 }
  0xbd   : > { %5132 = vmatprep.subr.mxu0 %v5890_v7  ;;  %v5904_v50 = vand.u32 4294901760, %v1469_v43 }
  0xbf   : > { %5100 = vmatmul.mubr.msk.f32.gmra.mxu0 %vm238_vm0, %v5820_v51  ;;  %v5910_v62 = vsub.f32 %v1469_v43, %v5904_v50 }
 0x15e   : > { %v5056_v11 = vpop.f32.mrf.mxu1 }
 0x160   : > { %v447_v12 = vpop.f32.mrf.mxu1 }
 0x162   : > { %v5059_v13 = vpop.f32.mrf.mxu1 }
 0x164   : > { %v459_v14 = vpop.f32.mrf.mxu1 }
 0x166   : > { %v5084_v18 = vpop.f32.mrf.mxu1 }
 0x167   : > { %v5042_v19 = vpop.f32.mrf.mxu0 }
 0x168   : > { %v643_v21 = vpop.f32.mrf.mxu1  ;;  %v454_v28 = vadd.f32 %v5056_v11, %v5042_v19 }
 0x169   : > { %v326_v20 = vpop.f32.mrf.mxu0 }
 0x16a   : > { %v448_v30 = vadd.f32 %v447_v12, %v326_v20 }
 0x16c   : > { %v5087_v24 = vpop.f32.mrf.mxu1 }
 0x16d   : > { %v5045_v23 = vpop.f32.mrf.mxu0 }
 0x16e   : > { %v659_v27 = vpop.f32.mrf.mxu1  ;;  %v466_v35 = vadd.f32 %v5059_v13, %v5045_v23  ;;  %v5922_v13 = vand.u32 4294901760, %v5910_v62 }
 0x16f   : > { %v346_v25 = vpop.f32.mrf.mxu0 }
 0x170   : > { %v460_v38 = vadd.f32 %v459_v14, %v346_v25 }
 0x172   : > { %v5070_v26 = vpop.f32.mrf.mxu0  ;;  %v5112_v32 = vpop.f32.mrf.mxu1 }
 0x173   : > { %v553_v31 = vadd.f32 %v5070_v26, %v454_v28  ;;  %v1611_v26 = vsub.f32 %v5910_v62, %v5922_v13 }
 0x174   : > { %v545_v29 = vpop.f32.mrf.mxu0  ;;  %v843_v44 = vpop.f32.mrf.mxu1 }
 0x175   : > { %v546_v36 = vadd.f32 %v545_v29, %v448_v30  ;;  %v652_v41 = vadd.f32 %v5084_v18, %v553_v31  ;;  %v2081_v29 = vpop.permute.xlu1 %2080  ;;  %v1456_v30 = vsel %vm1454_vm7, %v5763_v16, 0  ;;  %v1612_v34 = vand.u32 4294901760, %v1611_v26 }
 0x176   : > { %v5115_v54 = vpop.f32.mrf.mxu1 }
 0x177   : > { %v5073_v33 = vpop.f32.mrf.mxu0  ;;  %v644_v48 = vadd.f32 %v643_v21, %v546_v36  ;;  %v5940_v36 = vand.u32 4294901760, %v1456_v30 }
 0x178   : > { %v567_v40 = vadd.f32 %v5073_v33, %v466_v35  ;;  %v855_v2 = vpop.f32.mrf.mxu1  ;;  %v5938_v35 = vpop.permute.xlu0 %2047 }
 0x179   : > { %v559_v37 = vpop.f32.mrf.mxu0  ;;  %vm2058_vm8 = vcmp.eq.s32.totalorder %v5938_v35, %v5799_v39 }
 0x17a   : > { %v560_v46 = vadd.f32 %v559_v37, %v460_v38  ;;  %v668_v53 = vadd.f32 %v5087_v24, %v567_v40  ;;  %v1459_v37 = vsel %vm1454_vm7, %v5777_v22, 0  ;;  %v5945_v40 = vpop.permute.xlu1 %2050  ;;  %v5954_v22 = vsub.f32 %v1456_v30, %v5940_v36 }
 0x17b   : > { %v5098_v45 = vpop.f32.mrf.mxu0  ;;  %v5951_v43 = vand.u32 4294901760, %v1459_v37  ;;  %vm2059_vm9 = vcmp.eq.s32.totalorder %v5945_v40, %v5799_v39 }
 0x17c   : > { %v757_v47 = vadd.f32 %v5098_v45, %v652_v41  ;;  %v660_v59 = vadd.f32 %v659_v27, %v560_v46  ;;  %v1462_v41 = vsel %vm1454_vm7, %v5760_v15, 0  ;;  %v5967_v46 = vand.u32 4294901760, %v2081_v29 }
 0x17d   : > { %v750_v49 = vpop.f32.mrf.mxu0  ;;  %v5964_v15 = vsub.f32 %v1459_v37, %v5951_v43 }
 0x17e   : > { %v850_v51 = vadd.f32 %v5112_v32, %v757_v47  ;;  %v751_v52 = vadd.f32 %v750_v49, %v644_v48  ;;  %v5961_v45 = vpop.permute.xlu1 %2053 }
 0x17f   : > { %v5101_v55 = vpop.f32.mrf.mxu0  ;;  %vm2060_vm10 = vcmp.eq.s32.totalorder %v5961_v45, %v5799_v39  ;;  %v2712_v45 = vld [vmem:[%s6446_s2 + $0x18] sm:$0xff] }
 0x180   : > { %v871_v56 = vsel %vm866_vm6, %v850_v51, 0  ;;  %v844_v57 = vadd.f32 %v843_v44, %v751_v52  ;;  %v769_v58 = vadd.f32 %v5101_v55, %v668_v53  ;;  %v5959_v44 = vand.u32 4294901760, %v1462_v41 }
 0x181   : > { %v5907_v60 = vand.u32 4294901760, %v871_v56  ;;  %v762_v61 = vpop.f32.mrf.mxu0  ;;  %v5981_v51 = vsub.f32 %v2081_v29, %v5967_v46 }
 0x182   : > { %v868_v63 = vsel %vm866_vm6, %v844_v57, 0  ;;  %v862_v0 = vadd.f32 %v5115_v54, %v769_v58  ;;  %v763_v1 = vadd.f32 %v762_v61, %v660_v59  ;;  %v5974_v48 = vsub.f32 %v1462_v41, %v5959_v44  ;;  %v2077_v54 = vpop.permute.xlu1 %2076 }
 0x183   : > { %v956_v5 = vsub.f32 %v871_v56, %v5907_v60  ;;  %v5914_v6 = vand.u32 4294901760, %v868_v63  ;;  %v5997_v57 = vand.u32 4294901760, %v2077_v54  ;;  %v6001_v59 = vand.u32 4294901760, %v5981_v51 }
 0x184   : > { %v877_v3 = vsel %vm866_vm6, %v862_v0, 0  ;;  %v856_v9 = vadd.f32 %v855_v2, %v763_v1  ;;  %v1559_v55 = vand.u32 4294901760, %v5974_v48 }
 0x185   : > { %v957_v10 = vand.u32 4294901760, %v956_v5  ;;  %v946_v11 = vsub.f32 %v868_v63, %v5914_v6  ;;  %v5918_v12 = vand.u32 4294901760, %v877_v3  ;;  %5126 = vmatprep.mubr.f32.mxu1 %v5914_v6 }
 0x186   : > { %v874_v14 = vsel %vm866_vm6, %v856_v9, 0  ;;  %5127 = vmatmul.mubr.f32.vlgmr.msra.gmra.mxu1 %v5907_v60 }
 0x187   : > { %v976_v18 = vsub.f32 %v877_v3, %v5918_v12  ;;  %v5927_v19 = vand.u32 4294901760, %v874_v14  ;;  %v947_v20 = vand.u32 4294901760, %v946_v11  ;;  %5141 = vmatpush3.msra.mxu1 %v5887_v4  ;;  %v958_v21 = vsub.f32 %v956_v5, %v957_v10 }
 0x188   : > { %5156 = vmatprep.subr.mxu1 %v5887_v4  ;;  %v2235_v3 = vsub.f32 %v5981_v51, %v6001_v59 }
 0x189   : > { %v966_v23 = vsub.f32 %v874_v14, %v5927_v19  ;;  %5129 = vmatprep.mubr.f32.mxu1 %v5927_v19  ;;  %v948_v24 = vsub.f32 %v946_v11, %v947_v20  ;;  %v977_v25 = vand.u32 4294901760, %v976_v18  ;;  %v959_v31 = vand.u32 4294901760, %v958_v21 }
 0x18a   : > { %5130 = vmatmul.mubr.f32.gmra.mxu1 %v5918_v12 }
 0x18b   : > { %5142 = vmatprep.mubr.f32.mxu1 %v947_v20  ;;  %v949_v27 = vand.u32 4294901760, %v948_v24  ;;  %v967_v28 = vand.u32 4294901760, %v966_v23  ;;  %v978_v32 = vsub.f32 %v976_v18, %v977_v25 }
 0x18d   : > { %5118 = vmatprep.mubr.f32.mxu0 %v949_v27  ;;  %v968_v33 = vsub.f32 %v966_v23, %v967_v28  ;;  %v979_v16 = vand.u32 4294901760, %v978_v32  ;;  %v6061_v27 = vsel %vm2059_vm9, 1.0, %v5617_v42 }
 0x18e   : > { %5119 = vmatmul.mubr.f32.vlgmr.msra.gmra.mxu0 %v959_v31  ;;  %5143 = vmatmul.mubr.f32.vlgmr.msra.gmra.mxu1 %v957_v10  ;;  %v2090_v31 = vsel %vm238_vm0, %v6061_v27, 0 }
 0x18f   : > { %5133 = vmatpush3.msra.mxu0 %v5890_v7  ;;  %5145 = vmatprep.mubr.f32.mxu1 %v967_v28  ;;  %v969_v38 = vand.u32 4294901760, %v968_v33  ;;  %v1465_v7 = vsel %vm1454_vm7, %v5766_v17, 0  ;;  %v1539_v17 = vand.u32 4294901760, %v5954_v22  ;;  %v6066_v28 = vsel %vm2060_vm10, 1.0, %v5617_v42 }
 0x190   : > { %5148 = vmatprep.subr.mxu0 %v5895_v8  ;;  %5157 = vmatpush3.msra.mxu1 %v5887_v4  ;;  %v2079_v4 = vpop.permute.xlu0 %2078  ;;  %v5969_v47 = vand.u32 4294901760, %v1465_v7  ;;  %v6082_v32 = vsub.f32 %v2090_v31, %v2090_v31 }
 0x191   : > { %5121 = vmatprep.mubr.f32.mxu0 %v969_v38  ;;  %5172 = vmatprep.subr.mxu1 %v1612_v34  ;;  %v1540_v53 = vsub.f32 %v5954_v22, %v1539_v17  ;;  %v5993_v56 = vand.u32 4294901760, %v2079_v4 }
 0x192   : > { %5122 = vmatmul.mubr.f32.gmra.mxu0 %v979_v16  ;;  %5146 = vmatmul.mubr.f32.gmra.mxu1 %v977_v25  ;;  %v5986_v52 = vsub.f32 %v1465_v7, %v5969_v47 }
 0x193   : > { %5134 = vmatprep.mubr.f32.mxu0 %v946_v11  ;;  %5158 = vmatprep.mubr.f32.mxu1 %v5914_v6  ;;  %v1541_v0 = vand.u32 4294901760, %v1540_v53  ;;  %v6010_v1 = vsub.f32 %v2079_v4, %v5993_v56 }
 0x194   : > { %v5978_v49 = vpop.permute.xlu0 %2056  ;;  %v1569_v63 = vand.u32 4294901760, %v5986_v52 }
 0x195   : > { %vm2061_vm11 = vcmp.eq.s32.totalorder %v5978_v49, %v5799_v39 }
 0x196   : > { %5135 = vmatmul.mubr.f32.vlgmr.msra.gmra.mxu0 %v956_v5  ;;  %5159 = vmatmul.mubr.f32.vlgmr.msra.gmra.mxu1 %v5907_v60  ;;  %v6019_v5 = vsub.f32 %v2077_v54, %v5997_v57  ;;  %v1570_v9 = vsub.f32 %v5986_v52, %v1569_v63  ;;  %v6085_v33 = vsel %vm2061_vm11, 1.0, %v5617_v42 }
 0x197   : > { %5149 = vmatpush3.msra.mxu0 %v5895_v8  ;;  %5137 = vmatprep.mubr.f32.mxu0 %v966_v23  ;;  %v1549_v8 = vand.u32 4294901760, %v5964_v15  ;;  %v2096_v35 = vsel %vm238_vm0, %v6085_v33, 0 }
 0x198   : > { %5161 = vmatprep.mubr.f32.mxu1 %v5927_v19  ;;  %5164 = vmatprep.subr.mxu0 %v5904_v50  ;;  %v2075_v61 = vpop.permute.xlu0 %2074  ;;  %v1571_v14 = vand.u32 4294901760, %v1570_v9  ;;  %v2198_v37 = vsub.f32 %v2096_v35, %v2096_v35 }
 0x199   : > { %5173 = vmatpush3.msra.mxu1 %v1612_v34  ;;  %v1550_v58 = vsub.f32 %v5964_v15, %v1549_v8  ;;  %v6014_v2 = vand.u32 4294901760, %v2075_v61 }
 0x19a   : > { %5138 = vmatmul.mubr.f32.gmra.mxu0 %v976_v18  ;;  %5162 = vmatmul.mubr.f32.gmra.mxu1 %v5918_v12  ;;  %v6028_v18 = vand.u32 4294901760, %v6010_v1 }
 0x19b   : > { %5150 = vmatprep.mubr.f32.mxu0 %v5914_v6  ;;  %5174 = vmatprep.mubr.f32.mxu1 %v5940_v36  ;;  %v1551_v6 = vand.u32 4294901760, %v1550_v58  ;;  %v6025_v11 = vsub.f32 %v2075_v61, %v6014_v2 }
 0x19c   : > { %5188 = vmatprep.subr.mxu1 %v5904_v50  ;;  %v2242_v21 = vsub.f32 %v6010_v1, %v6028_v18 }
 0x19d   : > { %v6039_v20 = vand.u32 4294901760, %v6025_v11 }
 0x19e   : > { %5151 = vmatmul.mubr.f32.vlgmr.msra.gmra.mxu0 %v5907_v60  ;;  %5175 = vmatmul.mubr.f32.vlgmr.msra.gmra.mxu1 %v5951_v43  ;;  %v1560_v60 = vsub.f32 %v5974_v48, %v1559_v55  ;;  %v2243_v24 = vand.u32 4294901760, %v2242_v21 }
 0x19f   : > { %5165 = vmatpush3.msra.mxu0 %v5904_v50  ;;  %5153 = vmatprep.mubr.f32.mxu0 %v5927_v19  ;;  %v6031_v19 = vand.u32 4294901760, %v6019_v5  ;;  %v2256_v23 = vsub.f32 %v6025_v11, %v6039_v20 }
 0x1a0   : > { %5177 = vmatprep.mubr.f32.mxu1 %v5959_v44  ;;  %5189 = vmatpush3.msra.mxu1 %v5904_v50  ;;  %v1561_v10 = vand.u32 4294901760, %v1560_v60 }
 0x1a1   : > { %5180 = vmatprep.subr.mxu0 %v5910_v62  ;;  %5204 = vmatprep.subr.mxu1 %v5904_v50  ;;  %v2257_v29 = vand.u32 4294901760, %v2256_v23 }
 0x1a2   : > { %5154 = vmatmul.mubr.f32.gmra.mxu0 %v5918_v12  ;;  %5178 = vmatmul.mubr.f32.gmra.mxu1 %v5969_v47  ;;  %v2236_v12 = vand.u32 4294901760, %v2235_v3 }
 0x1a3   : > { %5166 = vmatprep.mubr.f32.mxu0 %v1541_v0  ;;  %5190 = vmatprep.mubr.f32.mxu1 %v1539_v17 }
 0x1a6   : > { %5167 = vmatmul.mubr.f32.vlgmr.msra.gmra.mxu0 %v1551_v6  ;;  %5191 = vmatmul.mubr.f32.vlgmr.msra.gmra.mxu1 %v1549_v8 }
 0x1a7   : > { %5181 = vmatpush3.msra.mxu0 %v5910_v62  ;;  %5205 = vmatpush3.msra.mxu1 %v5904_v50  ;;  %v2249_v62 = vsub.f32 %v6019_v5, %v6031_v19  ;;  %v6048_v50 = vsel %vm2058_vm8, 1.0, %v5617_v42  ;;  %v2179_v42 = vand.u32 4294901760, %v6082_v32 }
 0x1a8   : > { %5226 = vmatprep.subr.mxu1 %v2236_v12  ;;  %5169 = vmatprep.mubr.f32.mxu0 %v1561_v10  ;;  %v2087_v26 = vsel %vm238_vm0, %v6048_v50, 0 }
 0x1a9   : > { %5193 = vmatprep.mubr.f32.mxu1 %v1559_v55  ;;  %5196 = vmatprep.subr.mxu0 %v5922_v13  ;;  %v2250_v25 = vand.u32 4294901760, %v2249_v62  ;;  %v6069_v30 = vsub.f32 %v2087_v26, %v2087_v26  ;;  %v2180_v40 = vsub.f32 %v6082_v32, %v2179_v42 }
 0x1aa   : > { %5170 = vmatmul.mubr.f32.gmra.mxu0 %v1571_v14  ;;  %5194 = vmatmul.mubr.f32.gmra.mxu1 %v1569_v63 }
 0x1ab   : > { %5182 = vmatprep.mubr.f32.mxu0 %v5954_v22  ;;  %5206 = vmatprep.mubr.f32.mxu1 %v5940_v36  ;;  %v2169_v39 = vand.u32 4294901760, %v6069_v30  ;;  %v2181_v22 = vand.u32 4294901760, %v2180_v40 }
 0x1ae   : > { %5183 = vmatmul.mubr.f32.vlgmr.msra.gmra.mxu0 %v5964_v15  ;;  %5207 = vmatmul.mubr.f32.vlgmr.msra.gmra.mxu1 %v5951_v43  ;;  %v6168_v15 = vand.u32 4294901760, %v2712_v45 }
 0x1af   : > { %5197 = vmatpush3.msra.mxu0 %v5922_v13  ;;  %5227 = vmatpush3.msra.mxu1 %v2236_v12  ;;  %v2093_v13 = vsel %vm238_vm0, %v6066_v28, 0 }
 0x1b0   : > { %5212 = vmatprep.subr.mxu0 %v5967_v46  ;;  %5228 = vmatprep.subr.mxu1 %v2243_v24  ;;  %v6089_v34 = vsub.f32 %v2093_v13, %v2093_v13 }
 0x1b1   : > { %5229 = vmatpush3.msra.mxu1 %v2243_v24  ;;  %5185 = vmatprep.mubr.f32.mxu0 %v5974_v48 }
 0x1b2   : > { %5209 = vmatprep.mubr.f32.mxu1 %v5959_v44  ;;  %5230 = vmatprep.subr.mxu1 %v2250_v25  ;;  %v2189_v38 = vand.u32 4294901760, %v6089_v34 }
 0x1b3   : > { %5186 = vmatmul.mubr.f32.gmra.mxu0 %v5986_v52  ;;  %5210 = vmatmul.mubr.f32.gmra.mxu1 %v5969_v47 }
 0x1b4   : > { %5231 = vmatpush3.msra.mxu1 %v2250_v25  ;;  %5234 = vmatprep.mubr.msk.f32.mxu1 %vm238_vm0, %v6048_v50  ;;  %v2190_v41 = vsub.f32 %v6089_v34, %v2189_v38 }
 0x1b5   : > { %5232 = vmatprep.subr.mxu1 %v2257_v29  ;;  %5198 = vmatprep.mubr.f32.mxu0 %v5940_v36  ;;  %v2170_v36 = vsub.f32 %v6069_v30, %v2169_v39 }
 0x1b6   : > { %5233 = vmatpush3.msra.mxu1 %v2257_v29  ;;  %v2191_v7 = vand.u32 4294901760, %v2190_v41 }
 0x1b7   : > { %5254 = vmatprep.subr.mxu1 %v5967_v46  ;;  %5199 = vmatmul.mubr.f32.vlgmr.msra.gmra.mxu0 %v5951_v43  ;;  %v2171_v16 = vand.u32 4294901760, %v2170_v36  ;;  %v2199_v43 = vand.u32 4294901760, %v2198_v37 }
 0x1b8   : > { %5213 = vmatpush3.msra.mxu0 %v5967_v46  ;;  %5235 = vmatmul.mubr.msk.f32.vlgmr.msra.gmra.mxu1 %vm238_vm0, %v6061_v27 }
 0x1b9   : > { %5255 = vmatpush3.msra.mxu1 %v5967_v46  ;;  %5214 = vmatprep.subr.mxu0 %v5993_v56 }
 0x1ba   : > { %5237 = vmatprep.mubr.msk.f32.mxu1 %vm238_vm0, %v6066_v28  ;;  %5256 = vmatprep.subr.mxu1 %v5993_v56 }
 0x1bb   : > { %5215 = vmatpush3.msra.mxu0 %v5993_v56  ;;  %5257 = vmatpush3.msra.mxu1 %v5993_v56 }
 0x1bc   : > { %5201 = vmatprep.mubr.f32.mxu0 %v5959_v44  ;;  %5216 = vmatprep.subr.mxu0 %v5997_v57  ;;  %v2200_v44 = vsub.f32 %v2198_v37, %v2199_v43 }
 0x1bd   : > { %5258 = vmatprep.subr.mxu1 %v5997_v57  ;;  %5202 = vmatmul.mubr.f32.gmra.mxu0 %v5969_v47 }
 0x1be   : > { %5217 = vmatpush3.msra.mxu0 %v5997_v57  ;;  %5238 = vmatmul.mubr.msk.f32.gmra.mxu1 %vm238_vm0, %v6085_v33  ;;  %v2201_v4 = vand.u32 4294901760, %v2200_v44 }
 0x1bf   : > { %5259 = vmatpush3.msra.mxu1 %v5997_v57  ;;  %5218 = vmatprep.subr.mxu0 %v6014_v2 }
 0x1c0   : > { %5220 = vmatprep.mubr.f32.mxu0 %v2171_v16  ;;  %5260 = vmatprep.subr.mxu1 %v6014_v2 }
 0x1c1   : > { %5262 = vmatprep.mubr.f32.mxu1 %v2169_v39  ;;  %5219 = vmatpush3.msra.mxu0 %v6014_v2 }
 0x1c2   : > { %5261 = vmatpush3.msra.mxu1 %v6014_v2  ;;  %5240 = vmatprep.subr.mxu0 %v5981_v51 }
 0x1c3   : > { %5282 = vmatprep.subr.mxu1 %v5967_v46  ;;  %5221 = vmatmul.mubr.f32.vlgmr.msra.gmra.mxu0 %v2181_v22 }
 0x1c4   : > { %5241 = vmatpush3.msra.mxu0 %v5981_v51  ;;  %5263 = vmatmul.mubr.f32.vlgmr.msra.gmra.mxu1 %v2179_v42 }
 0x1c5   : > { %5283 = vmatpush3.msra.mxu1 %v5967_v46  ;;  %5223 = vmatprep.mubr.f32.mxu0 %v2191_v7  ;;  %v6171_v46 = vsub.f32 %v2712_v45, %v6168_v15 }
 0x1c6   : > { %5242 = vmatprep.subr.mxu0 %v6010_v1  ;;  %5265 = vmatprep.mubr.f32.mxu1 %v2189_v38 }
 0x1c7   : > { %5284 = vmatprep.subr.mxu1 %v5993_v56  ;;  %5243 = vmatpush3.msra.mxu0 %v6010_v1  ;;  %v6176_v47 = vand.u32 4294901760, %v6171_v46 }
 0x1c8   : > { %5285 = vmatpush3.msra.mxu1 %v5993_v56  ;;  %5244 = vmatprep.subr.mxu0 %v6019_v5 }
 0x1c9   : > { %5286 = vmatprep.subr.mxu1 %v5997_v57  ;;  %5224 = vmatmul.mubr.f32.gmra.mxu0 %v2201_v4  ;;  %v2865_v17 = vsub.f32 %v6171_v46, %v6176_v47 }
 0x1ca   : > { %5245 = vmatpush3.msra.mxu0 %v6019_v5  ;;  %5266 = vmatmul.mubr.f32.gmra.mxu1 %v2199_v43 }
 0x1cb   : > { %5287 = vmatpush3.msra.mxu1 %v5997_v57  ;;  %5246 = vmatprep.subr.mxu0 %v6025_v11  ;;  %v2866_v48 = vand.u32 4294901760, %v2865_v17 }
 0x1cc   : > { %5248 = vmatprep.mubr.f32.mxu0 %v6069_v30  ;;  %5288 = vmatprep.subr.mxu1 %v6014_v2 }
 0x1cd   : > { %5290 = vmatprep.mubr.msk.f32.mxu1 %vm238_vm0, %v6048_v50  ;;  %5247 = vmatpush3.msra.mxu0 %v6025_v11 }
 0x1ce   : > { %5289 = vmatpush3.msra.mxu1 %v6014_v2  ;;  %5268 = vmatprep.subr.mxu0 %v6001_v59 }
 0x1cf   : > { %5249 = vmatmul.mubr.f32.vlgmr.msra.gmra.mxu0 %v6082_v32  ;;  %5291 = vmatmul.mubr.msk.f32.vlgmr.msra.gmra.mxu1 %vm238_vm0, %v6061_v27 }
 0x1d0   : > { %5269 = vmatpush3.msra.mxu0 %v6001_v59  ;;  %5251 = vmatprep.mubr.f32.mxu0 %v6089_v34 }
 0x1d1   : > { %5270 = vmatprep.subr.mxu0 %v6028_v18  ;;  %5293 = vmatprep.mubr.msk.f32.mxu1 %vm238_vm0, %v6066_v28 }
 0x1d2   : > { %5271 = vmatpush3.msra.mxu0 %v6028_v18  ;;  %5304 = vmatprep.subr.mxu1 %v2866_v48 }
 0x1d3   : > { %5272 = vmatprep.subr.mxu0 %v6031_v19  ;;  %5252 = vmatmul.mubr.f32.gmra.mxu0 %v2198_v37 }
 0x1d4   : > { %5273 = vmatpush3.msra.mxu0 %v6031_v19  ;;  %5294 = vmatmul.mubr.msk.f32.gmra.mxu1 %vm238_vm0, %v6085_v33 }
 0x1d5   : > { %5274 = vmatprep.subr.mxu0 %v6039_v20  ;;  %5276 = vmatprep.mubr.msk.f32.mxu0 %vm238_vm0, %v6048_v50 }
 0x1d6   : > { %5275 = vmatpush3.msra.mxu0 %v6039_v20  ;;  %5305 = vmatpush3.msra.mxu1 %v2866_v48 }
 0x1d7   : > { %5277 = vmatmul.mubr.msk.f32.vlgmr.msra.gmra.mxu0 %vm238_vm0, %v6061_v27  ;;  %5296 = vmatprep.subr.mxu0 %v6168_v15 }
 0x1d8   : > { %5279 = vmatprep.mubr.msk.f32.mxu0 %vm238_vm0, %v6066_v28  ;;  %5297 = vmatpush3.msra.mxu0 %v6168_v15 }
 0x1d9   : > { %5312 = vmatprep.subr.mxu0 %v6171_v46  ;;  %5320 = vmatprep.subr.mxu1 %v6168_v15 }
 0x1db   : > { %5280 = vmatmul.mubr.msk.f32.gmra.mxu0 %vm238_vm0, %v6085_v33 }
 0x246   : > { %v5128_v49 = vpop.f32.mrf.mxu1 }
 0x248   : > { %v1057_v51 = vpop.f32.mrf.mxu1 }
 0x24a   : > { %v5131_v8 = vpop.f32.mrf.mxu1 }
 0x24c   : > { %v1069_v52 = vpop.f32.mrf.mxu1 }
 0x24e   : > { %v5120_v53 = vpop.f32.mrf.mxu0  ;;  %v5144_v54 = vpop.f32.mrf.mxu1 }
 0x24f   : > { %v1064_v55 = vadd.f32 %v5128_v49, %v5120_v53 }
 0x250   : > { %v951_v56 = vpop.f32.mrf.mxu0  ;;  %v1244_v57 = vpop.f32.mrf.mxu1 }
 0x251   : > { %v1058_v58 = vadd.f32 %v1057_v51, %v951_v56 }
 0x252   : > { %v5123_v59 = vpop.f32.mrf.mxu0  ;;  %v5147_v61 = vpop.f32.mrf.mxu1 }
 0x253   : > { %v1076_v63 = vadd.f32 %v5131_v8, %v5123_v59 }
 0x254   : > { %v971_v0 = vpop.f32.mrf.mxu0  ;;  %v1260_v60 = vpop.f32.mrf.mxu1 }
 0x255   : > { %v1070_v1 = vadd.f32 %v1069_v52, %v971_v0 }
 0x256   : > { %v5136_v2 = vpop.f32.mrf.mxu0  ;;  %v5160_v5 = vpop.f32.mrf.mxu1 }
 0x257   : > { %v1157_v6 = vadd.f32 %v5136_v2, %v1064_v55 }
 0x258   : > { %v1149_v3 = vpop.f32.mrf.mxu0  ;;  %v1432_v9 = vpop.f32.mrf.mxu1 }
 0x259   : > { %v1150_v10 = vadd.f32 %v1149_v3, %v1058_v58  ;;  %v1253_v11 = vadd.f32 %v5144_v54, %v1157_v6 }
 0x25a   : > { %v5139_v12 = vpop.f32.mrf.mxu0  ;;  %v5163_v14 = vpop.f32.mrf.mxu1 }
 0x25b   : > { %v1171_v18 = vadd.f32 %v5139_v12, %v1076_v63  ;;  %v1245_v19 = vadd.f32 %v1244_v57, %v1150_v10 }
 0x25c   : > { %v1163_v20 = vpop.f32.mrf.mxu0  ;;  %v1444_v21 = vpop.f32.mrf.mxu1 }
 0x25d   : > { %v1164_v62 = vadd.f32 %v1163_v20, %v1070_v1  ;;  %v1269_v50 = vadd.f32 %v5147_v61, %v1171_v18 }
 0x25e   : > { %v5152_v23 = vpop.f32.mrf.mxu0  ;;  %v5176_v24 = vpop.f32.mrf.mxu1 }
 0x25f   : > { %v1349_v25 = vadd.f32 %v5152_v23, %v1253_v11  ;;  %v1261_v26 = vadd.f32 %v1260_v60, %v1164_v62 }
 0x260   : > { %v1342_v27 = vpop.f32.mrf.mxu0  ;;  %v1649_v28 = vpop.f32.mrf.mxu1 }
 0x261   : > { %v1343_v29 = vadd.f32 %v1342_v27, %v1245_v19  ;;  %v1439_v30 = vadd.f32 %v5160_v5, %v1349_v25 }
 0x262   : > { %v5155_v31 = vpop.f32.mrf.mxu0  ;;  %v5179_v13 = vpop.f32.mrf.mxu1 }
 0x263   : > { %v1361_v32 = vadd.f32 %v5155_v31, %v1269_v50  ;;  %v1433_v33 = vadd.f32 %v1432_v9, %v1343_v29 }
 0x264   : > { %v1354_v39 = vpop.f32.mrf.mxu0  ;;  %v1661_v34 = vpop.f32.mrf.mxu1 }
 0x265   : > { %v1355_v35 = vadd.f32 %v1354_v39, %v1261_v26  ;;  %v1451_v42 = vadd.f32 %v5163_v14, %v1361_v32 }
 0x266   : > { %v5168_v36 = vpop.f32.mrf.mxu0  ;;  %v5192_v37 = vpop.f32.mrf.mxu1 }
 0x267   : > { %v1554_v38 = vadd.f32 %v5168_v36, %v1439_v30  ;;  %v1445_v40 = vadd.f32 %v1444_v21, %v1355_v35 }
 0x268   : > { %v1543_v16 = vpop.f32.mrf.mxu0  ;;  %v1836_v41 = vpop.f32.mrf.mxu1 }
 0x269   : > { %v1544_v43 = vadd.f32 %v1543_v16, %v1433_v33  ;;  %v1656_v22 = vadd.f32 %v5176_v24, %v1554_v38 }
 0x26a   : > { %v5171_v7 = vpop.f32.mrf.mxu0  ;;  %v5195_v44 = vpop.f32.mrf.mxu1 }
 0x26b   : > { %v1574_v4 = vadd.f32 %v5171_v7, %v1451_v42  ;;  %v1650_v45 = vadd.f32 %v1649_v28, %v1544_v43 }
 0x26c   : > { %v1563_v17 = vpop.f32.mrf.mxu0  ;;  %v1852_v48 = vpop.f32.mrf.mxu1 }
 0x26d   : > { %v1564_v49 = vadd.f32 %v1563_v17, %v1445_v40  ;;  %v1668_v51 = vadd.f32 %v5179_v13, %v1574_v4 }
 0x26e   : > { %v5184_v8 = vpop.f32.mrf.mxu0  ;;  %v5208_v52 = vpop.f32.mrf.mxu1 }
 0x26f   : > { %v1749_v53 = vadd.f32 %v5184_v8, %v1656_v22  ;;  %v1662_v54 = vadd.f32 %v1661_v34, %v1564_v49 }
 0x270   : > { %v1741_v55 = vpop.f32.mrf.mxu0  ;;  %v2024_v56 = vpop.f32.mrf.mxu1 }
 0x271   : > { %v1742_v57 = vadd.f32 %v1741_v55, %v1650_v45  ;;  %v1845_v58 = vadd.f32 %v5192_v37, %v1749_v53 }
 0x273   : > { %v5187_v59 = vpop.f32.mrf.mxu0  ;;  %v5211_v61 = vpop.f32.mrf.mxu1  ;;  %v1837_v63 = vadd.f32 %v1836_v41, %v1742_v57 }
 0x274   : > { %v1763_v0 = vadd.f32 %v5187_v59, %v1668_v51 }
 0x275   : > { %v1755_v60 = vpop.f32.mrf.mxu0  ;;  %v2036_v1 = vpop.f32.mrf.mxu1 }
 0x276   : > { %v1756_v2 = vadd.f32 %v1755_v60, %v1662_v54  ;;  %v1861_v5 = vadd.f32 %v5195_v44, %v1763_v0 }
 0x277   : > { %v5200_v6 = vpop.f32.mrf.mxu0 }
 0x278   : > { %v1941_v3 = vadd.f32 %v5200_v6, %v1845_v58  ;;  %v5236_v9 = vpop.f32.mrf.mxu1  ;;  %v1853_v10 = vadd.f32 %v1852_v48, %v1756_v2 }
 0x279   : > { %v1934_v11 = vpop.f32.mrf.mxu0 }
 0x27a   : > { %v6182_v12 = vadd.f32 %v5208_v52, %v1941_v3  ;;  %v1935_v14 = vadd.f32 %v1934_v11, %v1837_v63  ;;  %v2294_v18 = vpop.f32.mrf.mxu1 }
 0x27c   : > { %v6184_v19 = vadd.f32 %v2024_v56, %v1935_v14 }
 0x27d   : > { %v5203_v20 = vpop.f32.mrf.mxu0 }
 0x27e   : > { %v1953_v21 = vadd.f32 %v5203_v20, %v1861_v5  ;;  %v5239_v62 = vpop.f32.mrf.mxu1 }
 0x27f   : > { %v1946_v50 = vpop.f32.mrf.mxu0 }
 0x280   : > { %v6186_v23 = vadd.f32 %v5211_v61, %v1953_v21  ;;  %v1947_v24 = vadd.f32 %v1946_v50, %v1853_v10  ;;  %v2306_v25 = vpop.f32.mrf.mxu1 }
 0x282   : > { %v6188_v26 = vadd.f32 %v2036_v1, %v1947_v24 }
 0x283   : > { %v5222_v27 = vpop.f32.mrf.mxu0 }
 0x284   : > { %v5264_v28 = vpop.f32.mrf.mxu1  ;;  %v2301_v34 = vadd.f32 %v5236_v9, %v5222_v27 }
 0x285   : > { %v2173_v29 = vpop.f32.mrf.mxu0 }
 0x286   : > { %v2490_v30 = vpop.f32.mrf.mxu1  ;;  %v2295_v42 = vadd.f32 %v2294_v18, %v2173_v29 }
 0x289   : > { %v5225_v31 = vpop.f32.mrf.mxu0 }
 0x28a   : > { %v5267_v13 = vpop.f32.mrf.mxu1  ;;  %v2313_v40 = vadd.f32 %v5239_v62, %v5225_v31 }
 0x28b   : > { %v2193_v32 = vpop.f32.mrf.mxu0 }
 0x28c   : > { %v2506_v33 = vpop.f32.mrf.mxu1  ;;  %v2307_v43 = vadd.f32 %v2306_v25, %v2193_v32 }
 0x28f   : > { %v5250_v39 = vpop.f32.mrf.mxu0  ;;  %v5292_v37 = vpop.f32.mrf.mxu1 }
 0x290   : > { %v2400_v36 = vadd.f32 %v5250_v39, %v2301_v34  ;;  %v3320_v34 = vld [vmem:[%s6446_s2 + $0x20] sm:$0xff] }
 0x291   : > { %v2392_v35 = vpop.f32.mrf.mxu0  ;;  %v2690_v44 = vpop.f32.mrf.mxu1 }
 0x292   : > { %v2393_v16 = vadd.f32 %v2392_v35, %v2295_v42  ;;  %v2499_v7 = vadd.f32 %v5264_v28, %v2400_v36  ;;  %v6224_v36 = vand.u32 4294901760, %v3320_v34 }
 0x293   : > { %v5253_v38 = vpop.f32.mrf.mxu0 }
 0x294   : > { %v2414_v22 = vadd.f32 %v5253_v38, %v2313_v40  ;;  %v2491_v48 = vadd.f32 %v2490_v30, %v2393_v16  ;;  %v5295_v53 = vpop.f32.mrf.mxu1  ;;  %v6237_v16 = vsub.f32 %v3320_v34, %v6224_v36 }
 0x295   : > { %v2406_v41 = vpop.f32.mrf.mxu0 }
 0x296   : > { %v2407_v45 = vadd.f32 %v2406_v41, %v2307_v43  ;;  %v2515_v52 = vadd.f32 %v5267_v13, %v2414_v22  ;;  %v2702_v1 = vpop.f32.mrf.mxu1 }
 0x297   : > { %v5278_v4 = vpop.f32.mrf.mxu0 }
 0x298   : > { %v2604_v17 = vadd.f32 %v5278_v4, %v2499_v7  ;;  %v2507_v58 = vadd.f32 %v2506_v33, %v2407_v45  ;;  %v3321_v33 = vld [vmem:[%s6446_s2 + $0x38] sm:$0xff]  ;;  %v6246_v7 = vand.u32 4294901760, %v6237_v16 }
 0x299   : > { %v2597_v49 = vpop.f32.mrf.mxu0  ;;  %v6211_v39 = vand.u32 4294901760, %v3321_v33 }
 0x29a   : > { %v2697_v51 = vadd.f32 %v5292_v37, %v2604_v17  ;;  %v2598_v8 = vadd.f32 %v2597_v49, %v2491_v48  ;;  %v3319_v37 = vld [vmem:[%s6446_s2 + $0x8] sm:$0xff]  ;;  %v3493_v45 = vsub.f32 %v6237_v16, %v6246_v7 }
 0x29b   : > { %v5281_v54 = vpop.f32.mrf.mxu0  ;;  %v6222_v42 = vsub.f32 %v3321_v33, %v6211_v39  ;;  %v6239_v41 = vand.u32 4294901760, %v3319_v37 }
 0x29c   : > { %v2717_v55 = vsel %vm866_vm6, %v2697_v51, 0  ;;  %v2691_v56 = vadd.f32 %v2690_v44, %v2598_v8  ;;  %v2616_v57 = vadd.f32 %v5281_v54, %v2515_v52  ;;  %v3494_v48 = vand.u32 4294901760, %v3493_v45  ;;  %v4754_v8 = vld [vmem:[%s6447_s3 + $0x3] ss:$0 sm:$0xff]  ;;  %v5548_v52 = vld [vmem:[%s5756_s13 + $0x8] sm:$0xff] }
 0x29d   : > { %v2801_v59 = vand.u32 4294901760, %v2717_v55  ;;  %v2609_v61 = vpop.f32.mrf.mxu0  ;;  %v6234_v40 = vand.u32 4294901760, %v6222_v42  ;;  %v6249_v44 = vsub.f32 %v3319_v37, %v6239_v41  ;;  %v5549_v54 = vld [vmem:[%s5756_s13] sm:$0xff] }
 0x29e   : > { %v2714_v63 = vsel %vm866_vm6, %v2691_v56, 0  ;;  %v2709_v0 = vadd.f32 %v5295_v53, %v2616_v57  ;;  %v2610_v60 = vadd.f32 %v2609_v61, %v2507_v58  ;;  %v4579_v53 = vmul.f32 %v5548_v52, %v4754_v8  ;;  %v5550_v56 = vld [vmem:[%s5756_s13 + $0x10] sm:$0xff]  ;;  %v5551_v58 = vld [vmem:[%s5756_s13 + $0x18] sm:$0xff] }
 0x29f   : > { %v2802_v2 = vsub.f32 %v2717_v55, %v2801_v59  ;;  %v2791_v5 = vand.u32 4294901760, %v2714_v63  ;;  %v3486_v22 = vsub.f32 %v6222_v42, %v6234_v40  ;;  %v6256_v17 = vand.u32 4294901760, %v6249_v44 }
 0x2a0   : > { %v2723_v6 = vsel %vm866_vm6, %v2709_v0, 0  ;;  %v2703_v3 = vadd.f32 %v2702_v1, %v2610_v60  ;;  %v4578_v55 = vmul.f32 %v5549_v54, %v4754_v8  ;;  %v4580_v57 = vmul.f32 %v5550_v56, %v4754_v8 }
 0x2a1   : > { %v2803_v9 = vand.u32 4294901760, %v2802_v2  ;;  %v2792_v10 = vsub.f32 %v2714_v63, %v2791_v5  ;;  %v2821_v11 = vand.u32 4294901760, %v2723_v6  ;;  %5306 = vmatprep.mubr.f32.mxu1 %v2791_v5  ;;  %v3487_v4 = vand.u32 4294901760, %v3486_v22 }
 0x2a2   : > { %v2720_v14 = vsel %vm866_vm6, %v2703_v3, 0  ;;  %5307 = vmatmul.mubr.f32.vlgmr.msra.gmra.mxu1 %v2801_v59  ;;  %v3500_v49 = vsub.f32 %v6249_v44, %v6256_v17  ;;  %v4585_v61 = vsel %vm1454_vm7, %v4579_v53, 0.0  ;;  %v4582_v63 = vsel %vm1454_vm7, %v4578_v55, 0.0 }
 0x2a3   : > { %v2822_v18 = vsub.f32 %v2723_v6, %v2821_v11  ;;  %v2811_v20 = vand.u32 4294901760, %v2720_v14  ;;  %v2793_v21 = vand.u32 4294901760, %v2792_v10  ;;  %5321 = vmatpush3.msra.mxu1 %v6168_v15  ;;  %v2804_v62 = vsub.f32 %v2802_v2, %v2803_v9  ;;  %4586 = vadd.xlane.f32.xlu0 %v4585_v61 }
 0x2a4   : > { %5336 = vmatprep.subr.mxu1 %v6168_v15  ;;  %v3501_v51 = vand.u32 4294901760, %v3500_v49  ;;  %4583 = vadd.xlane.f32.xlu1 %v4582_v63  ;;  %v4588_v0 = vsel %vm1454_vm7, %v4580_v57, 0.0 }
 0x2a5   : > { %v2812_v50 = vsub.f32 %v2720_v14, %v2811_v20  ;;  %5309 = vmatprep.mubr.f32.mxu1 %v2811_v20  ;;  %v2794_v24 = vsub.f32 %v2792_v10, %v2793_v21  ;;  %v2823_v25 = vand.u32 4294901760, %v2822_v18  ;;  %v2805_v29 = vand.u32 4294901760, %v2804_v62 }
 0x2a6   : > { %5310 = vmatmul.mubr.f32.gmra.mxu1 %v2821_v11 }
 0x2a7   : > { %5322 = vmatprep.mubr.f32.mxu1 %v2793_v21  ;;  %v2795_v27 = vand.u32 4294901760, %v2794_v24  ;;  %v2813_v28 = vand.u32 4294901760, %v2812_v50  ;;  %v2824_v30 = vsub.f32 %v2822_v18, %v2823_v25  ;;  %4589 = vadd.xlane.f32.xlu0 %v4588_v0 }
 0x2a9   : > { %5298 = vmatprep.mubr.f32.mxu0 %v2795_v27  ;;  %v2814_v31 = vsub.f32 %v2812_v50, %v2813_v28  ;;  %v2825_v32 = vand.u32 4294901760, %v2824_v30 }
 0x2aa   : > { %5299 = vmatmul.mubr.f32.vlgmr.msra.gmra.mxu0 %v2805_v29  ;;  %5323 = vmatmul.mubr.f32.vlgmr.msra.gmra.mxu1 %v2803_v9 }
 0x2ab   : > { %5313 = vmatpush3.msra.mxu0 %v6171_v46  ;;  %5325 = vmatprep.mubr.f32.mxu1 %v2813_v28  ;;  %v2815_v13 = vand.u32 4294901760, %v2814_v31 }
 0x2ac   : > { %5328 = vmatprep.subr.mxu0 %v6176_v47  ;;  %5337 = vmatpush3.msra.mxu1 %v6168_v15  ;;  %v3322_v15 = vld [vmem:[%s6446_s2 + $0x50] sm:$0xff] }
 0x2ad   : > { %5301 = vmatprep.mubr.f32.mxu0 %v2815_v13  ;;  %v6203_v46 = vand.u32 4294901760, %v3322_v15 }
 0x2ae   : > { %5302 = vmatmul.mubr.f32.gmra.mxu0 %v2825_v32  ;;  %5326 = vmatmul.mubr.f32.gmra.mxu1 %v2823_v25 }
 0x2af   : > { %5314 = vmatprep.mubr.f32.mxu0 %v2792_v10  ;;  %5338 = vmatprep.mubr.f32.mxu1 %v2791_v5 }
 0x2b2   : > { %5315 = vmatmul.mubr.f32.vlgmr.msra.gmra.mxu0 %v2802_v2  ;;  %5339 = vmatmul.mubr.f32.vlgmr.msra.gmra.mxu1 %v2801_v59 }
 0x2b3   : > { %5329 = vmatpush3.msra.mxu0 %v6176_v47  ;;  %5317 = vmatprep.mubr.f32.mxu0 %v2812_v50  ;;  %v6209_v47 = vsub.f32 %v3322_v15, %v6203_v46 }
 0x2b4   : > { %5341 = vmatprep.mubr.f32.mxu1 %v2811_v20  ;;  %5344 = vmatprep.subr.mxu0 %v6203_v46 }
 0x2b5   : > { %v6219_v35 = vand.u32 4294901760, %v6209_v47 }
 0x2b6   : > { %5318 = vmatmul.mubr.f32.gmra.mxu0 %v2822_v18  ;;  %5342 = vmatmul.mubr.f32.gmra.mxu1 %v2821_v11 }
 0x2b7   : > { %5330 = vmatprep.mubr.f32.mxu0 %v2791_v5  ;;  %v3479_v38 = vsub.f32 %v6209_v47, %v6219_v35 }
 0x2b9   : > { %v3480_v43 = vand.u32 4294901760, %v3479_v38 }
 0x2ba   : > { %5331 = vmatmul.mubr.f32.vlgmr.msra.gmra.mxu0 %v2801_v59  ;;  %v4581_v59 = vmul.f32 %v5551_v58, %v4754_v8  ;;  %v4751_v8 = vld [vmem:[%s6447_s3] ss:$0 sm:$0xff] }
 0x2bb   : > { %5333 = vmatprep.mubr.f32.mxu0 %v2811_v20  ;;  %5345 = vmatpush3.msra.mxu0 %v6203_v46 }
 0x2bc   : > { %5346 = vmatprep.subr.mxu0 %v6211_v39  ;;  %5358 = vmatprep.subr.mxu1 %v3480_v43  ;;  %v4591_v60 = vsel %vm1454_vm7, %v4581_v59, 0.0 }
 0x2bd   : > { %5347 = vmatpush3.msra.mxu0 %v6211_v39  ;;  %5359 = vmatpush3.msra.mxu1 %v3480_v43 }
 0x2be   : > { %5334 = vmatmul.mubr.f32.gmra.mxu0 %v2821_v11  ;;  %5348 = vmatprep.subr.mxu0 %v6224_v36 }
 0x2bf   : > { %5349 = vmatpush3.msra.mxu0 %v6224_v36  ;;  %5360 = vmatprep.subr.mxu1 %v3487_v4 }
 0x2c0   : > { %5350 = vmatprep.subr.mxu0 %v6239_v41  ;;  %5361 = vmatpush3.msra.mxu1 %v3487_v4 }
 0x2c1   : > { %5351 = vmatpush3.msra.mxu0 %v6239_v41  ;;  %5362 = vmatprep.subr.mxu1 %v3494_v48 }
 0x2c2   : > { %5372 = vmatprep.subr.mxu0 %v6209_v47  ;;  %5363 = vmatpush3.msra.mxu1 %v3494_v48 }
 0x2c3   : > { %5364 = vmatprep.subr.mxu1 %v3501_v51  ;;  %4592 = vadd.xlane.f32.xlu1 %v4591_v60 }
 0x2c4   : > { %5365 = vmatpush3.msra.mxu1 %v3501_v51 }
 0x2c5   : > { %5386 = vmatprep.subr.mxu1 %v6203_v46 }
 0x362   : > { %v5308_v1 = vpop.f32.mrf.mxu1 }
 0x364   : > { %v2903_v2 = vpop.f32.mrf.mxu1 }
 0x366   : > { %v5311_v5 = vpop.f32.mrf.mxu1 }
 0x368   : > { %v2915_v6 = vpop.f32.mrf.mxu1 }
 0x36a   : > { %v5300_v3 = vpop.f32.mrf.mxu0  ;;  %v5324_v9 = vpop.f32.mrf.mxu1 }
 0x36b   : > { %v2910_v50 = vadd.f32 %v5308_v1, %v5300_v3 }
 0x36c   : > { %v2797_v10 = vpop.f32.mrf.mxu0  ;;  %v3090_v11 = vpop.f32.mrf.mxu1 }
 0x36d   : > { %v2904_v25 = vadd.f32 %v2903_v2, %v2797_v10 }
 0x36e   : > { %v5303_v14 = vpop.f32.mrf.mxu0  ;;  %v5327_v18 = vpop.f32.mrf.mxu1 }
 0x36f   : > { %v2922_v30 = vadd.f32 %v5311_v5, %v5303_v14 }
 0x370   : > { %v2817_v20 = vpop.f32.mrf.mxu0  ;;  %v3106_v21 = vpop.f32.mrf.mxu1 }
 0x371   : > { %v2916_v32 = vadd.f32 %v2915_v6, %v2817_v20 }
 0x372   : > { %v5316_v62 = vpop.f32.mrf.mxu0  ;;  %v5340_v28 = vpop.f32.mrf.mxu1 }
 0x373   : > { %v3003_v27 = vadd.f32 %v5316_v62, %v2910_v50 }
 0x374   : > { %v2995_v24 = vpop.f32.mrf.mxu0  ;;  %v3278_v34 = vpop.f32.mrf.mxu1 }
 0x375   : > { %v2996_v31 = vadd.f32 %v2995_v24, %v2904_v25  ;;  %v3099_v33 = vadd.f32 %v5324_v9, %v3003_v27 }
 0x376   : > { %v5319_v29 = vpop.f32.mrf.mxu0  ;;  %v5343_v51 = vpop.f32.mrf.mxu1 }
 0x377   : > { %v3017_v15 = vadd.f32 %v5319_v29, %v2922_v30  ;;  %v3091_v22 = vadd.f32 %v3090_v11, %v2996_v31 }
 0x378   : > { %v3009_v13 = vpop.f32.mrf.mxu0  ;;  %v3290_v0 = vpop.f32.mrf.mxu1 }
 0x379   : > { %v3010_v38 = vadd.f32 %v3009_v13, %v2916_v32  ;;  %v3115_v49 = vadd.f32 %v5327_v18, %v3017_v15 }
 0x37a   : > { %v5332_v37 = vpop.f32.mrf.mxu0 }
 0x37b   : > { %v3195_v43 = vadd.f32 %v5332_v37, %v3099_v33  ;;  %v3107_v56 = vadd.f32 %v3106_v21, %v3010_v38 }
 0x37c   : > { %v3188_v4 = vpop.f32.mrf.mxu0 }
 0x37d   : > { %v3285_v45 = vadd.f32 %v5340_v28, %v3195_v43  ;;  %v3189_v48 = vadd.f32 %v3188_v4, %v3091_v22  ;;  %v4755_v22 = vld [vmem:[%s6447_s3 + $0x4] ss:$0 sm:$0xff]  ;;  %v4587_v4 = vpop.xlane.xlu0 %4586 }
 0x37e   : > { %v5335_v52 = vpop.f32.mrf.mxu0 }
 0x37f   : > { %v3301_v53 = vadd.f32 %v3285_v45, %v6182_v12  ;;  %v3279_v54 = vadd.f32 %v3278_v34, %v3189_v48  ;;  %v3207_v55 = vadd.f32 %v5335_v52, %v3115_v49  ;;  %v4584_v45 = vpop.xlane.xlu1 %4583  ;;  %v4601_v48 = vadd.f32 %v4755_v22, %v4587_v4 }
 0x380   : > { %v3200_v57 = vpop.f32.mrf.mxu0  ;;  %v5618_v49 = vmov 0  }
 0x381   : > { %v3312_v58 = vadd.f32 %v4751_v8, %v3301_v53  ;;  %v3300_v59 = vadd.f32 %v3279_v54, %v6184_v19  ;;  %v3297_v61 = vadd.f32 %v5343_v51, %v3207_v55  ;;  %v3201_v63 = vadd.f32 %v3200_v57, %v3107_v56  ;;  %5547 = vset.pattern.permute.xlu1 %v5618_v49 }
 0x382   : > { %v4600_v51 = vadd.f32 %v4755_v22, %v4584_v45  ;;  %5546 = vset.pattern.permute.xlu0 %v5618_v49  ;;  %4611 = vperm.xlu1 %5547, %v4601_v48  }
 0x383   : > { %v3316_v60 = vmax.f32 %v3312_v58, 0.0  ;;  %v3311_v1 = vadd.f32 %v4751_v8, %v3300_v59  ;;  %v3303_v2 = vadd.f32 %v3297_v61, %v6186_v23  ;;  %v3291_v5 = vadd.f32 %v3290_v0, %v3201_v63  ;;  %v4593_v52 = vpop.xlane.xlu1 %4592 }
 0x384   : > { %4606 = vperm.xlu0 %5546, %v4600_v51   ;;  %v4603_v54 = vadd.f32 %v4755_v22, %v4593_v52 }
 0x385   : > { %v3334_v6 = vsel %vm238_vm0, %v3316_v60, 0  ;;  %v3315_v3 = vmax.f32 %v3311_v1, 0.0  ;;  %v3314_v9 = vadd.f32 %v4751_v8, %v3303_v2  ;;  %v3302_v12 = vadd.f32 %v3291_v5, %v6188_v26  ;;  %v4752_v60 = vld [vmem:[%s6447_s3 + $0x1] ss:$0 sm:$0xff] }
 0x386   : > { %v6281_v10 = vand.u32 4294901760, %v3334_v6 }
 0x387   : > { %v3318_v11 = vmax.f32 %v3314_v9, 0.0  ;;  %v3313_v14 = vadd.f32 %v4751_v8, %v3302_v12  ;;  %v3331_v19 = vsel %vm238_vm0, %v3315_v3, 0  ;;  %v4590_v8 = vpop.xlane.xlu0 %4589 }
 0x388   : > { %v3422_v18 = vsub.f32 %v3334_v6, %v6281_v10  ;;  %v6285_v20 = vand.u32 4294901760, %v3331_v19  ;;  %v4602_v53 = vadd.f32 %v4755_v22, %v4590_v8 }
 0x389   : > { %v3317_v21 = vmax.f32 %v3313_v14, 0.0  ;;  %v3340_v23 = vsel %vm238_vm0, %v3318_v11, 0 }
 0x38a   : > { %5366 = vmatprep.mubr.f32.mxu1 %v6285_v20  ;;  %v6289_v62 = vand.u32 4294901760, %v3340_v23  ;;  %v3412_v50 = vsub.f32 %v3331_v19, %v6285_v20  ;;  %v3423_v26 = vand.u32 4294901760, %v3422_v18  ;;  %4616 = vperm.xlu1 %5547, %v4602_v53  }
 0x38b   : > { %5367 = vmatmul.mubr.f32.vlgmr.msra.gmra.mxu1 %v6281_v10  ;;  %v3337_v24 = vsel %vm238_vm0, %v3317_v21, 0 }
 0x38c   : > { %5387 = vmatpush3.msra.mxu1 %v6203_v46  ;;  %v3431_v25 = vand.u32 4294901760, %v3337_v24  ;;  %v3413_v27 = vand.u32 4294901760, %v3412_v50  ;;  %v3442_v28 = vsub.f32 %v3340_v23, %v6289_v62  ;;  %v3424_v29 = vsub.f32 %v3422_v18, %v3423_v26 }
 0x38d   : > { %5388 = vmatprep.subr.mxu1 %v6211_v39 }
 0x38e   : > { %5369 = vmatprep.mubr.f32.mxu1 %v3431_v25  ;;  %5389 = vmatpush3.msra.mxu1 %v6211_v39  ;;  %v3414_v30 = vsub.f32 %v3412_v50, %v3413_v27  ;;  %v3432_v31 = vsub.f32 %v3337_v24, %v3431_v25  ;;  %v3443_v13 = vand.u32 4294901760, %v3442_v28  ;;  %v3425_v33 = vand.u32 4294901760, %v3424_v29 }
 0x38f   : > { %5370 = vmatmul.mubr.f32.gmra.mxu1 %v6289_v62  ;;  %5390 = vmatprep.subr.mxu1 %v6224_v36 }
 0x390   : > { %5391 = vmatpush3.msra.mxu1 %v6224_v36  ;;  %5394 = vmatprep.mubr.f32.mxu1 %v3413_v27  ;;  %v3415_v32 = vand.u32 4294901760, %v3414_v30  ;;  %v3433_v15 = vand.u32 4294901760, %v3432_v31  ;;  %v3444_v37 = vsub.f32 %v3442_v28, %v3443_v13 }
 0x391   : > { %5392 = vmatprep.subr.mxu1 %v6239_v41  ;;  %4621 = vperm.xlu1 %5547, %v4603_v54  }
 0x392   : > { %5352 = vmatprep.mubr.f32.mxu0 %v3415_v32  ;;  %5393 = vmatpush3.msra.mxu1 %v6239_v41  ;;  %v3434_v34 = vsub.f32 %v3432_v31, %v3433_v15  ;;  %v3445_v43 = vand.u32 4294901760, %v3444_v37 }
 0x393   : > { %5353 = vmatmul.mubr.f32.vlgmr.msra.gmra.mxu0 %v3425_v33  ;;  %5395 = vmatmul.mubr.f32.vlgmr.msra.gmra.mxu1 %v3423_v26 }
 0x394   : > { %5373 = vmatpush3.msra.mxu0 %v6209_v47  ;;  %5414 = vmatprep.subr.mxu1 %v6203_v46  ;;  %v3435_v38 = vand.u32 4294901760, %v3434_v34 }
 0x395   : > { %5374 = vmatprep.subr.mxu0 %v6222_v42  ;;  %5397 = vmatprep.mubr.f32.mxu1 %v3433_v15 }
 0x396   : > { %5415 = vmatpush3.msra.mxu1 %v6203_v46  ;;  %5375 = vmatpush3.msra.mxu0 %v6222_v42  ;;  %v3961_v46 = vld [vmem:[%s6446_s2 + $0x28] sm:$0xff] }
 0x397   : > { %5416 = vmatprep.subr.mxu1 %v6211_v39  ;;  %5355 = vmatprep.mubr.f32.mxu0 %v3435_v38  ;;  %v6335_v47 = vand.u32 4294901760, %v3961_v46 }
 0x398   : > { %5376 = vmatprep.subr.mxu0 %v6237_v16  ;;  %5417 = vmatpush3.msra.mxu1 %v6211_v39  ;;  %v3960_v39 = vld [vmem:[%s6446_s2 + $0x10] sm:$0xff] }
 0x399   : > { %5356 = vmatmul.mubr.f32.gmra.mxu0 %v3445_v43  ;;  %5398 = vmatmul.mubr.f32.gmra.mxu1 %v3443_v13  ;;  %v6343_v42 = vand.u32 4294901760, %v3960_v39 }
 0x39a   : > { %5377 = vmatpush3.msra.mxu0 %v6237_v16  ;;  %5418 = vmatprep.subr.mxu1 %v6224_v36 }
 0x39b   : > { %5378 = vmatprep.subr.mxu0 %v6249_v44  ;;  %5380 = vmatprep.mubr.f32.mxu0 %v3412_v50 }
 0x39c   : > { %5419 = vmatpush3.msra.mxu1 %v6224_v36  ;;  %5422 = vmatprep.mubr.f32.mxu1 %v6285_v20 }
 0x39d   : > { %5379 = vmatpush3.msra.mxu0 %v6249_v44  ;;  %5420 = vmatprep.subr.mxu1 %v6239_v41 }
 0x39e   : > { %5400 = vmatprep.subr.mxu0 %v6219_v35  ;;  %5421 = vmatpush3.msra.mxu1 %v6239_v41 }
 0x39f   : > { %5381 = vmatmul.mubr.f32.vlgmr.msra.gmra.mxu0 %v3422_v18  ;;  %5423 = vmatmul.mubr.f32.vlgmr.msra.gmra.mxu1 %v6281_v10 }
 0x3a0   : > { %5401 = vmatpush3.msra.mxu0 %v6219_v35  ;;  %5383 = vmatprep.mubr.f32.mxu0 %v3432_v31  ;;  %v6341_v35 = vsub.f32 %v3961_v46, %v6335_v47 }
 0x3a1   : > { %5402 = vmatprep.subr.mxu0 %v6234_v40  ;;  %5425 = vmatprep.mubr.f32.mxu1 %v3431_v25 }
 0x3a2   : > { %5403 = vmatpush3.msra.mxu0 %v6234_v40  ;;  %v6348_v36 = vand.u32 4294901760, %v6341_v35  ;;  %v6351_v40 = vsub.f32 %v3960_v39, %v6343_v42 }
 0x3a3   : > { %5404 = vmatprep.subr.mxu0 %v6246_v7  ;;  %5384 = vmatmul.mubr.f32.gmra.mxu0 %v3442_v28 }
 0x3a4   : > { %5405 = vmatpush3.msra.mxu0 %v6246_v7  ;;  %5426 = vmatmul.mubr.f32.gmra.mxu1 %v6289_v62  ;;  %v4121_v16 = vsub.f32 %v6341_v35, %v6348_v36  ;;  %v6358_v41 = vand.u32 4294901760, %v6351_v40 }
 0x3a5   : > { %5406 = vmatprep.subr.mxu0 %v6256_v17  ;;  %5408 = vmatprep.mubr.f32.mxu0 %v6285_v20 }
 0x3a6   : > { %5407 = vmatpush3.msra.mxu0 %v6256_v17  ;;  %v4122_v7 = vand.u32 4294901760, %v4121_v16  ;;  %v4128_v44 = vsub.f32 %v6351_v40, %v6358_v41 }
 0x3a7   : > { %5409 = vmatmul.mubr.f32.vlgmr.msra.gmra.mxu0 %v6281_v10  ;;  %5428 = vmatprep.subr.mxu0 %v6335_v47 }
 0x3a8   : > { %5411 = vmatprep.mubr.f32.mxu0 %v3431_v25  ;;  %5429 = vmatpush3.msra.mxu0 %v6335_v47  ;;  %v4129_v17 = vand.u32 4294901760, %v4128_v44 }
 0x3a9   : > { %5430 = vmatprep.subr.mxu0 %v6343_v42  ;;  %5438 = vmatprep.subr.mxu1 %v4122_v7 }
 0x3aa   : > { %5431 = vmatpush3.msra.mxu0 %v6343_v42  ;;  %5439 = vmatpush3.msra.mxu1 %v4122_v7 }
 0x3ab   : > { %5412 = vmatmul.mubr.f32.gmra.mxu0 %v6289_v62  ;;  %5448 = vmatprep.subr.mxu0 %v6341_v35 }
 0x3ac   : > { %5440 = vmatprep.subr.mxu1 %v4129_v17 }
 0x3ad   : > { %5441 = vmatpush3.msra.mxu1 %v4129_v17 }
 0x3ae   : > { %5458 = vmatprep.subr.mxu1 %v6335_v47 }
 0x44b   : > { %v5368_v55 = vpop.f32.mrf.mxu1 }
 0x44d   : > { %v3538_v56 = vpop.f32.mrf.mxu1 }
 0x44f   : > { %v5371_v57 = vpop.f32.mrf.mxu1 }
 0x451   : > { %v3550_v58 = vpop.f32.mrf.mxu1 }
 0x453   : > { %v5354_v59 = vpop.f32.mrf.mxu0  ;;  %v5396_v61 = vpop.f32.mrf.mxu1 }
 0x454   : > { %v3428_v6 = vadd.f32 %v5354_v59, %v4752_v60 }
 0x455   : > { %v3417_v63 = vpop.f32.mrf.mxu0  ;;  %v3734_v0 = vpop.f32.mrf.mxu1 }
 0x456   : > { %v3418_v3 = vadd.f32 %v4752_v60, %v3417_v63  ;;  %v3545_v11 = vadd.f32 %v5368_v55, %v3428_v6 }
 0x458   : > { %v3539_v20 = vadd.f32 %v3538_v56, %v3418_v3 }
 0x459   : > { %v5357_v1 = vpop.f32.mrf.mxu0  ;;  %v5399_v2 = vpop.f32.mrf.mxu1 }
 0x45a   : > { %v3448_v10 = vadd.f32 %v5357_v1, %v4752_v60 }
 0x45b   : > { %v3437_v5 = vpop.f32.mrf.mxu0  ;;  %v3750_v9 = vpop.f32.mrf.mxu1 }
 0x45c   : > { %v3438_v19 = vadd.f32 %v4752_v60, %v3437_v5  ;;  %v3557_v50 = vadd.f32 %v5371_v57, %v3448_v10 }
 0x45e   : > { %v3551_v25 = vadd.f32 %v3550_v58, %v3438_v19 }
 0x45f   : > { %v5382_v12 = vpop.f32.mrf.mxu0  ;;  %v5424_v21 = vpop.f32.mrf.mxu1 }
 0x460   : > { %v3644_v18 = vadd.f32 %v5382_v12, %v3545_v11 }
 0x461   : > { %v3636_v14 = vpop.f32.mrf.mxu0  ;;  %v3934_v28 = vpop.f32.mrf.mxu1 }
 0x462   : > { %v3637_v62 = vadd.f32 %v3636_v14, %v3539_v20  ;;  %v3743_v27 = vadd.f32 %v5396_v61, %v3644_v18 }
 0x463   : > { %v5385_v23 = vpop.f32.mrf.mxu0 }
 0x464   : > { %v3658_v24 = vadd.f32 %v5385_v23, %v3557_v50  ;;  %v3735_v13 = vadd.f32 %v3734_v0, %v3637_v62  ;;  %v5427_v37 = vpop.f32.mrf.mxu1 }
 0x465   : > { %v3650_v26 = vpop.f32.mrf.mxu0 }
 0x466   : > { %v3651_v30 = vadd.f32 %v3650_v26, %v3551_v25  ;;  %v3759_v34 = vadd.f32 %v5399_v2, %v3658_v24  ;;  %v3946_v45 = vpop.f32.mrf.mxu1 }
 0x467   : > { %v5410_v29 = vpop.f32.mrf.mxu0 }
 0x468   : > { %v3848_v31 = vadd.f32 %v5410_v29, %v3743_v27  ;;  %v3751_v16 = vadd.f32 %v3750_v9, %v3651_v30 }
 0x469   : > { %v3841_v32 = vpop.f32.mrf.mxu0 }
 0x46a   : > { %v3941_v15 = vadd.f32 %v5424_v21, %v3848_v31  ;;  %v3842_v33 = vadd.f32 %v3841_v32, %v3735_v13  ;;  %v4612_v32 = vpop.permute.xlu1 %4611 }
 0x46b   : > { %v5413_v38 = vpop.f32.mrf.mxu0 }
 0x46c   : > { %v3957_v43 = vmax.f32 %v3941_v15, 0.0  ;;  %v3935_v46 = vadd.f32 %v3934_v28, %v3842_v33  ;;  %v3860_v39 = vadd.f32 %v5413_v38, %v3759_v34 }
 0x46d   : > { %v3853_v7 = vpop.f32.mrf.mxu0 }
 0x46e   : > { %v3974_v44 = vsel %vm3969_vm12, %v3957_v43, 0  ;;  %v3956_v17 = vmax.f32 %v3935_v46, 0.0  ;;  %v3953_v22 = vadd.f32 %v5427_v37, %v3860_v39  ;;  %v3854_v4 = vadd.f32 %v3853_v7, %v3751_v16 }
 0x46f   : > { %v4059_v48 = vand.u32 4294901760, %v3974_v44 }
 0x470   : > { %v3971_v49 = vsel %vm3969_vm12, %v3956_v17, 0  ;;  %v3959_v51 = vmax.f32 %v3953_v22, 0.0  ;;  %v3947_v8 = vadd.f32 %v3946_v45, %v3854_v4  ;;  %v4617_v4 = vpop.permute.xlu1 %4616 }
 0x471   : > { %v4060_v52 = vsub.f32 %v3974_v44, %v4059_v48  ;;  %v4049_v53 = vand.u32 4294901760, %v3971_v49 }
 0x472   : > { %v3980_v54 = vsel %vm3969_vm12, %v3959_v51, 0  ;;  %v3958_v55 = vmax.f32 %v3947_v8, 0.0  ;;  %v4607_v8 = vpop.permute.xlu0 %4606 }
 0x473   : > { %v4061_v56 = vand.u32 4294901760, %v4060_v52  ;;  %v4050_v57 = vsub.f32 %v3971_v49, %v4049_v53  ;;  %v4079_v58 = vand.u32 4294901760, %v3980_v54  ;;  %5442 = vmatprep.mubr.f32.mxu1 %v4049_v53 }
 0x474   : > { %v3977_v59 = vsel %vm3969_vm12, %v3958_v55, 0  ;;  %5443 = vmatmul.mubr.f32.vlgmr.msra.gmra.mxu1 %v4059_v48 }
 0x475   : > { %v4080_v61 = vsub.f32 %v3980_v54, %v4079_v58  ;;  %v4069_v63 = vand.u32 4294901760, %v3977_v59  ;;  %5459 = vmatpush3.msra.mxu1 %v6335_v47  ;;  %v4051_v0 = vand.u32 4294901760, %v4050_v57  ;;  %v4062_v60 = vsub.f32 %v4060_v52, %v4061_v56 }
 0x476   : > { %5460 = vmatprep.subr.mxu1 %v6343_v42 }
 0x477   : > { %v4070_v1 = vsub.f32 %v3977_v59, %v4069_v63  ;;  %5445 = vmatprep.mubr.f32.mxu1 %v4069_v63  ;;  %v4052_v2 = vsub.f32 %v4050_v57, %v4051_v0  ;;  %5461 = vmatpush3.msra.mxu1 %v6343_v42  ;;  %v4081_v5 = vand.u32 4294901760, %v4080_v61  ;;  %v4063_v9 = vand.u32 4294901760, %v4062_v60 }
 0x478   : > { %5446 = vmatmul.mubr.f32.gmra.mxu1 %v4079_v58  ;;  %5478 = vmatprep.subr.mxu1 %v6335_v47 }
 0x479   : > { %5462 = vmatprep.mubr.f32.mxu1 %v4051_v0  ;;  %v4053_v6 = vand.u32 4294901760, %v4052_v2  ;;  %v4071_v3 = vand.u32 4294901760, %v4070_v1  ;;  %v4082_v12 = vsub.f32 %v4080_v61, %v4081_v5 }
 0x47b   : > { %5432 = vmatprep.mubr.f32.mxu0 %v4053_v6  ;;  %v4072_v10 = vsub.f32 %v4070_v1, %v4071_v3  ;;  %v4083_v14 = vand.u32 4294901760, %v4082_v12 }
 0x47c   : > { %5433 = vmatmul.mubr.f32.vlgmr.msra.gmra.mxu0 %v4063_v9  ;;  %5463 = vmatmul.mubr.f32.vlgmr.msra.gmra.mxu1 %v4061_v56 }
 0x47d   : > { %5449 = vmatpush3.msra.mxu0 %v6341_v35  ;;  %5465 = vmatprep.mubr.f32.mxu1 %v4071_v3  ;;  %v4073_v11 = vand.u32 4294901760, %v4072_v10 }
 0x47e   : > { %5450 = vmatprep.subr.mxu0 %v6351_v40  ;;  %5479 = vmatpush3.msra.mxu1 %v6335_v47 }
 0x47f   : > { %5435 = vmatprep.mubr.f32.mxu0 %v4073_v11  ;;  %5451 = vmatpush3.msra.mxu0 %v6351_v40 }
 0x480   : > { %5436 = vmatmul.mubr.f32.gmra.mxu0 %v4083_v14  ;;  %5466 = vmatmul.mubr.f32.gmra.mxu1 %v4081_v5 }
 0x481   : > { %5452 = vmatprep.mubr.f32.mxu0 %v4050_v57  ;;  %5482 = vmatprep.mubr.f32.mxu1 %v4049_v53 }
 0x482   : > { %5480 = vmatprep.subr.mxu1 %v6343_v42  ;;  %5468 = vmatprep.subr.mxu0 %v6348_v36 }
 0x483   : > { %5481 = vmatpush3.msra.mxu1 %v6343_v42 }
 0x484   : > { %5453 = vmatmul.mubr.f32.vlgmr.msra.gmra.mxu0 %v4060_v52  ;;  %5483 = vmatmul.mubr.f32.vlgmr.msra.gmra.mxu1 %v4059_v48 }
 0x485   : > { %5469 = vmatpush3.msra.mxu0 %v6348_v36  ;;  %5455 = vmatprep.mubr.f32.mxu0 %v4070_v1  ;;  %v4753_v36 = vld [vmem:[%s6447_s3 + $0x2] ss:$0 sm:$0xff]  ;;  %v4622_v1 = vpop.permute.xlu1 %4621 }
 0x486   : > { %5485 = vmatprep.mubr.f32.mxu1 %v4069_v63  ;;  %5470 = vmatprep.subr.mxu0 %v6358_v41 }
 0x487   : > { %5471 = vmatpush3.msra.mxu0 %v6358_v41 }
 0x488   : > { %5456 = vmatmul.mubr.f32.gmra.mxu0 %v4080_v61  ;;  %5486 = vmatmul.mubr.f32.gmra.mxu1 %v4079_v58 }
 0x489   : > { %5472 = vmatprep.mubr.f32.mxu0 %v4049_v53 }
 0x48c   : > { %5473 = vmatmul.mubr.f32.vlgmr.msra.gmra.mxu0 %v4059_v48 }
 0x48d   : > { %5475 = vmatprep.mubr.f32.mxu0 %v4069_v63 }
 0x490   : > { %5476 = vmatmul.mubr.f32.gmra.mxu0 %v4079_v58 }
 0x534   : > { %v5444_v47 = vpop.f32.mrf.mxu1 }
 0x536   : > { %v4166_v35 = vpop.f32.mrf.mxu1 }
 0x538   : > { %v5447_v40 = vpop.f32.mrf.mxu1 }
 0x53a   : > { %v4178_v42 = vpop.f32.mrf.mxu1 }
 0x53c   : > { %v5434_v19 = vpop.f32.mrf.mxu0  ;;  %v5464_v18 = vpop.f32.mrf.mxu1 }
 0x53d   : > { %v4066_v62 = vadd.f32 %v5434_v19, %v4753_v36 }
 0x53e   : > { %v4055_v20 = vpop.f32.mrf.mxu0  ;;  %v4356_v21 = vpop.f32.mrf.mxu1 }
 0x53f   : > { %v4056_v26 = vadd.f32 %v4753_v36, %v4055_v20  ;;  %v4173_v28 = vadd.f32 %v5444_v47, %v4066_v62 }
 0x540   : > { %v5437_v23 = vpop.f32.mrf.mxu0  ;;  %v5467_v41 = vpop.f32.mrf.mxu1 }
 0x541   : > { %v4086_v27 = vadd.f32 %v5437_v23, %v4753_v36  ;;  %v4167_v13 = vadd.f32 %v4166_v35, %v4056_v26 }
 0x542   : > { %v4075_v50 = vpop.f32.mrf.mxu0  ;;  %v4372_v24 = vpop.f32.mrf.mxu1 }
 0x543   : > { %v4076_v30 = vadd.f32 %v4753_v36, %v4075_v50  ;;  %v4185_v37 = vadd.f32 %v5447_v40, %v4086_v27 }
 0x544   : > { %v5454_v25 = vpop.f32.mrf.mxu0  ;;  %v5484_v15 = vpop.f32.mrf.mxu1 }
 0x545   : > { %v4268_v31 = vadd.f32 %v5454_v25, %v4173_v28  ;;  %v4179_v46 = vadd.f32 %v4178_v42, %v4076_v30 }
 0x546   : > { %v4260_v29 = vpop.f32.mrf.mxu0  ;;  %v4548_v16 = vpop.f32.mrf.mxu1 }
 0x547   : > { %v4261_v34 = vadd.f32 %v4260_v29, %v4167_v13  ;;  %v4365_v39 = vadd.f32 %v5464_v18, %v4268_v31 }
 0x548   : > { %v5457_v33 = vpop.f32.mrf.mxu0  ;;  %v5487_v52 = vpop.f32.mrf.mxu1 }
 0x549   : > { %v4282_v43 = vadd.f32 %v5457_v33, %v4185_v37  ;;  %v4357_v22 = vadd.f32 %v4356_v21, %v4261_v34 }
 0x54a   : > { %v4274_v38 = vpop.f32.mrf.mxu0  ;;  %v4560_v60 = vpop.f32.mrf.mxu1 }
 0x54b   : > { %v4275_v44 = vadd.f32 %v4274_v38, %v4179_v46  ;;  %v4381_v51 = vadd.f32 %v5467_v41, %v4282_v43 }
 0x54c   : > { %v5474_v7 = vpop.f32.mrf.mxu0 }
 0x54d   : > { %v4464_v17 = vadd.f32 %v5474_v7, %v4365_v39  ;;  %v4373_v56 = vadd.f32 %v4372_v24, %v4275_v44 }
 0x54e   : > { %v4457_v45 = vpop.f32.mrf.mxu0 }
 0x54f   : > { %v4555_v48 = vadd.f32 %v5484_v15, %v4464_v17  ;;  %v4458_v49 = vadd.f32 %v4457_v45, %v4357_v22 }
 0x550   : > { %v5477_v53 = vpop.f32.mrf.mxu0 }
 0x551   : > { %v4625_v54 = vadd.f32 %v4612_v32, %v4555_v48  ;;  %v4476_v55 = vadd.f32 %v5477_v53, %v4381_v51  ;;  %v4549_v57 = vadd.f32 %v4548_v16, %v4458_v49 }
 0x552   : > { %v4469_v58 = vpop.f32.mrf.mxu0 }
 0x553   : > { %v4629_v59 = vmul.f32 0.5, %v4625_v54  ;;  %v4567_v61 = vadd.f32 %v5487_v52, %v4476_v55  ;;  %v4470_v63 = vadd.f32 %v4469_v58, %v4373_v56  ;;  %v4624_v0 = vadd.f32 %v4607_v8, %v4549_v57 }
 0x555   : > { %4633 = vst [vmem:[%s191_s11 + $0x8] sm:$0xff] %v4629_v59  ;;  %v4627_v2 = vadd.f32 %v4622_v1, %v4567_v61  ;;  %v4561_v5 = vadd.f32 %v4560_v60, %v4470_v63  ;;  %v4628_v6 = vmul.f32 0.5, %v4624_v0 }
 0x557   : > { %v4631_v3 = vmul.f32 0.5, %v4627_v2  ;;  %v4626_v9 = vadd.f32 %v4617_v4, %v4561_v5  ;;  %4632 = vst [vmem:[%s191_s11] sm:$0xff] %v4628_v6 }
 0x559   : > { %4635 = vst [vmem:[%s191_s11 + $0x18] sm:$0xff] %v4631_v3  ;;  %v4630_v12 = vmul.f32 0.5, %v4626_v9 }
 0x55b   : > { %4634 = vst [vmem:[%s191_s11 + $0x10] sm:$0xff] %v4630_v12 }
 0x55c   : > { %5565 = shalt.err (!%p5562_p3)
}
 0x55d   : > { %s5566_s30 = scalar_lea.hbm %s6398_s22, 512  ;;  %s5570_s7 = scalar_lea.hbm %s6448_s4, 1024 }
 0x55e   : > { %p5567_p4 = scmp.ne.s32.totalorder %s6398_s22, %s5566_s30  ;;  %p5571_p9 = scmp.lt.s32.totalorder %s6398_s22, %s6448_s4 }
 0x55f   : > { %p5572_p10 = scmp.lt.s32.totalorder %s5570_s7, %s5566_s30 }
 0x560   : > { %p5568_p7 = pnand %p5567_p4, %p5685_p5 }
 0x561   : > { %p5573_p11 = por %p5572_p10, %p5571_p9 }
 0x562   : > { %p5569_p8 = pneg %p5568_p7 }
 0x564   : > { %p5574_p12 = pnand %p5573_p11, %p5569_p8 }
 0x566   : > { %5577 = shalt.err (!%p5574_p12)
}
 0x567   : > { %s5620_s10 = smov 128   ;;  %s5621_s11 = smov 8  }
 0x568   : > { %5496 = dma.vmem_to_hbm [thread:$0]  (%p5685_p5), %s6400_s12, 512, %s6398_s22, %s6404_s23, %s5620_s10, %s5620_s10, %s5621_s11  }
 0x569 PF: > { %p5502_p13 = scmp.ge.s32.totalorder %s5612_s18, 2  ;;  %s4665_s14 = sand.u32 1, %s5600_s15  }
 0x56a   : > { %s4666_s13 = scalar_lea.sflag [#allocation3], %s4665_s14 }
 0x56b   : > { %p5499_p0 = pnand %p5502_p13, %p5689_p6 }
 0x56d   : > { %p5500_p1 = pneg %p5499_p0 }
 0x56f   : > { %5595 = dma.done.wait (%p5500_p1), %s4666_s13, 512  }
 0x570   : > { %5597 = vsyncadd (%p5500_p1), %s4666_s13, 4294966784  ;;  %p14_p2 = scmp.ge.s32.totalorder %s5672_s21, 4   ;;  %s6451_s15 = smov %s5604_s16 }
 0x571   : > { %s6452_s16 = smov %s5608_s17  ;;  %s6453_s17 = smov %s5683_s24 }
 0x572   : > { %s6454_s18 = smov %s5672_s21  ;;  %16 = sbr.rel (!%p14_p2) target bundleno = 3 (0x3), region = 71 }
 0x577   :  { %4671 = vsyncpa [#allocation3], 1 }
 0x578   :  { %4673 = vsyncpa [#allocation3 + $0x1], 1 }

// kernel: tpu_custom_call.1
= control target key start
LH: loop header
LB: loop body
LE: loop exit
PB: predicated region body
PF: predicated region fallthrough
CT: control target
= control target key end

     0   :  { %9 = vsyncpa [#allocation3], 0  ;;  %s1690_s0 = inlined_call_operand.vmem [shape: f32[64,6], index: 0, kind: input, shape index: {}]   ;;  %s1691_s1 = inlined_call_operand.vmem [shape: f32[32,16], index: 1, kind: input, shape index: {}]   ;;  %s1692_s2 = inlined_call_operand.vmem [shape: f32[32,384], index: 2, kind: input, shape index: {}]   ;;  %s1693_s3 = inlined_call_operand.vmem [shape: f32[1,640], index: 3, kind: input, shape index: {}]   ;;  %s1694_s4 = inlined_call_operand.hbm [shape: f32[64,128], index: 4, kind: output, shape index: {}]  }
   0x1   :  { %11 = vsyncpa [#allocation3 + $0x1], 0  ;;  %s1483_s15 = smov 0   ;;  %s1485_s16 = smov 0  }
   0x2   :  { %s1487_s17 = smov 0   ;;  %s1489_s18 = smov 0  }
   0x3 LB: > { %s1504_s19 = sadd.s32 4294967295, %s1448_s18   ;;  %s1152_s20 = sadd.s32 4294967294, %s1448_s18   ;;  %s1448_s18 = sphi %s1489_s18, %s1700_s18   ;;  %s1444_s17 = sphi %s1487_s17, %s1699_s17   ;;  %s1440_s16 = sphi %s1485_s16, %s1698_s16   ;;  %s1436_s15 = sphi %s1483_s15, %s1697_s15  }
   0x4   : > { %s1508_s21 = sadd.s32 1, %s1448_s18   ;;  %s113_s22 = sadd.s32 1, %s1444_s17 }
   0x5   : > { %s110_s23 = ssub.s32 %s1448_s18, %s1508_s21  ;;  %p123_p0 = scmp.ne.s32.totalorder %s1444_s17, %s1440_s16 }
   0x6   : > { %p111_p1 = scmp.eq.s32.totalorder %s110_s23, 0  ;;  %p124_p2 = scmp.eq.s32.totalorder %s1504_s19, 1 }
   0x7   : > { %p129_p3 = scmp.ne.s32.totalorder %s1440_s16, %s1436_s15  ;;  %p130_p4 = scmp.eq.s32.totalorder %s1152_s20, 1 }
   0x8   : > { %s1519_s24 = scalar_select %p111_p1, %s1444_s17, %s113_s22  }
   0x9   : > { %p1521_p5 = por %p124_p2, %p123_p0  ;;  %p1525_p6 = por %p130_p4, %p129_p3 }
   0xa   : > { %p1155_p7 = scmp.ge.s32.totalorder %s1448_s18, 1  ;;  %p166_p8 = scmp.lt.s32.totalorder %s1448_s18, 3 }
   0xc   : > { %p167_p9 = pnand %p1155_p7, %p166_p8 }
   0xd   : > { %s1157_s27 = sshll.u32 (!%p167_p9), %s1504_s19, 2  ;;  %s1451_s14 = smov (!%p167_p9), 120  }
   0xe   : > { %170 = sbr.rel (%p167_p9) target bundleno = 992 (0x3e0), region = 36  ;;  %p193_p10 = scmp.lt.s32.totalorder (!%p167_p9), %s1157_s27, 7 }
   0xf   : > { %s189_s7 = sand.u32 (!%p167_p9), 1, %s1440_s16   ;;  %s1206_s13 = sshll.u32 (!%p167_p9), %s1504_s19, 9 }
  0x10   : > { %s1156_s10 = sshll.u32 (!%p167_p9), %s189_s7, 5  ;;  %s1646_s22 = scalar_lea.hbm (!%p167_p9), %s1694_s4, %s1206_s13 }
  0x11   : > { %s1650_s23 = scalar_lea.sflag (!%p167_p9), [#allocation3], %s189_s7 }
  0x13   : > { %v1450_v0 = vmov 4   ;;  %v237_v1 = vld [vmem:[%s1691_s1 + $0x18] sm:$0xff]  ;;  %s1702_s27 = smov (!%p193_p10, %s1157_s27), 7  ;;  %v236_v2 = vld [vmem:[%s1691_s1 + $0x10] sm:$0xff]  ;;  %v235_v3 = vld [vmem:[%s1691_s1 + $0x8] sm:$0xff]  ;;  %v1452_v17 = vmov 5   ;;  %v208_v18 = vlaneseq }
  0x14   : > { %1383 = vset.pattern.permute.xlu1 %v1450_v0  ;;  %1382 = vset.pattern.permute.xlu0 %v1450_v0  ;;  %s1158_s6 = sshll.u32 %s1702_s27, 3  ;;  %v234_v4 = vld [vmem:[%s1691_s1] sm:$0xff]  ;;  %vm238_vm0 = vcmask 261120   ;;  %v1453_v22 = vmov 0.0   ;;  %v207_v42 = vld [vmem:[%s1692_s2 + $0x30] sm:$0xf] }
  0x15   : > { %1252 = vmatprep.subr.mxu0 %v237_v1  ;;  %s196_s11 = scalar_lea.vmem %s1690_s0, %s1158_s6  ;;  %v209_v19 = vand.u32 127, %v208_v18  ;;  %v336_v41 = vld [vmem:[%s1692_s2] sm:$0xff]  ;;  %vm448_vm9 = vcmask 1043456   ;;  %vm337_vm10 = vcmask 64512   ;;  %v674_v45 = vld [vmem:[%s1692_s2 + $0x18] sm:$0xff]  ;;  %vm435_vm11 = vcmask 31744  }
  0x16   : > { %1253 = vmatpush3.msra.mxu0 %v237_v1  ;;  %v1547_v5 = vld [vmem:[%s196_s11 + $0x10] sm:$0xff]  ;;  %v1549_v6 = vld [vmem:[%s196_s11] sm:$0xff]  ;;  %v1551_v7 = vld [vmem:[%s196_s11 + $0x18] sm:$0xff]  ;;  %1266 = vmatprep.subr.mxu1 %v336_v41  ;;  %vm912_vm12 = vcmask 130048   ;;  %s1455_s27 = smov [#allocation2]  }
  0x17   : > { %1254 = vmatprep.subr.mxu0 %v236_v2  ;;  %v1332_v8 = vtrunc.f32 %v1547_v5  ;;  %v1328_v9 = vtrunc.f32 %v1549_v6  ;;  %v1334_v10 = vtrunc.f32 %v1551_v7  ;;  %v1556_v11 = vld [vmem:[%s196_s11 + $0x8] sm:$0xff]  ;;  %1267 = vmatpush3.msra.mxu1 %v336_v41  ;;  %v794_v52 = vld [vmem:[%s1692_s2 + $0x50] sm:$0xff]  ;;  %v793_v53 = vld [vmem:[%s1692_s2 + $0x38] sm:$0xff]  ;;  %s191_s11 = scalar_lea.vmem [#allocation2], %s1156_s10  ;;  %s1392_s28 = sshll.u32 %s1455_s27, 4  ;;  %s1393_s28 = int_to_ptr.vmem [resolvable:$false] %s1392_s28 }
  0x18   : > { %1255 = vmatpush3.msra.mxu0 %v236_v2  ;;  %v1330_v12 = vtrunc.f32 %v1556_v11  ;;  %1274 = vmatprep.subr.msk.mxu1 %vm448_vm9, %v207_v42  ;;  %v792_v54 = vld [vmem:[%s1692_s2 + $0x20] sm:$0xff]  ;;  %v791_v55 = vld [vmem:[%s1692_s2 + $0x8] sm:$0xff]  ;;  %s1090_s12 = sshll.u32 %s191_s11, 4  ;;  %s1394_s29 = scalar_lea.vmem %s1393_s28, 1024  ;;  %s1641_s12 = int_to_ptr.vmem [resolvable:$true] %s1090_s12 }
  0x19   : > { %1256 = vmatprep.subr.mxu0 %v235_v3  ;;  %v1333_v13 = vcvt.f32.s32 %v1332_v8  ;;  %v1329_v14 = vcvt.f32.s32 %v1328_v9  ;;  %v1335_v15 = vcvt.f32.s32 %v1334_v10  ;;  %v1199_v56 = vld [vmem:[%s1693_s3 + $0x3] ss:$0 sm:$0xff]  ;;  %s1388_s19 = scalar_lea.vmem %s1641_s12, 512  ;;  %p1395_p0 = scmp.lt.s32.totalorder %s1641_s12, %s1393_s28 }
  0x1a   : > { %1257 = vmatpush3.msra.mxu0 %v235_v3  ;;  %v1331_v16 = vcvt.f32.s32 %v1330_v12  ;;  %v1019_v57 = vmul.f32 %v1199_v56, %v1556_v11  ;;  %v1018_v58 = vmul.f32 %v1199_v56, %v1549_v6  ;;  %v1020_v59 = vmul.f32 %v1199_v56, %v1547_v5  ;;  %p1389_p11 = scmp.ne.s32.totalorder %s1641_s12, %s1388_s19  ;;  %p1396_p1 = scmp.lt.s32.totalorder %s1394_s29, %s1388_s19 }
  0x1b   : > { %1258 = vmatprep.subr.mxu0 %v234_v4  ;;  %217 = vperm.xlu1 %1383, %v1333_v13   ;;  %v1021_v60 = vmul.f32 %v1199_v56, %v1551_v7  ;;  %v1194_v56 = vld [vmem:[%s1693_s3 + $0x2] ss:$0 sm:$0xff] }
  0x1c   : > { %1259 = vmatpush3.msra.mxu0 %v234_v4  ;;  %211 = vperm.xlu0 %1382, %v1329_v14   ;;  %v1025_v61 = vsel %vm435_vm11, %v1019_v57, 0.0  ;;  %v1022_v62 = vsel %vm435_vm11, %v1018_v58, 0.0  ;;  %v1028_v63 = vsel %vm435_vm11, %v1020_v59, 0.0  ;;  %p1390_p12 = pnand %p1389_p11, %p1521_p5  ;;  %p1397_p2 = por %p1396_p1, %p1395_p0 }
  0x1d   : > { %v1031_v0 = vsel %vm435_vm11, %v1021_v60, 0.0 }
  0x1e   : > { %p1391_p13 = pneg %p1390_p12 }
  0x1f   : > { %220 = vperm.xlu1 %1383, %v1335_v15  }
  0x20   : > { %214 = vperm.xlu0 %1382, %v1331_v16   ;;  %p1398_p3 = pnand %p1397_p2, %p1391_p13 }
  0x23   : > { %571 = vrot.lane.b32.xlu1 %v237_v1, %s1451_s14 }
  0x24   : > { %1384 = vset.pattern.permute.xlu0 %v1452_v17  ;;  %1385 = vset.pattern.permute.xlu1 %v1452_v17 }
  0x25   : > { %538 = vperm.xlu0 %1384, %v1329_v14  }
  0x27   : > { %541 = vperm.xlu1 %1385, %v1331_v16  }
  0x29   : > { %569 = vrot.lane.b32.xlu0 %v236_v2, %s1451_s14 }
  0x2b   : > { %544 = vperm.xlu1 %1385, %v1333_v13   ;;  %v1188_v13 = vld [vmem:[%s1693_s3] ss:$0 sm:$0xff] }
  0x2d   : > { %567 = vrot.lane.b32.xlu0 %v235_v3, %s1451_s14 }
  0x2f   : > { %547 = vperm.xlu1 %1385, %v1335_v15  }
  0x31   : > { %565 = vrot.lane.b32.xlu0 %v234_v4, %s1451_s14 }
  0x50   : > { %1026 = vadd.xlane.f32.xlu0 %v1025_v61 }
  0x53   : > { %1023 = vadd.xlane.f32.xlu1 %v1022_v62 }
  0x54   : > { %1029 = vadd.xlane.f32.xlu0 %v1028_v63 }
  0x57   : > { %1032 = vadd.xlane.f32.xlu1 %v1031_v0 }
  0x96   : > { %v218_v20 = vpop.permute.xlu1 %217 }
  0x97   : > { %v212_v21 = vpop.permute.xlu0 %211  ;;  %vm224_vm2 = vcmp.eq.s32.totalorder %v218_v20, %v209_v19 }
  0x98   : > { %vm222_vm1 = vcmp.eq.s32.totalorder %v212_v21, %v209_v19  ;;  %v1161_v26 = vsel %vm224_vm2, 1.0, %v1453_v22 }
  0x99   : > { %v1159_v23 = vsel %vm222_vm1, 1.0, %v1453_v22 }
  0x9a   : > { %1260 = vmatprep.mubr.msk.f32.mxu0 %vm238_vm0, %v1159_v23  ;;  %v221_v24 = vpop.permute.xlu1 %220 }
  0x9b   : > { %v215_v25 = vpop.permute.xlu0 %214  ;;  %vm225_vm4 = vcmp.eq.s32.totalorder %v221_v24, %v209_v19 }
  0x9c   : > { %vm223_vm3 = vcmp.eq.s32.totalorder %v215_v25, %v209_v19  ;;  %v1162_v30 = vsel %vm225_vm4, 1.0, %v1453_v22 }
  0x9d   : > { %v1160_v27 = vsel %vm223_vm3, 1.0, %v1453_v22 }
  0x9e   : > { %1261 = vmatmul.mubr.msk.f32.vlgmr.msra.gmra.mxu0 %vm238_vm0, %v1160_v27  ;;  %v572_v28 = vpop.permute.xlu1 %571 }
  0x9f   : > { %1263 = vmatprep.mubr.msk.f32.mxu0 %vm238_vm0, %v1161_v26  ;;  %1282 = vmatprep.subr.mxu0 %v572_v28 }
  0xa0   : > { %v539_v29 = vpop.permute.xlu0 %538  ;;  %1283 = vmatpush3.msra.mxu0 %v572_v28 }
  0xa1   : > { %vm549_vm5 = vcmp.eq.s32.totalorder %v539_v29, %v209_v19 }
  0xa2   : > { %v1176_v31 = vsel %vm549_vm5, 1.0, %v1453_v22  ;;  %1264 = vmatmul.mubr.msk.f32.gmra.mxu0 %vm238_vm0, %v1162_v30  ;;  %v542_v32 = vpop.permute.xlu1 %541  ;;  %v904_v30 = vld [vmem:[%s1692_s2 + $0x28] sm:$0xff] }
  0xa3   : > { %1290 = vmatprep.mubr.msk.f32.mxu0 %vm238_vm0, %v1176_v31  ;;  %vm550_vm6 = vcmp.eq.s32.totalorder %v542_v32, %v209_v19  ;;  %v903_v31 = vld [vmem:[%s1692_s2 + $0x10] sm:$0xff]  ;;  %v1200_v32 = vld [vmem:[%s1693_s3 + $0x4] ss:$0 sm:$0xff] }
  0xa4   : > { %v570_v33 = vpop.permute.xlu0 %569  ;;  %v1177_v38 = vsel %vm550_vm6, 1.0, %v1453_v22 }
  0xa5   : > { %1284 = vmatprep.subr.mxu0 %v570_v33 }
  0xa6   : > { %1285 = vmatpush3.msra.mxu0 %v570_v33  ;;  %v545_v34 = vpop.permute.xlu1 %544 }
  0xa7   : > { %vm551_vm7 = vcmp.eq.s32.totalorder %v545_v34, %v209_v19 }
  0xa8   : > { %v568_v35 = vpop.permute.xlu0 %567  ;;  %v1178_v39 = vsel %vm551_vm7, 1.0, %v1453_v22 }
  0xa9   : > { %1286 = vmatprep.subr.mxu0 %v568_v35 }
  0xaa   : > { %1287 = vmatpush3.msra.mxu0 %v568_v35  ;;  %v548_v36 = vpop.permute.xlu1 %547 }
  0xab   : > { %vm552_vm8 = vcmp.eq.s32.totalorder %v548_v36, %v209_v19  ;;  %v1454_v36 = vmov 0  }
  0xac   : > { %v566_v37 = vpop.permute.xlu0 %565  ;;  %v1179_v40 = vsel %vm552_vm8, 1.0, %v1453_v22  ;;  %1387 = vset.pattern.permute.xlu1 %v1454_v36  ;;  %1386 = vset.pattern.permute.xlu0 %v1454_v36 }
  0xad   : > { %1288 = vmatprep.subr.mxu0 %v566_v37 }
  0xae   : > { %1289 = vmatpush3.msra.mxu0 %v566_v37 }
  0xaf   : > { %1291 = vmatmul.mubr.msk.f32.vlgmr.msra.gmra.mxu0 %vm238_vm0, %v1177_v38  ;;  %1304 = vmatprep.subr.mxu0 %v794_v52 }
  0xb0   : > { %1293 = vmatprep.mubr.msk.f32.mxu0 %vm238_vm0, %v1178_v39  ;;  %1305 = vmatpush3.msra.mxu0 %v794_v52 }
  0xb1   : > { %1306 = vmatprep.subr.mxu0 %v793_v53 }
  0xb2   : > { %1307 = vmatpush3.msra.mxu0 %v793_v53 }
  0xb3   : > { %1294 = vmatmul.mubr.msk.f32.gmra.mxu0 %vm238_vm0, %v1179_v40  ;;  %1308 = vmatprep.subr.mxu0 %v792_v54 }
  0xb4   : > { %1309 = vmatpush3.msra.mxu0 %v792_v54 }
  0xb5   : > { %1310 = vmatprep.subr.mxu0 %v791_v55 }
  0xb6   : > { %1311 = vmatpush3.msra.mxu0 %v791_v55 }
  0xd9   : > { %v1027_v33 = vpop.xlane.xlu0 %1026 }
  0xda   : > { %v1041_v35 = vadd.f32 %v1200_v32, %v1027_v33 }
  0xdc   : > { %v1024_v34 = vpop.xlane.xlu1 %1023  ;;  %1051 = vperm.xlu1 %1387, %v1041_v35  }
  0xdd   : > { %v1040_v37 = vadd.f32 %v1200_v32, %v1024_v34  ;;  %v1030_v38 = vpop.xlane.xlu0 %1029 }
  0xde   : > { %v1042_v40 = vadd.f32 %v1200_v32, %v1030_v38 }
  0xdf   : > { %1046 = vperm.xlu0 %1386, %v1040_v37  }
  0xe0   : > { %v1033_v39 = vpop.xlane.xlu1 %1032  ;;  %1056 = vperm.xlu1 %1387, %v1042_v40  }
  0xe1   : > { %v1043_v41 = vadd.f32 %v1200_v32, %v1033_v39 }
  0xe4   : > { %1061 = vperm.xlu1 %1387, %v1043_v41  }
 0x157   : > { %v1052_v55 = vpop.permute.xlu1 %1051 }
 0x15a   : > { %v1047_v61 = vpop.permute.xlu0 %1046 }
 0x15b   : > { %v1057_v57 = vpop.permute.xlu1 %1056 }
 0x15e   : > { %v1262_v43 = vpop.f32.mrf.mxu0 }
 0x160   : > { %v317_v44 = vpop.f32.mrf.mxu0 }
 0x161   : > { %1268 = vmatprep.mubr.msk.f32.mxu1 %vm337_vm10, %v317_v44 }
 0x162   : > { %v1265_v46 = vpop.f32.mrf.mxu0  ;;  %1269 = vmatmul.mubr.msk.f32.vlgmr.msra.gmra.mxu1 %vm337_vm10, %v1262_v43 }
 0x163   : > { %1275 = vmatpush3.msk.msra.mxu1 %vm448_vm9, %v207_v42  ;;  %v1189_v42 = vld [vmem:[%s1693_s3 + $0x1] ss:$0 sm:$0xff] }
 0x164   : > { %v327_v47 = vpop.f32.mrf.mxu0  ;;  %1296 = vmatprep.subr.mxu1 %v674_v45 }
 0x165   : > { %1271 = vmatprep.mubr.msk.f32.mxu1 %vm337_vm10, %v327_v47 }
 0x166   : > { %1272 = vmatmul.mubr.msk.f32.gmra.mxu1 %vm337_vm10, %v1265_v46 }
 0x167   : > { %1276 = vmatprep.mubr.msk.f32.mxu1 %vm435_vm11, %v1549_v6 }
 0x16a   : > { %1277 = vmatmul.mubr.msk.f32.vlgmr.msra.gmra.mxu1 %vm435_vm11, %v1556_v11 }
 0x16b   : > { %1297 = vmatpush3.msra.mxu1 %v674_v45  ;;  %1279 = vmatprep.mubr.msk.f32.mxu1 %vm435_vm11, %v1547_v5 }
 0x16c   : > { %1318 = vmatprep.subr.mxu1 %v904_v30 }
 0x16e   : > { %1280 = vmatmul.mubr.msk.f32.gmra.mxu1 %vm435_vm11, %v1551_v7 }
 0x16f   : > { %v1292_v48 = vpop.f32.mrf.mxu0 }
 0x171   : > { %v655_v49 = vpop.f32.mrf.mxu0 }
 0x172   : > { %1298 = vmatprep.mubr.msk.f32.mxu1 %vm337_vm10, %v655_v49 }
 0x173   : > { %v1295_v50 = vpop.f32.mrf.mxu0  ;;  %1299 = vmatmul.mubr.msk.f32.vlgmr.msra.gmra.mxu1 %vm337_vm10, %v1292_v48 }
 0x174   : > { %1319 = vmatpush3.msra.mxu1 %v904_v30 }
 0x175   : > { %v665_v51 = vpop.f32.mrf.mxu0  ;;  %1320 = vmatprep.subr.mxu1 %v903_v31 }
 0x176   : > { %1301 = vmatprep.mubr.msk.f32.mxu1 %vm337_vm10, %v665_v51  ;;  %1321 = vmatpush3.msra.mxu1 %v903_v31 }
 0x177   : > { %1302 = vmatmul.mubr.msk.f32.gmra.mxu1 %vm337_vm10, %v1295_v50 }
 0x222   : > { %v1270_v1 = vpop.f32.mrf.mxu1 }
 0x224   : > { %v416_v2 = vpop.f32.mrf.mxu1 }
 0x226   : > { %v1273_v3 = vpop.f32.mrf.mxu1 }
 0x228   : > { %v426_v4 = vpop.f32.mrf.mxu1 }
 0x22a   : > { %v1278_v6 = vpop.f32.mrf.mxu1 }
 0x22b   : > { %v524_v9 = vadd.f32 %v1278_v6, %v1270_v1 }
 0x22c   : > { %v518_v5 = vpop.f32.mrf.mxu1 }
 0x22d   : > { %v519_v11 = vadd.f32 %v518_v5, %v416_v2 }
 0x22e   : > { %v1281_v8 = vpop.f32.mrf.mxu1 }
 0x22f   : > { %v534_v15 = vadd.f32 %v1281_v8, %v1273_v3 }
 0x230   : > { %v528_v7 = vpop.f32.mrf.mxu1 }
 0x231   : > { %v529_v19 = vadd.f32 %v528_v7, %v426_v4  ;;  %v1062_v4 = vpop.permute.xlu1 %1061 }
 0x233   : > { %v1300_v10 = vpop.f32.mrf.mxu1 }
 0x234   : > { %v773_v12 = vadd.f32 %v1300_v10, %v524_v9 }
 0x235   : > { %v753_v14 = vpop.f32.mrf.mxu1 }
 0x236   : > { %v772_v16 = vadd.f32 %v753_v14, %v519_v11  ;;  %v784_v17 = vadd.f32 %v1188_v13, %v773_v12 }
 0x237   : > { %v1303_v18 = vpop.f32.mrf.mxu1 }
 0x238   : > { %v783_v20 = vadd.f32 %v1188_v13, %v772_v16  ;;  %v775_v21 = vadd.f32 %v1303_v18, %v534_v15  ;;  %v788_v25 = vmax.f32 %v784_v17, 0.0 }
 0x239   : > { %v763_v22 = vpop.f32.mrf.mxu1 }
 0x23a   : > { %v787_v23 = vmax.f32 %v783_v20, 0.0  ;;  %v774_v24 = vadd.f32 %v763_v22, %v529_v19  ;;  %v786_v26 = vadd.f32 %v1188_v13, %v775_v21 }
 0x23c   : > { %v785_v27 = vadd.f32 %v1188_v13, %v774_v24  ;;  %1312 = vmatprep.mubr.msk.f32.mxu0 %vm238_vm0, %v787_v23  ;;  %v790_v29 = vmax.f32 %v786_v26, 0.0 }
 0x23d   : > { %1313 = vmatmul.mubr.msk.f32.vlgmr.msra.gmra.mxu0 %vm238_vm0, %v788_v25 }
 0x23e   : > { %v789_v28 = vmax.f32 %v785_v27, 0.0 }
 0x240   : > { %1315 = vmatprep.mubr.msk.f32.mxu0 %vm238_vm0, %v789_v28 }
 0x241   : > { %1316 = vmatmul.mubr.msk.f32.gmra.mxu0 %vm238_vm0, %v790_v29 }
 0x2fd   : > { %v1314_v43 = vpop.f32.mrf.mxu0 }
 0x2fe   : > { %v886_v44 = vadd.f32 %v1314_v43, %v1189_v42 }
 0x2ff   : > { %v880_v45 = vpop.f32.mrf.mxu0 }
 0x300   : > { %v881_v46 = vadd.f32 %v1189_v42, %v880_v45  ;;  %v900_v49 = vmax.f32 %v886_v44, 0.0 }
 0x301   : > { %v1317_v47 = vpop.f32.mrf.mxu0 }
 0x302   : > { %v899_v48 = vmax.f32 %v881_v46, 0.0  ;;  %v896_v50 = vadd.f32 %v1317_v47, %v1189_v42 }
 0x303   : > { %v890_v51 = vpop.f32.mrf.mxu0 }
 0x304   : > { %v891_v52 = vadd.f32 %v1189_v42, %v890_v51  ;;  %1322 = vmatprep.mubr.msk.f32.mxu1 %vm912_vm12, %v899_v48  ;;  %v902_v54 = vmax.f32 %v896_v50, 0.0 }
 0x305   : > { %1323 = vmatmul.mubr.msk.f32.vlgmr.msra.gmra.mxu1 %vm912_vm12, %v900_v49 }
 0x306   : > { %v901_v53 = vmax.f32 %v891_v52, 0.0 }
 0x308   : > { %1325 = vmatprep.mubr.msk.f32.mxu1 %vm912_vm12, %v901_v53 }
 0x309   : > { %1326 = vmatmul.mubr.msk.f32.gmra.mxu1 %vm912_vm12, %v902_v54 }
 0x3c5   : > { %v1324_v58 = vpop.f32.mrf.mxu1 }
 0x3c6   : > { %v997_v59 = vadd.f32 %v1324_v58, %v1194_v56 }
 0x3c7   : > { %v991_v60 = vpop.f32.mrf.mxu1 }
 0x3c8   : > { %v1065_v62 = vadd.f32 %v1052_v55, %v997_v59  ;;  %v992_v63 = vadd.f32 %v1194_v56, %v991_v60 }
 0x3c9   : > { %v1327_v0 = vpop.f32.mrf.mxu1 }
 0x3ca   : > { %v1069_v1 = vmul.f32 0.5, %v1065_v62  ;;  %v1007_v2 = vadd.f32 %v1327_v0, %v1194_v56  ;;  %v1064_v3 = vadd.f32 %v1047_v61, %v992_v63 }
 0x3cb   : > { %v1001_v6 = vpop.f32.mrf.mxu1 }
 0x3cc   : > { %1073 = vst [vmem:[%s191_s11 + $0x8] sm:$0xff] %v1069_v1  ;;  %v1067_v5 = vadd.f32 %v1062_v4, %v1007_v2  ;;  %v1068_v8 = vmul.f32 0.5, %v1064_v3  ;;  %v1002_v7 = vadd.f32 %v1194_v56, %v1001_v6 }
 0x3ce   : > { %v1071_v9 = vmul.f32 0.5, %v1067_v5  ;;  %1072 = vst [vmem:[%s191_s11] sm:$0xff] %v1068_v8  ;;  %v1066_v10 = vadd.f32 %v1057_v57, %v1002_v7 }
 0x3d0   : > { %1075 = vst [vmem:[%s191_s11 + $0x18] sm:$0xff] %v1071_v9  ;;  %v1070_v11 = vmul.f32 0.5, %v1066_v10 }
 0x3d2   : > { %1074 = vst [vmem:[%s191_s11 + $0x10] sm:$0xff] %v1070_v11 }
 0x3d3   : > { %1401 = shalt.err (!%p1398_p3)
}
 0x3d4   : > { %s1402_s30 = scalar_lea.hbm %s1646_s22, 512  ;;  %s1406_s7 = scalar_lea.hbm %s1694_s4, 1024 }
 0x3d5   : > { %p1403_p4 = scmp.ne.s32.totalorder %s1646_s22, %s1402_s30  ;;  %p1407_p9 = scmp.lt.s32.totalorder %s1646_s22, %s1694_s4 }
 0x3d6   : > { %p1408_p10 = scmp.lt.s32.totalorder %s1406_s7, %s1402_s30 }
 0x3d7   : > { %p1404_p7 = pnand %p1403_p4, %p1521_p5 }
 0x3d8   : > { %p1409_p11 = por %p1408_p10, %p1407_p9 }
 0x3d9   : > { %p1405_p8 = pneg %p1404_p7 }
 0x3db   : > { %p1410_p12 = pnand %p1409_p11, %p1405_p8 }
 0x3dd   : > { %1413 = shalt.err (!%p1410_p12)
}
 0x3de   : > { %s1456_s10 = smov 128   ;;  %s1457_s11 = smov 8  }
 0x3df   : > { %1336 = dma.vmem_to_hbm [thread:$0]  (%p1521_p5), %s1641_s12, 512, %s1646_s22, %s1650_s23, %s1456_s10, %s1456_s10, %s1457_s11  }
 0x3e0 PF: > { %p1342_p13 = scmp.ge.s32.totalorder %s1448_s18, 2  ;;  %s1105_s13 = sand.u32 1, %s1436_s15  }
 0x3e1   : > { %s1106_s14 = scalar_lea.sflag [#allocation3], %s1105_s13 }
 0x3e2   : > { %p1339_p0 = pnand %p1342_p13, %p1525_p6 }
 0x3e4   : > { %p1340_p1 = pneg %p1339_p0 }
 0x3e6   : > { %1431 = dma.done.wait (%p1340_p1), %s1106_s14, 512  }
 0x3e7   : > { %1433 = vsyncadd (%p1340_p1), %s1106_s14, 4294966784  ;;  %p14_p2 = scmp.ge.s32.totalorder %s1508_s21, 4   ;;  %s1697_s15 = smov %s1440_s16 }
 0x3e8   : > { %s1698_s16 = smov %s1444_s17  ;;  %s1699_s17 = smov %s1519_s24 }
 0x3e9   : > { %s1700_s18 = smov %s1508_s21  ;;  %16 = sbr.rel (!%p14_p2) target bundleno = 3 (0x3), region = 71 }
 0x3ee   :  { %1111 = vsyncpa [#allocation3], 1 }
 0x3ef   :  { %1113 = vsyncpa [#allocation3 + $0x1], 1 }

</bundles_post_ra>
